<compile_context>
chip_gen: v7x
topology: tpu7x:2x2x1
jax: 0.10.0
libtpu: 0.0.40
codegen_flags: <defaults>
</compile_context>

<pallas_src>
import math
import functools

import jax
import jax.numpy as jnp
from jax import lax
from jax.experimental import pallas as pl
from jax.experimental.pallas import tpu as pltpu


# contract last dims of both operands: A (m, d) x B (n, d) -> (m, n)  (i.e. A @ B^T)
_NT_DIMS = (((1,), (1,)), ((), ()))


# --------------------------------------------------------------------------- fused kernel
def fused_kernel(x_ref, q1p_ref, q2p_ref, sp_ref, *rest, num_heads, dim_V):
    # rest = [4 + 6 + 4 + 6 + 4 weight refs] + [dec_w, dec_b] + [out_ref] + [o_scr]
    counts = (4, 6, 4, 6, 4)          # 4: (wkv,bkv,wo,bo)   6: (wq,bq,wkv,bkv,wo,bo)
    mab_w, idx = [], 0
    for c in counts:
        mab_w.append(rest[idx:idx + c])
        idx += c
    dec_w_ref, dec_b_ref = rest[idx], rest[idx + 1]
    out_ref, o_scr = rest[idx + 2], rest[idx + 3]

    ds = dim_V // num_heads
    scale = 1.0 / math.sqrt(dim_V)    # NOTE: reference scales by sqrt(dim_V), not sqrt(ds)

    def attn_heads(Qp, K, V):
        """Per-head softmax attention + residual; heads written into the VMEM slab."""
        Nq = Qp.shape[0]
        for h in range(num_heads):    # static unrolled loop, num_heads is tiny
            sl = slice(h * ds, (h + 1) * ds)
            Qh, Kh, Vh = Qp[:, sl], K[:, sl], V[:, sl]
            # Q'_h @ K'_h^T via dot_general contracting last dims (no explicit transpose)
            logits = lax.dot_general(Qh, Kh, _NT_DIMS,
                                     preferred_element_type=jnp.float32) * scale
            m = jnp.max(logits, axis=-1, keepdims=True)
            e = jnp.exp(logits - m)
            A = e * pl.reciprocal(jnp.sum(e, axis=-1, keepdims=True), approx=True)
            o_scr[0:Nq, sl] = Qh + jnp.dot(A, Vh, preferred_element_type=jnp.float32)
        return o_scr[0:Nq, :]

    def mab_core(Qp, k, wkv_ref, bkv_ref, wo_ref, bo_ref):
        """MAB with the Q projection already applied (Qp = Q Wq + bq)."""
        KV = jnp.dot(k, wkv_ref[...], preferred_element_type=jnp.float32) + bkv_ref[...]
        K, V = KV[:, :dim_V], KV[:, dim_V:]
        O = attn_heads(Qp, K, V)
        H = jnp.dot(O, wo_ref[...], preferred_element_type=jnp.float32) + bo_ref[...]
        return O + jnp.maximum(H, 0.0)

    def mab(q, k, w6):
        wq_ref, bq_ref, wkv_ref, bkv_ref, wo_ref, bo_ref = w6
        Qp = jnp.dot(q, wq_ref[...], preferred_element_type=jnp.float32) + bq_ref[...]
        return mab_core(Qp, k, wkv_ref, bkv_ref, wo_ref, bo_ref)

    x = x_ref[...].astype(jnp.float32)          # (N, dim_input) for this batch element

    # encoder: ISAB(dim_input -> dh) ; ISAB(dh -> dh)
    h1 = mab_core(q1p_ref[...], x, *mab_w[0])   # (num_inds, dh)
    y1 = mab(x, h1, mab_w[1])                   # (N, dh)
    h2 = mab_core(q2p_ref[...], y1, *mab_w[2])  # (num_inds, dh)
    y2 = mab(y1, h2, mab_w[3])                  # (N, dh)

    # decoder: Dropout(identity) -> PMA -> Dropout(identity) -> Linear
    z = mab_core(sp_ref[...], y2, *mab_w[4])    # (num_outputs, dh)
    out = jnp.dot(z, dec_w_ref[...], preferred_element_type=jnp.float32) + dec_b_ref[...]
    out_ref[...] = out.astype(out_ref.dtype)


# --------------------------------------------------------------------------- wrapper
def set_transformer_forward(X, params, num_heads, h=None):
    B, N, din = X.shape
    num_inds, dh = params["I1"].shape
    num_outputs = params["S"].shape[0]
    dim_output = params["dec_w"].shape[1]

    # One-time, batch-invariant precompute (exact: I / S are only used through fc_q,
    # and the MAB residual uses the projected Q).
    def q_pre(I, p):
        return jnp.dot(I, p["wq"], precision=lax.Precision.HIGHEST) + p["bq"]

    q1p = q_pre(params["I1"], params["isab1_mab0"])
    q2p = q_pre(params["I2"], params["isab2_mab0"])
    sp = q_pre(params["S"], params["pma_mab"])

    def pack_kv(p):
        return (jnp.concatenate([p["wk"], p["wv"]], axis=1),
                jnp.concatenate([p["bk"], p["bv"]], axis=1))

    def pack4(p):                                  # constant-Q MAB: no wq/bq needed
        wkv, bkv = pack_kv(p)
        return [wkv, bkv, p["wo"], p["bo"]]

    def pack6(p):
        wkv, bkv = pack_kv(p)
        return [p["wq"], p["bq"], wkv, bkv, p["wo"], p["bo"]]

    w_list = (pack4(params["isab1_mab0"]) + pack6(params["isab1_mab1"])
              + pack4(params["isab2_mab0"]) + pack6(params["isab2_mab1"])
              + pack4(params["pma_mab"]))

    def const2d(arr):                              # whole array, resident across the grid
        return pl.BlockSpec(arr.shape, lambda b: (0, 0))

    in_specs = (
        [pl.BlockSpec((None, N, din), lambda b: (b, 0, 0)),       # X, batch-squeezed
         const2d(q1p), const2d(q2p), const2d(sp)]
        + [const2d(a) for a in w_list]
        + [const2d(params["dec_w"]), const2d(params["dec_b"])]
    )

    max_rows = max(N, num_inds, num_outputs)
    max_rows = (max_rows + 7) // 8 * 8             # sublane-align the scratch slab

    kernel = functools.partial(fused_kernel, num_heads=num_heads, dim_V=dh)

    out = pl.pallas_call(
        kernel,
        out_shape=jax.ShapeDtypeStruct((B, num_outputs, dim_output), jnp.float32),
        grid=(B,),
        in_specs=in_specs,
        out_specs=pl.BlockSpec((None, num_outputs, dim_output), lambda b: (b, 0, 0)),
        scratch_shapes=[pltpu.VMEM((max_rows, dh), jnp.float32)],
        compiler_params=pltpu.CompilerParams(dimension_semantics=("parallel",)),
    )(X, q1p, q2p, sp, *w_list, params["dec_w"], params["dec_b"])

    # matches torch .squeeze() on the (B, num_outputs, dim_output) decoder output
    return jnp.squeeze(out), h


# --------------------------------------------------------------------------- param init
def init_linear_params(key, d_in, d_out):
    k1, k2 = jax.random.split(key)
    lim = 1.0 / math.sqrt(d_in)
    w = jax.random.uniform(k1, (d_in, d_out), jnp.float32, -lim, lim)
    b = jax.random.uniform(k2, (1, d_out), jnp.float32, -lim, lim)
    return w, b


def init_mab_params(key, d_q, d_k, d_v):
    ks = jax.random.split(key, 4)
    wq, bq = init_linear_params(ks[0], d_q, d_v)
    wk, bk = init_linear_params(ks[1], d_k, d_v)
    wv, bv = init_linear_params(ks[2], d_k, d_v)
    wo, bo = init_linear_params(ks[3], d_v, d_v)
    return dict(wq=wq, bq=bq, wk=wk, bk=bk, wv=wv, bv=bv, wo=wo, bo=bo)


def xavier_uniform(key, shape):
    fan_in, fan_out = shape[-2], shape[-1]
    lim = math.sqrt(6.0 / (fan_in + fan_out))
    return jax.random.uniform(key, shape, jnp.float32, -lim, lim)


def init_set_transformer(key, dim_input, num_outputs, dim_output,
                         num_inds, dim_hidden, num_heads):
    ks = jax.random.split(key, 9)
    params = {
        # ISAB 1: dim_input -> dim_hidden
        "I1": xavier_uniform(ks[0], (num_inds, dim_hidden)),
        "isab1_mab0": init_mab_params(ks[1], dim_hidden, dim_input, dim_hidden),
        "isab1_mab1": init_mab_params(ks[2], dim_input, dim_hidden, dim_hidden),
        # ISAB 2: dim_hidden -> dim_hidden
        "I2": xavier_uniform(ks[3], (num_inds, dim_hidden)),
        "isab2_mab0": init_mab_params(ks[4], dim_hidden, dim_hidden, dim_hidden),
        "isab2_mab1": init_mab_params(ks[5], dim_hidden, dim_hidden, dim_hidden),
        # PMA
        "S": xavier_uniform(ks[6], (num_outputs, dim_hidden)),
        "pma_mab": init_mab_params(ks[7], dim_hidden, dim_hidden, dim_hidden),
    }
    dw, db = init_linear_params(ks[8], dim_hidden, dim_output)
    params["dec_w"] = dw
    params["dec_b"] = db
    return params


# --------------------------------------------------------------------------- main
if __name__ == "__main__":
    # small shapes consistent with the module
    B, N = 2, 16
    dim_input, dim_hidden, dim_output = 3, 32, 8
    num_heads, num_inds, num_outputs = 4, 8, 1

    key = jax.random.PRNGKey(0)
    k_x, k_p = jax.random.split(key)
    X = jax.random.normal(k_x, (B, N, dim_input), jnp.float32)

    params = init_set_transformer(k_p, dim_input, num_outputs, dim_output,
                                  num_inds, dim_hidden, num_heads)

    out, h = set_transformer_forward(X, params, num_heads)
    out = jax.block_until_ready(out)
    assert out.shape == (B, dim_output), out.shape
    assert jnp.all(jnp.isfinite(out))
    assert h is None
    print("KERNEL_OK")
</pallas_src>

<mosaic_0001>
module attributes {stable_mosaic.version = 11 : i64} {
  func.func @fused_kernel(%arg0: i32, %arg1: memref<1x16x3xf32, #tpu.memory_space<vmem>>, %arg2: memref<8x32xf32, #tpu.memory_space<vmem>>, %arg3: memref<8x32xf32, #tpu.memory_space<vmem>>, %arg4: memref<1x32xf32, #tpu.memory_space<vmem>>, %arg5: memref<3x64xf32, #tpu.memory_space<vmem>>, %arg6: memref<1x64xf32, #tpu.memory_space<vmem>>, %arg7: memref<32x32xf32, #tpu.memory_space<vmem>>, %arg8: memref<1x32xf32, #tpu.memory_space<vmem>>, %arg9: memref<3x32xf32, #tpu.memory_space<vmem>>, %arg10: memref<1x32xf32, #tpu.memory_space<vmem>>, %arg11: memref<32x64xf32, #tpu.memory_space<vmem>>, %arg12: memref<1x64xf32, #tpu.memory_space<vmem>>, %arg13: memref<32x32xf32, #tpu.memory_space<vmem>>, %arg14: memref<1x32xf32, #tpu.memory_space<vmem>>, %arg15: memref<32x64xf32, #tpu.memory_space<vmem>>, %arg16: memref<1x64xf32, #tpu.memory_space<vmem>>, %arg17: memref<32x32xf32, #tpu.memory_space<vmem>>, %arg18: memref<1x32xf32, #tpu.memory_space<vmem>>, %arg19: memref<32x32xf32, #tpu.memory_space<vmem>>, %arg20: memref<1x32xf32, #tpu.memory_space<vmem>>, %arg21: memref<32x64xf32, #tpu.memory_space<vmem>>, %arg22: memref<1x64xf32, #tpu.memory_space<vmem>>, %arg23: memref<32x32xf32, #tpu.memory_space<vmem>>, %arg24: memref<1x32xf32, #tpu.memory_space<vmem>>, %arg25: memref<32x64xf32, #tpu.memory_space<vmem>>, %arg26: memref<1x64xf32, #tpu.memory_space<vmem>>, %arg27: memref<32x32xf32, #tpu.memory_space<vmem>>, %arg28: memref<1x32xf32, #tpu.memory_space<vmem>>, %arg29: memref<32x8xf32, #tpu.memory_space<vmem>>, %arg30: memref<1x8xf32, #tpu.memory_space<vmem>>, %arg31: memref<1x1x8xf32, #tpu.memory_space<vmem>>, %arg32: memref<16x32xf32, #tpu.memory_space<vmem>>) attributes {dimension_semantics = [#tpu.dimension_semantics<parallel>], iteration_bounds = array<i64: 2>, scalar_prefetch = 0 : i64, scratch_operands = 1 : i64, tpu.core_type = #tpu.core_type<tc>, window_params = [{transform_indices = @transform_0, window_bounds = array<i64: 1, 16, 3>}, {pipeline_mode = #tpu.pipeline_mode<synchronous>, transform_indices = @transform_1, window_bounds = array<i64: 8, 32>}, {pipeline_mode = #tpu.pipeline_mode<synchronous>, transform_indices = @transform_2, window_bounds = array<i64: 8, 32>}, {pipeline_mode = #tpu.pipeline_mode<synchronous>, transform_indices = @transform_3, window_bounds = array<i64: 1, 32>}, {pipeline_mode = #tpu.pipeline_mode<synchronous>, transform_indices = @transform_4, window_bounds = array<i64: 3, 64>}, {pipeline_mode = #tpu.pipeline_mode<synchronous>, transform_indices = @transform_5, window_bounds = array<i64: 1, 64>}, {pipeline_mode = #tpu.pipeline_mode<synchronous>, transform_indices = @transform_6, window_bounds = array<i64: 32, 32>}, {pipeline_mode = #tpu.pipeline_mode<synchronous>, transform_indices = @transform_7, window_bounds = array<i64: 1, 32>}, {pipeline_mode = #tpu.pipeline_mode<synchronous>, transform_indices = @transform_8, window_bounds = array<i64: 3, 32>}, {pipeline_mode = #tpu.pipeline_mode<synchronous>, transform_indices = @transform_9, window_bounds = array<i64: 1, 32>}, {pipeline_mode = #tpu.pipeline_mode<synchronous>, transform_indices = @transform_10, window_bounds = array<i64: 32, 64>}, {pipeline_mode = #tpu.pipeline_mode<synchronous>, transform_indices = @transform_11, window_bounds = array<i64: 1, 64>}, {pipeline_mode = #tpu.pipeline_mode<synchronous>, transform_indices = @transform_12, window_bounds = array<i64: 32, 32>}, {pipeline_mode = #tpu.pipeline_mode<synchronous>, transform_indices = @transform_13, window_bounds = array<i64: 1, 32>}, {pipeline_mode = #tpu.pipeline_mode<synchronous>, transform_indices = @transform_14, window_bounds = array<i64: 32, 64>}, {pipeline_mode = #tpu.pipeline_mode<synchronous>, transform_indices = @transform_15, window_bounds = array<i64: 1, 64>}, {pipeline_mode = #tpu.pipeline_mode<synchronous>, transform_indices = @transform_16, window_bounds = array<i64: 32, 32>}, {pipeline_mode = #tpu.pipeline_mode<synchronous>, transform_indices = @transform_17, window_bounds = array<i64: 1, 32>}, {pipeline_mode = #tpu.pipeline_mode<synchronous>, transform_indices = @transform_18, window_bounds = array<i64: 32, 32>}, {pipeline_mode = #tpu.pipeline_mode<synchronous>, transform_indices = @transform_19, window_bounds = array<i64: 1, 32>}, {pipeline_mode = #tpu.pipeline_mode<synchronous>, transform_indices = @transform_20, window_bounds = array<i64: 32, 64>}, {pipeline_mode = #tpu.pipeline_mode<synchronous>, transform_indices = @transform_21, window_bounds = array<i64: 1, 64>}, {pipeline_mode = #tpu.pipeline_mode<synchronous>, transform_indices = @transform_22, window_bounds = array<i64: 32, 32>}, {pipeline_mode = #tpu.pipeline_mode<synchronous>, transform_indices = @transform_23, window_bounds = array<i64: 1, 32>}, {pipeline_mode = #tpu.pipeline_mode<synchronous>, transform_indices = @transform_24, window_bounds = array<i64: 32, 64>}, {pipeline_mode = #tpu.pipeline_mode<synchronous>, transform_indices = @transform_25, window_bounds = array<i64: 1, 64>}, {pipeline_mode = #tpu.pipeline_mode<synchronous>, transform_indices = @transform_26, window_bounds = array<i64: 32, 32>}, {pipeline_mode = #tpu.pipeline_mode<synchronous>, transform_indices = @transform_27, window_bounds = array<i64: 1, 32>}, {pipeline_mode = #tpu.pipeline_mode<synchronous>, transform_indices = @transform_28, window_bounds = array<i64: 32, 8>}, {pipeline_mode = #tpu.pipeline_mode<synchronous>, transform_indices = @transform_29, window_bounds = array<i64: 1, 8>}, {transform_indices = @transform_30, window_bounds = array<i64: 1, 1, 8>}]} {
    %c0 = arith.constant 0 : index
    %c0_0 = arith.constant 0 : index
    %c0_1 = arith.constant 0 : index
    %0 = vector.load %arg1[%c0, %c0_0, %c0_1] : memref<1x16x3xf32, #tpu.memory_space<vmem>>, vector<1x16x3xf32>
    %1 = vector.shape_cast %0 : vector<1x16x3xf32> to vector<16x3xf32>
    %c0_2 = arith.constant 0 : index
    %c0_3 = arith.constant 0 : index
    %2 = vector.load %arg2[%c0_2, %c0_3] : memref<8x32xf32, #tpu.memory_space<vmem>>, vector<8x32xf32>
    %c0_4 = arith.constant 0 : index
    %c0_5 = arith.constant 0 : index
    %3 = vector.load %arg5[%c0_4, %c0_5] : memref<3x64xf32, #tpu.memory_space<vmem>>, vector<3x64xf32>
    %cst = arith.constant dense<0.000000e+00> : vector<16x64xf32>
    %4 = tpu.matmul %1, %3, %cst {dimension_numbers = #tpu.dot_dimension_numbers<[1], [0], [0], [1], [0, 0, 1, 1], [], []>} : vector<16x3xf32>, vector<3x64xf32>, vector<16x64xf32> -> vector<16x64xf32>
    %c0_6 = arith.constant 0 : index
    %c0_7 = arith.constant 0 : index
    %5 = vector.load %arg6[%c0_6, %c0_7] : memref<1x64xf32, #tpu.memory_space<vmem>>, vector<1x64xf32>
    %6 = vector.broadcast %5 : vector<1x64xf32> to vector<16x64xf32>
    %7 = arith.addf %4, %6 : vector<16x64xf32>
    %8 = vector.extract_strided_slice %7 {offsets = [0, 0], sizes = [16, 32], strides = [1, 1]} : vector<16x64xf32> to vector<16x32xf32>
    %9 = vector.extract_strided_slice %7 {offsets = [0, 32], sizes = [16, 32], strides = [1, 1]} : vector<16x64xf32> to vector<16x32xf32>
    %10 = vector.extract_strided_slice %2 {offsets = [0, 0], sizes = [8, 8], strides = [1, 1]} : vector<8x32xf32> to vector<8x8xf32>
    %11 = vector.extract_strided_slice %8 {offsets = [0, 0], sizes = [16, 8], strides = [1, 1]} : vector<16x32xf32> to vector<16x8xf32>
    %12 = vector.extract_strided_slice %9 {offsets = [0, 0], sizes = [16, 8], strides = [1, 1]} : vector<16x32xf32> to vector<16x8xf32>
    %cst_8 = arith.constant dense<0.000000e+00> : vector<8x16xf32>
    %13 = tpu.matmul %10, %11, %cst_8 {dimension_numbers = #tpu.dot_dimension_numbers<[1], [1], [0], [0], [0, 0, 1, 0], [], []>} : vector<8x8xf32>, vector<16x8xf32>, vector<8x16xf32> -> vector<8x16xf32>
    %cst_9 = arith.constant 0.176776692 : f32
    %14 = vector.broadcast %cst_9 : f32 to vector<8x16xf32>
    %15 = arith.mulf %13, %14 : vector<8x16xf32>
    %cst_10 = arith.constant dense<0xFF800000> : vector<8xf32>
    %16 = vector.multi_reduction <maximumf>, %15, %cst_10 [1] : vector<8x16xf32> to vector<8xf32>
    %17 = vector.shape_cast %16 : vector<8xf32> to vector<8x1xf32>
    %18 = vector.broadcast %17 : vector<8x1xf32> to vector<8x16xf32>
    %19 = arith.subf %15, %18 : vector<8x16xf32>
    %20 = math.exp %19 : vector<8x16xf32>
    %cst_11 = arith.constant dense<0.000000e+00> : vector<8xf32>
    %21 = vector.multi_reduction <add>, %20, %cst_11 [1] : vector<8x16xf32> to vector<8xf32>
    %22 = vector.shape_cast %21 : vector<8xf32> to vector<8x1xf32>
    %23 = tpu.reciprocal %22 {approx = true} : vector<8x1xf32> -> vector<8x1xf32>
    %24 = vector.broadcast %23 : vector<8x1xf32> to vector<8x16xf32>
    %25 = arith.mulf %20, %24 : vector<8x16xf32>
    %cst_12 = arith.constant dense<0.000000e+00> : vector<8x8xf32>
    %26 = tpu.matmul %25, %12, %cst_12 {dimension_numbers = #tpu.dot_dimension_numbers<[1], [0], [0], [1], [0, 0, 1, 1], [], []>} : vector<8x16xf32>, vector<16x8xf32>, vector<8x8xf32> -> vector<8x8xf32>
    %27 = arith.addf %10, %26 : vector<8x8xf32>
    %c0_13 = arith.constant 0 : index
    %c0_14 = arith.constant 0 : index
    %28 = vector.load %arg32[%c0_13, %c0_14] : memref<16x32xf32, #tpu.memory_space<vmem>>, vector<8x8xf32>
    tpu.vector_store %arg32[%c0_13, %c0_14], %27 {strides = array<i32>} : memref<16x32xf32, #tpu.memory_space<vmem>>, vector<8x8xf32>,
    %29 = vector.extract_strided_slice %2 {offsets = [0, 8], sizes = [8, 8], strides = [1, 1]} : vector<8x32xf32> to vector<8x8xf32>
    %30 = vector.extract_strided_slice %8 {offsets = [0, 8], sizes = [16, 8], strides = [1, 1]} : vector<16x32xf32> to vector<16x8xf32>
    %31 = vector.extract_strided_slice %9 {offsets = [0, 8], sizes = [16, 8], strides = [1, 1]} : vector<16x32xf32> to vector<16x8xf32>
    %cst_15 = arith.constant dense<0.000000e+00> : vector<8x16xf32>
    %32 = tpu.matmul %29, %30, %cst_15 {dimension_numbers = #tpu.dot_dimension_numbers<[1], [1], [0], [0], [0, 0, 1, 0], [], []>} : vector<8x8xf32>, vector<16x8xf32>, vector<8x16xf32> -> vector<8x16xf32>
    %cst_16 = arith.constant 0.176776692 : f32
    %33 = vector.broadcast %cst_16 : f32 to vector<8x16xf32>
    %34 = arith.mulf %32, %33 : vector<8x16xf32>
    %cst_17 = arith.constant dense<0xFF800000> : vector<8xf32>
    %35 = vector.multi_reduction <maximumf>, %34, %cst_17 [1] : vector<8x16xf32> to vector<8xf32>
    %36 = vector.shape_cast %35 : vector<8xf32> to vector<8x1xf32>
    %37 = vector.broadcast %36 : vector<8x1xf32> to vector<8x16xf32>
    %38 = arith.subf %34, %37 : vector<8x16xf32>
    %39 = math.exp %38 : vector<8x16xf32>
    %cst_18 = arith.constant dense<0.000000e+00> : vector<8xf32>
    %40 = vector.multi_reduction <add>, %39, %cst_18 [1] : vector<8x16xf32> to vector<8xf32>
    %41 = vector.shape_cast %40 : vector<8xf32> to vector<8x1xf32>
    %42 = tpu.reciprocal %41 {approx = true} : vector<8x1xf32> -> vector<8x1xf32>
    %43 = vector.broadcast %42 : vector<8x1xf32> to vector<8x16xf32>
    %44 = arith.mulf %39, %43 : vector<8x16xf32>
    %cst_19 = arith.constant dense<0.000000e+00> : vector<8x8xf32>
    %45 = tpu.matmul %44, %31, %cst_19 {dimension_numbers = #tpu.dot_dimension_numbers<[1], [0], [0], [1], [0, 0, 1, 1], [], []>} : vector<8x16xf32>, vector<16x8xf32>, vector<8x8xf32> -> vector<8x8xf32>
    %46 = arith.addf %29, %45 : vector<8x8xf32>
    %c0_20 = arith.constant 0 : index
    %c8 = arith.constant 8 : index
    %47 = vector.load %arg32[%c0_20, %c8] : memref<16x32xf32, #tpu.memory_space<vmem>>, vector<8x8xf32>
    tpu.vector_store %arg32[%c0_20, %c8], %46 {strides = array<i32>} : memref<16x32xf32, #tpu.memory_space<vmem>>, vector<8x8xf32>,
    %48 = vector.extract_strided_slice %2 {offsets = [0, 16], sizes = [8, 8], strides = [1, 1]} : vector<8x32xf32> to vector<8x8xf32>
    %49 = vector.extract_strided_slice %8 {offsets = [0, 16], sizes = [16, 8], strides = [1, 1]} : vector<16x32xf32> to vector<16x8xf32>
    %50 = vector.extract_strided_slice %9 {offsets = [0, 16], sizes = [16, 8], strides = [1, 1]} : vector<16x32xf32> to vector<16x8xf32>
    %cst_21 = arith.constant dense<0.000000e+00> : vector<8x16xf32>
    %51 = tpu.matmul %48, %49, %cst_21 {dimension_numbers = #tpu.dot_dimension_numbers<[1], [1], [0], [0], [0, 0, 1, 0], [], []>} : vector<8x8xf32>, vector<16x8xf32>, vector<8x16xf32> -> vector<8x16xf32>
    %cst_22 = arith.constant 0.176776692 : f32
    %52 = vector.broadcast %cst_22 : f32 to vector<8x16xf32>
    %53 = arith.mulf %51, %52 : vector<8x16xf32>
    %cst_23 = arith.constant dense<0xFF800000> : vector<8xf32>
    %54 = vector.multi_reduction <maximumf>, %53, %cst_23 [1] : vector<8x16xf32> to vector<8xf32>
    %55 = vector.shape_cast %54 : vector<8xf32> to vector<8x1xf32>
    %56 = vector.broadcast %55 : vector<8x1xf32> to vector<8x16xf32>
    %57 = arith.subf %53, %56 : vector<8x16xf32>
    %58 = math.exp %57 : vector<8x16xf32>
    %cst_24 = arith.constant dense<0.000000e+00> : vector<8xf32>
    %59 = vector.multi_reduction <add>, %58, %cst_24 [1] : vector<8x16xf32> to vector<8xf32>
    %60 = vector.shape_cast %59 : vector<8xf32> to vector<8x1xf32>
    %61 = tpu.reciprocal %60 {approx = true} : vector<8x1xf32> -> vector<8x1xf32>
    %62 = vector.broadcast %61 : vector<8x1xf32> to vector<8x16xf32>
    %63 = arith.mulf %58, %62 : vector<8x16xf32>
    %cst_25 = arith.constant dense<0.000000e+00> : vector<8x8xf32>
    %64 = tpu.matmul %63, %50, %cst_25 {dimension_numbers = #tpu.dot_dimension_numbers<[1], [0], [0], [1], [0, 0, 1, 1], [], []>} : vector<8x16xf32>, vector<16x8xf32>, vector<8x8xf32> -> vector<8x8xf32>
    %65 = arith.addf %48, %64 : vector<8x8xf32>
    %c0_26 = arith.constant 0 : index
    %c16 = arith.constant 16 : index
    %66 = vector.load %arg32[%c0_26, %c16] : memref<16x32xf32, #tpu.memory_space<vmem>>, vector<8x8xf32>
    tpu.vector_store %arg32[%c0_26, %c16], %65 {strides = array<i32>} : memref<16x32xf32, #tpu.memory_space<vmem>>, vector<8x8xf32>,
    %67 = vector.extract_strided_slice %2 {offsets = [0, 24], sizes = [8, 8], strides = [1, 1]} : vector<8x32xf32> to vector<8x8xf32>
    %68 = vector.extract_strided_slice %8 {offsets = [0, 24], sizes = [16, 8], strides = [1, 1]} : vector<16x32xf32> to vector<16x8xf32>
    %69 = vector.extract_strided_slice %9 {offsets = [0, 24], sizes = [16, 8], strides = [1, 1]} : vector<16x32xf32> to vector<16x8xf32>
    %cst_27 = arith.constant dense<0.000000e+00> : vector<8x16xf32>
    %70 = tpu.matmul %67, %68, %cst_27 {dimension_numbers = #tpu.dot_dimension_numbers<[1], [1], [0], [0], [0, 0, 1, 0], [], []>} : vector<8x8xf32>, vector<16x8xf32>, vector<8x16xf32> -> vector<8x16xf32>
    %cst_28 = arith.constant 0.176776692 : f32
    %71 = vector.broadcast %cst_28 : f32 to vector<8x16xf32>
    %72 = arith.mulf %70, %71 : vector<8x16xf32>
    %cst_29 = arith.constant dense<0xFF800000> : vector<8xf32>
    %73 = vector.multi_reduction <maximumf>, %72, %cst_29 [1] : vector<8x16xf32> to vector<8xf32>
    %74 = vector.shape_cast %73 : vector<8xf32> to vector<8x1xf32>
    %75 = vector.broadcast %74 : vector<8x1xf32> to vector<8x16xf32>
    %76 = arith.subf %72, %75 : vector<8x16xf32>
    %77 = math.exp %76 : vector<8x16xf32>
    %cst_30 = arith.constant dense<0.000000e+00> : vector<8xf32>
    %78 = vector.multi_reduction <add>, %77, %cst_30 [1] : vector<8x16xf32> to vector<8xf32>
    %79 = vector.shape_cast %78 : vector<8xf32> to vector<8x1xf32>
    %80 = tpu.reciprocal %79 {approx = true} : vector<8x1xf32> -> vector<8x1xf32>
    %81 = vector.broadcast %80 : vector<8x1xf32> to vector<8x16xf32>
    %82 = arith.mulf %77, %81 : vector<8x16xf32>
    %cst_31 = arith.constant dense<0.000000e+00> : vector<8x8xf32>
    %83 = tpu.matmul %82, %69, %cst_31 {dimension_numbers = #tpu.dot_dimension_numbers<[1], [0], [0], [1], [0, 0, 1, 1], [], []>} : vector<8x16xf32>, vector<16x8xf32>, vector<8x8xf32> -> vector<8x8xf32>
    %84 = arith.addf %67, %83 : vector<8x8xf32>
    %c0_32 = arith.constant 0 : index
    %c24 = arith.constant 24 : index
    %85 = vector.load %arg32[%c0_32, %c24] : memref<16x32xf32, #tpu.memory_space<vmem>>, vector<8x8xf32>
    tpu.vector_store %arg32[%c0_32, %c24], %84 {strides = array<i32>} : memref<16x32xf32, #tpu.memory_space<vmem>>, vector<8x8xf32>,
    %c0_33 = arith.constant 0 : index
    %c0_34 = arith.constant 0 : index
    %86 = vector.load %arg32[%c0_33, %c0_34] : memref<16x32xf32, #tpu.memory_space<vmem>>, vector<8x32xf32>
    %c0_35 = arith.constant 0 : index
    %c0_36 = arith.constant 0 : index
    %87 = vector.load %arg7[%c0_35, %c0_36] : memref<32x32xf32, #tpu.memory_space<vmem>>, vector<32x32xf32>
    %cst_37 = arith.constant dense<0.000000e+00> : vector<8x32xf32>
    %88 = tpu.matmul %86, %87, %cst_37 {dimension_numbers = #tpu.dot_dimension_numbers<[1], [0], [0], [1], [0, 0, 1, 1], [], []>} : vector<8x32xf32>, vector<32x32xf32>, vector<8x32xf32> -> vector<8x32xf32>
    %c0_38 = arith.constant 0 : index
    %c0_39 = arith.constant 0 : index
    %89 = vector.load %arg8[%c0_38, %c0_39] : memref<1x32xf32, #tpu.memory_space<vmem>>, vector<1x32xf32>
    %90 = vector.broadcast %89 : vector<1x32xf32> to vector<8x32xf32>
    %91 = arith.addf %88, %90 : vector<8x32xf32>
    %cst_40 = arith.constant 0.000000e+00 : f32
    %92 = vector.broadcast %cst_40 : f32 to vector<8x32xf32>
    %93 = arith.maximumf %91, %92 : vector<8x32xf32>
    %94 = arith.addf %86, %93 : vector<8x32xf32>
    %c0_41 = arith.constant 0 : index
    %c0_42 = arith.constant 0 : index
    %95 = vector.load %arg9[%c0_41, %c0_42] : memref<3x32xf32, #tpu.memory_space<vmem>>, vector<3x32xf32>
    %cst_43 = arith.constant dense<0.000000e+00> : vector<16x32xf32>
    %96 = tpu.matmul %1, %95, %cst_43 {dimension_numbers = #tpu.dot_dimension_numbers<[1], [0], [0], [1], [0, 0, 1, 1], [], []>} : vector<16x3xf32>, vector<3x32xf32>, vector<16x32xf32> -> vector<16x32xf32>
    %c0_44 = arith.constant 0 : index
    %c0_45 = arith.constant 0 : index
    %97 = vector.load %arg10[%c0_44, %c0_45] : memref<1x32xf32, #tpu.memory_space<vmem>>, vector<1x32xf32>
    %98 = vector.broadcast %97 : vector<1x32xf32> to vector<16x32xf32>
    %99 = arith.addf %96, %98 : vector<16x32xf32>
    %c0_46 = arith.constant 0 : index
    %c0_47 = arith.constant 0 : index
    %100 = vector.load %arg11[%c0_46, %c0_47] : memref<32x64xf32, #tpu.memory_space<vmem>>, vector<32x64xf32>
    %cst_48 = arith.constant dense<0.000000e+00> : vector<8x64xf32>
    %101 = tpu.matmul %94, %100, %cst_48 {dimension_numbers = #tpu.dot_dimension_numbers<[1], [0], [0], [1], [0, 0, 1, 1], [], []>} : vector<8x32xf32>, vector<32x64xf32>, vector<8x64xf32> -> vector<8x64xf32>
    %c0_49 = arith.constant 0 : index
    %c0_50 = arith.constant 0 : index
    %102 = vector.load %arg12[%c0_49, %c0_50] : memref<1x64xf32, #tpu.memory_space<vmem>>, vector<1x64xf32>
    %103 = vector.broadcast %102 : vector<1x64xf32> to vector<8x64xf32>
    %104 = arith.addf %101, %103 : vector<8x64xf32>
    %105 = vector.extract_strided_slice %104 {offsets = [0, 0], sizes = [8, 32], strides = [1, 1]} : vector<8x64xf32> to vector<8x32xf32>
    %106 = vector.extract_strided_slice %104 {offsets = [0, 32], sizes = [8, 32], strides = [1, 1]} : vector<8x64xf32> to vector<8x32xf32>
    %107 = vector.extract_strided_slice %99 {offsets = [0, 0], sizes = [16, 8], strides = [1, 1]} : vector<16x32xf32> to vector<16x8xf32>
    %108 = vector.extract_strided_slice %105 {offsets = [0, 0], sizes = [8, 8], strides = [1, 1]} : vector<8x32xf32> to vector<8x8xf32>
    %109 = vector.extract_strided_slice %106 {offsets = [0, 0], sizes = [8, 8], strides = [1, 1]} : vector<8x32xf32> to vector<8x8xf32>
    %cst_51 = arith.constant dense<0.000000e+00> : vector<16x8xf32>
    %110 = tpu.matmul %107, %108, %cst_51 {dimension_numbers = #tpu.dot_dimension_numbers<[1], [1], [0], [0], [0, 0, 1, 0], [], []>} : vector<16x8xf32>, vector<8x8xf32>, vector<16x8xf32> -> vector<16x8xf32>
    %cst_52 = arith.constant 0.176776692 : f32
    %111 = vector.broadcast %cst_52 : f32 to vector<16x8xf32>
    %112 = arith.mulf %110, %111 : vector<16x8xf32>
    %cst_53 = arith.constant dense<0xFF800000> : vector<16xf32>
    %113 = vector.multi_reduction <maximumf>, %112, %cst_53 [1] : vector<16x8xf32> to vector<16xf32>
    %114 = vector.shape_cast %113 : vector<16xf32> to vector<16x1xf32>
    %115 = vector.broadcast %114 : vector<16x1xf32> to vector<16x8xf32>
    %116 = arith.subf %112, %115 : vector<16x8xf32>
    %117 = math.exp %116 : vector<16x8xf32>
    %cst_54 = arith.constant dense<0.000000e+00> : vector<16xf32>
    %118 = vector.multi_reduction <add>, %117, %cst_54 [1] : vector<16x8xf32> to vector<16xf32>
    %119 = vector.shape_cast %118 : vector<16xf32> to vector<16x1xf32>
    %120 = tpu.reciprocal %119 {approx = true} : vector<16x1xf32> -> vector<16x1xf32>
    %121 = vector.broadcast %120 : vector<16x1xf32> to vector<16x8xf32>
    %122 = arith.mulf %117, %121 : vector<16x8xf32>
    %cst_55 = arith.constant dense<0.000000e+00> : vector<16x8xf32>
    %123 = tpu.matmul %122, %109, %cst_55 {dimension_numbers = #tpu.dot_dimension_numbers<[1], [0], [0], [1], [0, 0, 1, 1], [], []>} : vector<16x8xf32>, vector<8x8xf32>, vector<16x8xf32> -> vector<16x8xf32>
    %124 = arith.addf %107, %123 : vector<16x8xf32>
    %c0_56 = arith.constant 0 : index
    %c0_57 = arith.constant 0 : index
    %125 = vector.load %arg32[%c0_56, %c0_57] : memref<16x32xf32, #tpu.memory_space<vmem>>, vector<16x8xf32>
    tpu.vector_store %arg32[%c0_56, %c0_57], %124 {strides = array<i32>} : memref<16x32xf32, #tpu.memory_space<vmem>>, vector<16x8xf32>,
    %126 = vector.extract_strided_slice %99 {offsets = [0, 8], sizes = [16, 8], strides = [1, 1]} : vector<16x32xf32> to vector<16x8xf32>
    %127 = vector.extract_strided_slice %105 {offsets = [0, 8], sizes = [8, 8], strides = [1, 1]} : vector<8x32xf32> to vector<8x8xf32>
    %128 = vector.extract_strided_slice %106 {offsets = [0, 8], sizes = [8, 8], strides = [1, 1]} : vector<8x32xf32> to vector<8x8xf32>
    %cst_58 = arith.constant dense<0.000000e+00> : vector<16x8xf32>
    %129 = tpu.matmul %126, %127, %cst_58 {dimension_numbers = #tpu.dot_dimension_numbers<[1], [1], [0], [0], [0, 0, 1, 0], [], []>} : vector<16x8xf32>, vector<8x8xf32>, vector<16x8xf32> -> vector<16x8xf32>
    %cst_59 = arith.constant 0.176776692 : f32
    %130 = vector.broadcast %cst_59 : f32 to vector<16x8xf32>
    %131 = arith.mulf %129, %130 : vector<16x8xf32>
    %cst_60 = arith.constant dense<0xFF800000> : vector<16xf32>
    %132 = vector.multi_reduction <maximumf>, %131, %cst_60 [1] : vector<16x8xf32> to vector<16xf32>
    %133 = vector.shape_cast %132 : vector<16xf32> to vector<16x1xf32>
    %134 = vector.broadcast %133 : vector<16x1xf32> to vector<16x8xf32>
    %135 = arith.subf %131, %134 : vector<16x8xf32>
    %136 = math.exp %135 : vector<16x8xf32>
    %cst_61 = arith.constant dense<0.000000e+00> : vector<16xf32>
    %137 = vector.multi_reduction <add>, %136, %cst_61 [1] : vector<16x8xf32> to vector<16xf32>
    %138 = vector.shape_cast %137 : vector<16xf32> to vector<16x1xf32>
    %139 = tpu.reciprocal %138 {approx = true} : vector<16x1xf32> -> vector<16x1xf32>
    %140 = vector.broadcast %139 : vector<16x1xf32> to vector<16x8xf32>
    %141 = arith.mulf %136, %140 : vector<16x8xf32>
    %cst_62 = arith.constant dense<0.000000e+00> : vector<16x8xf32>
    %142 = tpu.matmul %141, %128, %cst_62 {dimension_numbers = #tpu.dot_dimension_numbers<[1], [0], [0], [1], [0, 0, 1, 1], [], []>} : vector<16x8xf32>, vector<8x8xf32>, vector<16x8xf32> -> vector<16x8xf32>
    %143 = arith.addf %126, %142 : vector<16x8xf32>
    %c0_63 = arith.constant 0 : index
    %c8_64 = arith.constant 8 : index
    %144 = vector.load %arg32[%c0_63, %c8_64] : memref<16x32xf32, #tpu.memory_space<vmem>>, vector<16x8xf32>
    tpu.vector_store %arg32[%c0_63, %c8_64], %143 {strides = array<i32>} : memref<16x32xf32, #tpu.memory_space<vmem>>, vector<16x8xf32>,
    %145 = vector.extract_strided_slice %99 {offsets = [0, 16], sizes = [16, 8], strides = [1, 1]} : vector<16x32xf32> to vector<16x8xf32>
    %146 = vector.extract_strided_slice %105 {offsets = [0, 16], sizes = [8, 8], strides = [1, 1]} : vector<8x32xf32> to vector<8x8xf32>
    %147 = vector.extract_strided_slice %106 {offsets = [0, 16], sizes = [8, 8], strides = [1, 1]} : vector<8x32xf32> to vector<8x8xf32>
    %cst_65 = arith.constant dense<0.000000e+00> : vector<16x8xf32>
    %148 = tpu.matmul %145, %146, %cst_65 {dimension_numbers = #tpu.dot_dimension_numbers<[1], [1], [0], [0], [0, 0, 1, 0], [], []>} : vector<16x8xf32>, vector<8x8xf32>, vector<16x8xf32> -> vector<16x8xf32>
    %cst_66 = arith.constant 0.176776692 : f32
    %149 = vector.broadcast %cst_66 : f32 to vector<16x8xf32>
    %150 = arith.mulf %148, %149 : vector<16x8xf32>
    %cst_67 = arith.constant dense<0xFF800000> : vector<16xf32>
    %151 = vector.multi_reduction <maximumf>, %150, %cst_67 [1] : vector<16x8xf32> to vector<16xf32>
    %152 = vector.shape_cast %151 : vector<16xf32> to vector<16x1xf32>
    %153 = vector.broadcast %152 : vector<16x1xf32> to vector<16x8xf32>
    %154 = arith.subf %150, %153 : vector<16x8xf32>
    %155 = math.exp %154 : vector<16x8xf32>
    %cst_68 = arith.constant dense<0.000000e+00> : vector<16xf32>
    %156 = vector.multi_reduction <add>, %155, %cst_68 [1] : vector<16x8xf32> to vector<16xf32>
    %157 = vector.shape_cast %156 : vector<16xf32> to vector<16x1xf32>
    %158 = tpu.reciprocal %157 {approx = true} : vector<16x1xf32> -> vector<16x1xf32>
    %159 = vector.broadcast %158 : vector<16x1xf32> to vector<16x8xf32>
    %160 = arith.mulf %155, %159 : vector<16x8xf32>
    %cst_69 = arith.constant dense<0.000000e+00> : vector<16x8xf32>
    %161 = tpu.matmul %160, %147, %cst_69 {dimension_numbers = #tpu.dot_dimension_numbers<[1], [0], [0], [1], [0, 0, 1, 1], [], []>} : vector<16x8xf32>, vector<8x8xf32>, vector<16x8xf32> -> vector<16x8xf32>
    %162 = arith.addf %145, %161 : vector<16x8xf32>
    %c0_70 = arith.constant 0 : index
    %c16_71 = arith.constant 16 : index
    %163 = vector.load %arg32[%c0_70, %c16_71] : memref<16x32xf32, #tpu.memory_space<vmem>>, vector<16x8xf32>
    tpu.vector_store %arg32[%c0_70, %c16_71], %162 {strides = array<i32>} : memref<16x32xf32, #tpu.memory_space<vmem>>, vector<16x8xf32>,
    %164 = vector.extract_strided_slice %99 {offsets = [0, 24], sizes = [16, 8], strides = [1, 1]} : vector<16x32xf32> to vector<16x8xf32>
    %165 = vector.extract_strided_slice %105 {offsets = [0, 24], sizes = [8, 8], strides = [1, 1]} : vector<8x32xf32> to vector<8x8xf32>
    %166 = vector.extract_strided_slice %106 {offsets = [0, 24], sizes = [8, 8], strides = [1, 1]} : vector<8x32xf32> to vector<8x8xf32>
    %cst_72 = arith.constant dense<0.000000e+00> : vector<16x8xf32>
    %167 = tpu.matmul %164, %165, %cst_72 {dimension_numbers = #tpu.dot_dimension_numbers<[1], [1], [0], [0], [0, 0, 1, 0], [], []>} : vector<16x8xf32>, vector<8x8xf32>, vector<16x8xf32> -> vector<16x8xf32>
    %cst_73 = arith.constant 0.176776692 : f32
    %168 = vector.broadcast %cst_73 : f32 to vector<16x8xf32>
    %169 = arith.mulf %167, %168 : vector<16x8xf32>
    %cst_74 = arith.constant dense<0xFF800000> : vector<16xf32>
    %170 = vector.multi_reduction <maximumf>, %169, %cst_74 [1] : vector<16x8xf32> to vector<16xf32>
    %171 = vector.shape_cast %170 : vector<16xf32> to vector<16x1xf32>
    %172 = vector.broadcast %171 : vector<16x1xf32> to vector<16x8xf32>
    %173 = arith.subf %169, %172 : vector<16x8xf32>
    %174 = math.exp %173 : vector<16x8xf32>
    %cst_75 = arith.constant dense<0.000000e+00> : vector<16xf32>
    %175 = vector.multi_reduction <add>, %174, %cst_75 [1] : vector<16x8xf32> to vector<16xf32>
    %176 = vector.shape_cast %175 : vector<16xf32> to vector<16x1xf32>
    %177 = tpu.reciprocal %176 {approx = true} : vector<16x1xf32> -> vector<16x1xf32>
    %178 = vector.broadcast %177 : vector<16x1xf32> to vector<16x8xf32>
    %179 = arith.mulf %174, %178 : vector<16x8xf32>
    %cst_76 = arith.constant dense<0.000000e+00> : vector<16x8xf32>
    %180 = tpu.matmul %179, %166, %cst_76 {dimension_numbers = #tpu.dot_dimension_numbers<[1], [0], [0], [1], [0, 0, 1, 1], [], []>} : vector<16x8xf32>, vector<8x8xf32>, vector<16x8xf32> -> vector<16x8xf32>
    %181 = arith.addf %164, %180 : vector<16x8xf32>
    %c0_77 = arith.constant 0 : index
    %c24_78 = arith.constant 24 : index
    %182 = vector.load %arg32[%c0_77, %c24_78] : memref<16x32xf32, #tpu.memory_space<vmem>>, vector<16x8xf32>
    tpu.vector_store %arg32[%c0_77, %c24_78], %181 {strides = array<i32>} : memref<16x32xf32, #tpu.memory_space<vmem>>, vector<16x8xf32>,
    %c0_79 = arith.constant 0 : index
    %c0_80 = arith.constant 0 : index
    %183 = vector.load %arg32[%c0_79, %c0_80] : memref<16x32xf32, #tpu.memory_space<vmem>>, vector<16x32xf32>
    %c0_81 = arith.constant 0 : index
    %c0_82 = arith.constant 0 : index
    %184 = vector.load %arg13[%c0_81, %c0_82] : memref<32x32xf32, #tpu.memory_space<vmem>>, vector<32x32xf32>
    %cst_83 = arith.constant dense<0.000000e+00> : vector<16x32xf32>
    %185 = tpu.matmul %183, %184, %cst_83 {dimension_numbers = #tpu.dot_dimension_numbers<[1], [0], [0], [1], [0, 0, 1, 1], [], []>} : vector<16x32xf32>, vector<32x32xf32>, vector<16x32xf32> -> vector<16x32xf32>
    %c0_84 = arith.constant 0 : index
    %c0_85 = arith.constant 0 : index
    %186 = vector.load %arg14[%c0_84, %c0_85] : memref<1x32xf32, #tpu.memory_space<vmem>>, vector<1x32xf32>
    %187 = vector.broadcast %186 : vector<1x32xf32> to vector<16x32xf32>
    %188 = arith.addf %185, %187 : vector<16x32xf32>
    %cst_86 = arith.constant 0.000000e+00 : f32
    %189 = vector.broadcast %cst_86 : f32 to vector<16x32xf32>
    %190 = arith.maximumf %188, %189 : vector<16x32xf32>
    %191 = arith.addf %183, %190 : vector<16x32xf32>
    %c0_87 = arith.constant 0 : index
    %c0_88 = arith.constant 0 : index
    %192 = vector.load %arg3[%c0_87, %c0_88] : memref<8x32xf32, #tpu.memory_space<vmem>>, vector<8x32xf32>
    %c0_89 = arith.constant 0 : index
    %c0_90 = arith.constant 0 : index
    %193 = vector.load %arg15[%c0_89, %c0_90] : memref<32x64xf32, #tpu.memory_space<vmem>>, vector<32x64xf32>
    %cst_91 = arith.constant dense<0.000000e+00> : vector<16x64xf32>
    %194 = tpu.matmul %191, %193, %cst_91 {dimension_numbers = #tpu.dot_dimension_numbers<[1], [0], [0], [1], [0, 0, 1, 1], [], []>} : vector<16x32xf32>, vector<32x64xf32>, vector<16x64xf32> -> vector<16x64xf32>
    %c0_92 = arith.constant 0 : index
    %c0_93 = arith.constant 0 : index
    %195 = vector.load %arg16[%c0_92, %c0_93] : memref<1x64xf32, #tpu.memory_space<vmem>>, vector<1x64xf32>
    %196 = vector.broadcast %195 : vector<1x64xf32> to vector<16x64xf32>
    %197 = arith.addf %194, %196 : vector<16x64xf32>
    %198 = vector.extract_strided_slice %197 {offsets = [0, 0], sizes = [16, 32], strides = [1, 1]} : vector<16x64xf32> to vector<16x32xf32>
    %199 = vector.extract_strided_slice %197 {offsets = [0, 32], sizes = [16, 32], strides = [1, 1]} : vector<16x64xf32> to vector<16x32xf32>
    %200 = vector.extract_strided_slice %192 {offsets = [0, 0], sizes = [8, 8], strides = [1, 1]} : vector<8x32xf32> to vector<8x8xf32>
    %201 = vector.extract_strided_slice %198 {offsets = [0, 0], sizes = [16, 8], strides = [1, 1]} : vector<16x32xf32> to vector<16x8xf32>
    %202 = vector.extract_strided_slice %199 {offsets = [0, 0], sizes = [16, 8], strides = [1, 1]} : vector<16x32xf32> to vector<16x8xf32>
    %cst_94 = arith.constant dense<0.000000e+00> : vector<8x16xf32>
    %203 = tpu.matmul %200, %201, %cst_94 {dimension_numbers = #tpu.dot_dimension_numbers<[1], [1], [0], [0], [0, 0, 1, 0], [], []>} : vector<8x8xf32>, vector<16x8xf32>, vector<8x16xf32> -> vector<8x16xf32>
    %cst_95 = arith.constant 0.176776692 : f32
    %204 = vector.broadcast %cst_95 : f32 to vector<8x16xf32>
    %205 = arith.mulf %203, %204 : vector<8x16xf32>
    %cst_96 = arith.constant dense<0xFF800000> : vector<8xf32>
    %206 = vector.multi_reduction <maximumf>, %205, %cst_96 [1] : vector<8x16xf32> to vector<8xf32>
    %207 = vector.shape_cast %206 : vector<8xf32> to vector<8x1xf32>
    %208 = vector.broadcast %207 : vector<8x1xf32> to vector<8x16xf32>
    %209 = arith.subf %205, %208 : vector<8x16xf32>
    %210 = math.exp %209 : vector<8x16xf32>
    %cst_97 = arith.constant dense<0.000000e+00> : vector<8xf32>
    %211 = vector.multi_reduction <add>, %210, %cst_97 [1] : vector<8x16xf32> to vector<8xf32>
    %212 = vector.shape_cast %211 : vector<8xf32> to vector<8x1xf32>
    %213 = tpu.reciprocal %212 {approx = true} : vector<8x1xf32> -> vector<8x1xf32>
    %214 = vector.broadcast %213 : vector<8x1xf32> to vector<8x16xf32>
    %215 = arith.mulf %210, %214 : vector<8x16xf32>
    %cst_98 = arith.constant dense<0.000000e+00> : vector<8x8xf32>
    %216 = tpu.matmul %215, %202, %cst_98 {dimension_numbers = #tpu.dot_dimension_numbers<[1], [0], [0], [1], [0, 0, 1, 1], [], []>} : vector<8x16xf32>, vector<16x8xf32>, vector<8x8xf32> -> vector<8x8xf32>
    %217 = arith.addf %200, %216 : vector<8x8xf32>
    %c0_99 = arith.constant 0 : index
    %c0_100 = arith.constant 0 : index
    %218 = vector.load %arg32[%c0_99, %c0_100] : memref<16x32xf32, #tpu.memory_space<vmem>>, vector<8x8xf32>
    tpu.vector_store %arg32[%c0_99, %c0_100], %217 {strides = array<i32>} : memref<16x32xf32, #tpu.memory_space<vmem>>, vector<8x8xf32>,
    %219 = vector.extract_strided_slice %192 {offsets = [0, 8], sizes = [8, 8], strides = [1, 1]} : vector<8x32xf32> to vector<8x8xf32>
    %220 = vector.extract_strided_slice %198 {offsets = [0, 8], sizes = [16, 8], strides = [1, 1]} : vector<16x32xf32> to vector<16x8xf32>
    %221 = vector.extract_strided_slice %199 {offsets = [0, 8], sizes = [16, 8], strides = [1, 1]} : vector<16x32xf32> to vector<16x8xf32>
    %cst_101 = arith.constant dense<0.000000e+00> : vector<8x16xf32>
    %222 = tpu.matmul %219, %220, %cst_101 {dimension_numbers = #tpu.dot_dimension_numbers<[1], [1], [0], [0], [0, 0, 1, 0], [], []>} : vector<8x8xf32>, vector<16x8xf32>, vector<8x16xf32> -> vector<8x16xf32>
    %cst_102 = arith.constant 0.176776692 : f32
    %223 = vector.broadcast %cst_102 : f32 to vector<8x16xf32>
    %224 = arith.mulf %222, %223 : vector<8x16xf32>
    %cst_103 = arith.constant dense<0xFF800000> : vector<8xf32>
    %225 = vector.multi_reduction <maximumf>, %224, %cst_103 [1] : vector<8x16xf32> to vector<8xf32>
    %226 = vector.shape_cast %225 : vector<8xf32> to vector<8x1xf32>
    %227 = vector.broadcast %226 : vector<8x1xf32> to vector<8x16xf32>
    %228 = arith.subf %224, %227 : vector<8x16xf32>
    %229 = math.exp %228 : vector<8x16xf32>
    %cst_104 = arith.constant dense<0.000000e+00> : vector<8xf32>
    %230 = vector.multi_reduction <add>, %229, %cst_104 [1] : vector<8x16xf32> to vector<8xf32>
    %231 = vector.shape_cast %230 : vector<8xf32> to vector<8x1xf32>
    %232 = tpu.reciprocal %231 {approx = true} : vector<8x1xf32> -> vector<8x1xf32>
    %233 = vector.broadcast %232 : vector<8x1xf32> to vector<8x16xf32>
    %234 = arith.mulf %229, %233 : vector<8x16xf32>
    %cst_105 = arith.constant dense<0.000000e+00> : vector<8x8xf32>
    %235 = tpu.matmul %234, %221, %cst_105 {dimension_numbers = #tpu.dot_dimension_numbers<[1], [0], [0], [1], [0, 0, 1, 1], [], []>} : vector<8x16xf32>, vector<16x8xf32>, vector<8x8xf32> -> vector<8x8xf32>
    %236 = arith.addf %219, %235 : vector<8x8xf32>
    %c0_106 = arith.constant 0 : index
    %c8_107 = arith.constant 8 : index
    %237 = vector.load %arg32[%c0_106, %c8_107] : memref<16x32xf32, #tpu.memory_space<vmem>>, vector<8x8xf32>
    tpu.vector_store %arg32[%c0_106, %c8_107], %236 {strides = array<i32>} : memref<16x32xf32, #tpu.memory_space<vmem>>, vector<8x8xf32>,
    %238 = vector.extract_strided_slice %192 {offsets = [0, 16], sizes = [8, 8], strides = [1, 1]} : vector<8x32xf32> to vector<8x8xf32>
    %239 = vector.extract_strided_slice %198 {offsets = [0, 16], sizes = [16, 8], strides = [1, 1]} : vector<16x32xf32> to vector<16x8xf32>
    %240 = vector.extract_strided_slice %199 {offsets = [0, 16], sizes = [16, 8], strides = [1, 1]} : vector<16x32xf32> to vector<16x8xf32>
    %cst_108 = arith.constant dense<0.000000e+00> : vector<8x16xf32>
    %241 = tpu.matmul %238, %239, %cst_108 {dimension_numbers = #tpu.dot_dimension_numbers<[1], [1], [0], [0], [0, 0, 1, 0], [], []>} : vector<8x8xf32>, vector<16x8xf32>, vector<8x16xf32> -> vector<8x16xf32>
    %cst_109 = arith.constant 0.176776692 : f32
    %242 = vector.broadcast %cst_109 : f32 to vector<8x16xf32>
    %243 = arith.mulf %241, %242 : vector<8x16xf32>
    %cst_110 = arith.constant dense<0xFF800000> : vector<8xf32>
    %244 = vector.multi_reduction <maximumf>, %243, %cst_110 [1] : vector<8x16xf32> to vector<8xf32>
    %245 = vector.shape_cast %244 : vector<8xf32> to vector<8x1xf32>
    %246 = vector.broadcast %245 : vector<8x1xf32> to vector<8x16xf32>
    %247 = arith.subf %243, %246 : vector<8x16xf32>
    %248 = math.exp %247 : vector<8x16xf32>
    %cst_111 = arith.constant dense<0.000000e+00> : vector<8xf32>
    %249 = vector.multi_reduction <add>, %248, %cst_111 [1] : vector<8x16xf32> to vector<8xf32>
    %250 = vector.shape_cast %249 : vector<8xf32> to vector<8x1xf32>
    %251 = tpu.reciprocal %250 {approx = true} : vector<8x1xf32> -> vector<8x1xf32>
    %252 = vector.broadcast %251 : vector<8x1xf32> to vector<8x16xf32>
    %253 = arith.mulf %248, %252 : vector<8x16xf32>
    %cst_112 = arith.constant dense<0.000000e+00> : vector<8x8xf32>
    %254 = tpu.matmul %253, %240, %cst_112 {dimension_numbers = #tpu.dot_dimension_numbers<[1], [0], [0], [1], [0, 0, 1, 1], [], []>} : vector<8x16xf32>, vector<16x8xf32>, vector<8x8xf32> -> vector<8x8xf32>
    %255 = arith.addf %238, %254 : vector<8x8xf32>
    %c0_113 = arith.constant 0 : index
    %c16_114 = arith.constant 16 : index
    %256 = vector.load %arg32[%c0_113, %c16_114] : memref<16x32xf32, #tpu.memory_space<vmem>>, vector<8x8xf32>
    tpu.vector_store %arg32[%c0_113, %c16_114], %255 {strides = array<i32>} : memref<16x32xf32, #tpu.memory_space<vmem>>, vector<8x8xf32>,
    %257 = vector.extract_strided_slice %192 {offsets = [0, 24], sizes = [8, 8], strides = [1, 1]} : vector<8x32xf32> to vector<8x8xf32>
    %258 = vector.extract_strided_slice %198 {offsets = [0, 24], sizes = [16, 8], strides = [1, 1]} : vector<16x32xf32> to vector<16x8xf32>
    %259 = vector.extract_strided_slice %199 {offsets = [0, 24], sizes = [16, 8], strides = [1, 1]} : vector<16x32xf32> to vector<16x8xf32>
    %cst_115 = arith.constant dense<0.000000e+00> : vector<8x16xf32>
    %260 = tpu.matmul %257, %258, %cst_115 {dimension_numbers = #tpu.dot_dimension_numbers<[1], [1], [0], [0], [0, 0, 1, 0], [], []>} : vector<8x8xf32>, vector<16x8xf32>, vector<8x16xf32> -> vector<8x16xf32>
    %cst_116 = arith.constant 0.176776692 : f32
    %261 = vector.broadcast %cst_116 : f32 to vector<8x16xf32>
    %262 = arith.mulf %260, %261 : vector<8x16xf32>
    %cst_117 = arith.constant dense<0xFF800000> : vector<8xf32>
    %263 = vector.multi_reduction <maximumf>, %262, %cst_117 [1] : vector<8x16xf32> to vector<8xf32>
    %264 = vector.shape_cast %263 : vector<8xf32> to vector<8x1xf32>
    %265 = vector.broadcast %264 : vector<8x1xf32> to vector<8x16xf32>
    %266 = arith.subf %262, %265 : vector<8x16xf32>
    %267 = math.exp %266 : vector<8x16xf32>
    %cst_118 = arith.constant dense<0.000000e+00> : vector<8xf32>
    %268 = vector.multi_reduction <add>, %267, %cst_118 [1] : vector<8x16xf32> to vector<8xf32>
    %269 = vector.shape_cast %268 : vector<8xf32> to vector<8x1xf32>
    %270 = tpu.reciprocal %269 {approx = true} : vector<8x1xf32> -> vector<8x1xf32>
    %271 = vector.broadcast %270 : vector<8x1xf32> to vector<8x16xf32>
    %272 = arith.mulf %267, %271 : vector<8x16xf32>
    %cst_119 = arith.constant dense<0.000000e+00> : vector<8x8xf32>
    %273 = tpu.matmul %272, %259, %cst_119 {dimension_numbers = #tpu.dot_dimension_numbers<[1], [0], [0], [1], [0, 0, 1, 1], [], []>} : vector<8x16xf32>, vector<16x8xf32>, vector<8x8xf32> -> vector<8x8xf32>
    %274 = arith.addf %257, %273 : vector<8x8xf32>
    %c0_120 = arith.constant 0 : index
    %c24_121 = arith.constant 24 : index
    %275 = vector.load %arg32[%c0_120, %c24_121] : memref<16x32xf32, #tpu.memory_space<vmem>>, vector<8x8xf32>
    tpu.vector_store %arg32[%c0_120, %c24_121], %274 {strides = array<i32>} : memref<16x32xf32, #tpu.memory_space<vmem>>, vector<8x8xf32>,
    %c0_122 = arith.constant 0 : index
    %c0_123 = arith.constant 0 : index
    %276 = vector.load %arg32[%c0_122, %c0_123] : memref<16x32xf32, #tpu.memory_space<vmem>>, vector<8x32xf32>
    %c0_124 = arith.constant 0 : index
    %c0_125 = arith.constant 0 : index
    %277 = vector.load %arg17[%c0_124, %c0_125] : memref<32x32xf32, #tpu.memory_space<vmem>>, vector<32x32xf32>
    %cst_126 = arith.constant dense<0.000000e+00> : vector<8x32xf32>
    %278 = tpu.matmul %276, %277, %cst_126 {dimension_numbers = #tpu.dot_dimension_numbers<[1], [0], [0], [1], [0, 0, 1, 1], [], []>} : vector<8x32xf32>, vector<32x32xf32>, vector<8x32xf32> -> vector<8x32xf32>
    %c0_127 = arith.constant 0 : index
    %c0_128 = arith.constant 0 : index
    %279 = vector.load %arg18[%c0_127, %c0_128] : memref<1x32xf32, #tpu.memory_space<vmem>>, vector<1x32xf32>
    %280 = vector.broadcast %279 : vector<1x32xf32> to vector<8x32xf32>
    %281 = arith.addf %278, %280 : vector<8x32xf32>
    %cst_129 = arith.constant 0.000000e+00 : f32
    %282 = vector.broadcast %cst_129 : f32 to vector<8x32xf32>
    %283 = arith.maximumf %281, %282 : vector<8x32xf32>
    %284 = arith.addf %276, %283 : vector<8x32xf32>
    %c0_130 = arith.constant 0 : index
    %c0_131 = arith.constant 0 : index
    %285 = vector.load %arg19[%c0_130, %c0_131] : memref<32x32xf32, #tpu.memory_space<vmem>>, vector<32x32xf32>
    %cst_132 = arith.constant dense<0.000000e+00> : vector<16x32xf32>
    %286 = tpu.matmul %191, %285, %cst_132 {dimension_numbers = #tpu.dot_dimension_numbers<[1], [0], [0], [1], [0, 0, 1, 1], [], []>} : vector<16x32xf32>, vector<32x32xf32>, vector<16x32xf32> -> vector<16x32xf32>
    %c0_133 = arith.constant 0 : index
    %c0_134 = arith.constant 0 : index
    %287 = vector.load %arg20[%c0_133, %c0_134] : memref<1x32xf32, #tpu.memory_space<vmem>>, vector<1x32xf32>
    %288 = vector.broadcast %287 : vector<1x32xf32> to vector<16x32xf32>
    %289 = arith.addf %286, %288 : vector<16x32xf32>
    %c0_135 = arith.constant 0 : index
    %c0_136 = arith.constant 0 : index
    %290 = vector.load %arg21[%c0_135, %c0_136] : memref<32x64xf32, #tpu.memory_space<vmem>>, vector<32x64xf32>
    %cst_137 = arith.constant dense<0.000000e+00> : vector<8x64xf32>
    %291 = tpu.matmul %284, %290, %cst_137 {dimension_numbers = #tpu.dot_dimension_numbers<[1], [0], [0], [1], [0, 0, 1, 1], [], []>} : vector<8x32xf32>, vector<32x64xf32>, vector<8x64xf32> -> vector<8x64xf32>
    %c0_138 = arith.constant 0 : index
    %c0_139 = arith.constant 0 : index
    %292 = vector.load %arg22[%c0_138, %c0_139] : memref<1x64xf32, #tpu.memory_space<vmem>>, vector<1x64xf32>
    %293 = vector.broadcast %292 : vector<1x64xf32> to vector<8x64xf32>
    %294 = arith.addf %291, %293 : vector<8x64xf32>
    %295 = vector.extract_strided_slice %294 {offsets = [0, 0], sizes = [8, 32], strides = [1, 1]} : vector<8x64xf32> to vector<8x32xf32>
    %296 = vector.extract_strided_slice %294 {offsets = [0, 32], sizes = [8, 32], strides = [1, 1]} : vector<8x64xf32> to vector<8x32xf32>
    %297 = vector.extract_strided_slice %289 {offsets = [0, 0], sizes = [16, 8], strides = [1, 1]} : vector<16x32xf32> to vector<16x8xf32>
    %298 = vector.extract_strided_slice %295 {offsets = [0, 0], sizes = [8, 8], strides = [1, 1]} : vector<8x32xf32> to vector<8x8xf32>
    %299 = vector.extract_strided_slice %296 {offsets = [0, 0], sizes = [8, 8], strides = [1, 1]} : vector<8x32xf32> to vector<8x8xf32>
    %cst_140 = arith.constant dense<0.000000e+00> : vector<16x8xf32>
    %300 = tpu.matmul %297, %298, %cst_140 {dimension_numbers = #tpu.dot_dimension_numbers<[1], [1], [0], [0], [0, 0, 1, 0], [], []>} : vector<16x8xf32>, vector<8x8xf32>, vector<16x8xf32> -> vector<16x8xf32>
    %cst_141 = arith.constant 0.176776692 : f32
    %301 = vector.broadcast %cst_141 : f32 to vector<16x8xf32>
    %302 = arith.mulf %300, %301 : vector<16x8xf32>
    %cst_142 = arith.constant dense<0xFF800000> : vector<16xf32>
    %303 = vector.multi_reduction <maximumf>, %302, %cst_142 [1] : vector<16x8xf32> to vector<16xf32>
    %304 = vector.shape_cast %303 : vector<16xf32> to vector<16x1xf32>
    %305 = vector.broadcast %304 : vector<16x1xf32> to vector<16x8xf32>
    %306 = arith.subf %302, %305 : vector<16x8xf32>
    %307 = math.exp %306 : vector<16x8xf32>
    %cst_143 = arith.constant dense<0.000000e+00> : vector<16xf32>
    %308 = vector.multi_reduction <add>, %307, %cst_143 [1] : vector<16x8xf32> to vector<16xf32>
    %309 = vector.shape_cast %308 : vector<16xf32> to vector<16x1xf32>
    %310 = tpu.reciprocal %309 {approx = true} : vector<16x1xf32> -> vector<16x1xf32>
    %311 = vector.broadcast %310 : vector<16x1xf32> to vector<16x8xf32>
    %312 = arith.mulf %307, %311 : vector<16x8xf32>
    %cst_144 = arith.constant dense<0.000000e+00> : vector<16x8xf32>
    %313 = tpu.matmul %312, %299, %cst_144 {dimension_numbers = #tpu.dot_dimension_numbers<[1], [0], [0], [1], [0, 0, 1, 1], [], []>} : vector<16x8xf32>, vector<8x8xf32>, vector<16x8xf32> -> vector<16x8xf32>
    %314 = arith.addf %297, %313 : vector<16x8xf32>
    %c0_145 = arith.constant 0 : index
    %c0_146 = arith.constant 0 : index
    %315 = vector.load %arg32[%c0_145, %c0_146] : memref<16x32xf32, #tpu.memory_space<vmem>>, vector<16x8xf32>
    tpu.vector_store %arg32[%c0_145, %c0_146], %314 {strides = array<i32>} : memref<16x32xf32, #tpu.memory_space<vmem>>, vector<16x8xf32>,
    %316 = vector.extract_strided_slice %289 {offsets = [0, 8], sizes = [16, 8], strides = [1, 1]} : vector<16x32xf32> to vector<16x8xf32>
    %317 = vector.extract_strided_slice %295 {offsets = [0, 8], sizes = [8, 8], strides = [1, 1]} : vector<8x32xf32> to vector<8x8xf32>
    %318 = vector.extract_strided_slice %296 {offsets = [0, 8], sizes = [8, 8], strides = [1, 1]} : vector<8x32xf32> to vector<8x8xf32>
    %cst_147 = arith.constant dense<0.000000e+00> : vector<16x8xf32>
    %319 = tpu.matmul %316, %317, %cst_147 {dimension_numbers = #tpu.dot_dimension_numbers<[1], [1], [0], [0], [0, 0, 1, 0], [], []>} : vector<16x8xf32>, vector<8x8xf32>, vector<16x8xf32> -> vector<16x8xf32>
    %cst_148 = arith.constant 0.176776692 : f32
    %320 = vector.broadcast %cst_148 : f32 to vector<16x8xf32>
    %321 = arith.mulf %319, %320 : vector<16x8xf32>
    %cst_149 = arith.constant dense<0xFF800000> : vector<16xf32>
    %322 = vector.multi_reduction <maximumf>, %321, %cst_149 [1] : vector<16x8xf32> to vector<16xf32>
    %323 = vector.shape_cast %322 : vector<16xf32> to vector<16x1xf32>
    %324 = vector.broadcast %323 : vector<16x1xf32> to vector<16x8xf32>
    %325 = arith.subf %321, %324 : vector<16x8xf32>
    %326 = math.exp %325 : vector<16x8xf32>
    %cst_150 = arith.constant dense<0.000000e+00> : vector<16xf32>
    %327 = vector.multi_reduction <add>, %326, %cst_150 [1] : vector<16x8xf32> to vector<16xf32>
    %328 = vector.shape_cast %327 : vector<16xf32> to vector<16x1xf32>
    %329 = tpu.reciprocal %328 {approx = true} : vector<16x1xf32> -> vector<16x1xf32>
    %330 = vector.broadcast %329 : vector<16x1xf32> to vector<16x8xf32>
    %331 = arith.mulf %326, %330 : vector<16x8xf32>
    %cst_151 = arith.constant dense<0.000000e+00> : vector<16x8xf32>
    %332 = tpu.matmul %331, %318, %cst_151 {dimension_numbers = #tpu.dot_dimension_numbers<[1], [0], [0], [1], [0, 0, 1, 1], [], []>} : vector<16x8xf32>, vector<8x8xf32>, vector<16x8xf32> -> vector<16x8xf32>
    %333 = arith.addf %316, %332 : vector<16x8xf32>
    %c0_152 = arith.constant 0 : index
    %c8_153 = arith.constant 8 : index
    %334 = vector.load %arg32[%c0_152, %c8_153] : memref<16x32xf32, #tpu.memory_space<vmem>>, vector<16x8xf32>
    tpu.vector_store %arg32[%c0_152, %c8_153], %333 {strides = array<i32>} : memref<16x32xf32, #tpu.memory_space<vmem>>, vector<16x8xf32>,
    %335 = vector.extract_strided_slice %289 {offsets = [0, 16], sizes = [16, 8], strides = [1, 1]} : vector<16x32xf32> to vector<16x8xf32>
    %336 = vector.extract_strided_slice %295 {offsets = [0, 16], sizes = [8, 8], strides = [1, 1]} : vector<8x32xf32> to vector<8x8xf32>
    %337 = vector.extract_strided_slice %296 {offsets = [0, 16], sizes = [8, 8], strides = [1, 1]} : vector<8x32xf32> to vector<8x8xf32>
    %cst_154 = arith.constant dense<0.000000e+00> : vector<16x8xf32>
    %338 = tpu.matmul %335, %336, %cst_154 {dimension_numbers = #tpu.dot_dimension_numbers<[1], [1], [0], [0], [0, 0, 1, 0], [], []>} : vector<16x8xf32>, vector<8x8xf32>, vector<16x8xf32> -> vector<16x8xf32>
    %cst_155 = arith.constant 0.176776692 : f32
    %339 = vector.broadcast %cst_155 : f32 to vector<16x8xf32>
    %340 = arith.mulf %338, %339 : vector<16x8xf32>
    %cst_156 = arith.constant dense<0xFF800000> : vector<16xf32>
    %341 = vector.multi_reduction <maximumf>, %340, %cst_156 [1] : vector<16x8xf32> to vector<16xf32>
    %342 = vector.shape_cast %341 : vector<16xf32> to vector<16x1xf32>
    %343 = vector.broadcast %342 : vector<16x1xf32> to vector<16x8xf32>
    %344 = arith.subf %340, %343 : vector<16x8xf32>
    %345 = math.exp %344 : vector<16x8xf32>
    %cst_157 = arith.constant dense<0.000000e+00> : vector<16xf32>
    %346 = vector.multi_reduction <add>, %345, %cst_157 [1] : vector<16x8xf32> to vector<16xf32>
    %347 = vector.shape_cast %346 : vector<16xf32> to vector<16x1xf32>
    %348 = tpu.reciprocal %347 {approx = true} : vector<16x1xf32> -> vector<16x1xf32>
    %349 = vector.broadcast %348 : vector<16x1xf32> to vector<16x8xf32>
    %350 = arith.mulf %345, %349 : vector<16x8xf32>
    %cst_158 = arith.constant dense<0.000000e+00> : vector<16x8xf32>
    %351 = tpu.matmul %350, %337, %cst_158 {dimension_numbers = #tpu.dot_dimension_numbers<[1], [0], [0], [1], [0, 0, 1, 1], [], []>} : vector<16x8xf32>, vector<8x8xf32>, vector<16x8xf32> -> vector<16x8xf32>
    %352 = arith.addf %335, %351 : vector<16x8xf32>
    %c0_159 = arith.constant 0 : index
    %c16_160 = arith.constant 16 : index
    %353 = vector.load %arg32[%c0_159, %c16_160] : memref<16x32xf32, #tpu.memory_space<vmem>>, vector<16x8xf32>
    tpu.vector_store %arg32[%c0_159, %c16_160], %352 {strides = array<i32>} : memref<16x32xf32, #tpu.memory_space<vmem>>, vector<16x8xf32>,
    %354 = vector.extract_strided_slice %289 {offsets = [0, 24], sizes = [16, 8], strides = [1, 1]} : vector<16x32xf32> to vector<16x8xf32>
    %355 = vector.extract_strided_slice %295 {offsets = [0, 24], sizes = [8, 8], strides = [1, 1]} : vector<8x32xf32> to vector<8x8xf32>
    %356 = vector.extract_strided_slice %296 {offsets = [0, 24], sizes = [8, 8], strides = [1, 1]} : vector<8x32xf32> to vector<8x8xf32>
    %cst_161 = arith.constant dense<0.000000e+00> : vector<16x8xf32>
    %357 = tpu.matmul %354, %355, %cst_161 {dimension_numbers = #tpu.dot_dimension_numbers<[1], [1], [0], [0], [0, 0, 1, 0], [], []>} : vector<16x8xf32>, vector<8x8xf32>, vector<16x8xf32> -> vector<16x8xf32>
    %cst_162 = arith.constant 0.176776692 : f32
    %358 = vector.broadcast %cst_162 : f32 to vector<16x8xf32>
    %359 = arith.mulf %357, %358 : vector<16x8xf32>
    %cst_163 = arith.constant dense<0xFF800000> : vector<16xf32>
    %360 = vector.multi_reduction <maximumf>, %359, %cst_163 [1] : vector<16x8xf32> to vector<16xf32>
    %361 = vector.shape_cast %360 : vector<16xf32> to vector<16x1xf32>
    %362 = vector.broadcast %361 : vector<16x1xf32> to vector<16x8xf32>
    %363 = arith.subf %359, %362 : vector<16x8xf32>
    %364 = math.exp %363 : vector<16x8xf32>
    %cst_164 = arith.constant dense<0.000000e+00> : vector<16xf32>
    %365 = vector.multi_reduction <add>, %364, %cst_164 [1] : vector<16x8xf32> to vector<16xf32>
    %366 = vector.shape_cast %365 : vector<16xf32> to vector<16x1xf32>
    %367 = tpu.reciprocal %366 {approx = true} : vector<16x1xf32> -> vector<16x1xf32>
    %368 = vector.broadcast %367 : vector<16x1xf32> to vector<16x8xf32>
    %369 = arith.mulf %364, %368 : vector<16x8xf32>
    %cst_165 = arith.constant dense<0.000000e+00> : vector<16x8xf32>
    %370 = tpu.matmul %369, %356, %cst_165 {dimension_numbers = #tpu.dot_dimension_numbers<[1], [0], [0], [1], [0, 0, 1, 1], [], []>} : vector<16x8xf32>, vector<8x8xf32>, vector<16x8xf32> -> vector<16x8xf32>
    %371 = arith.addf %354, %370 : vector<16x8xf32>
    %c0_166 = arith.constant 0 : index
    %c24_167 = arith.constant 24 : index
    %372 = vector.load %arg32[%c0_166, %c24_167] : memref<16x32xf32, #tpu.memory_space<vmem>>, vector<16x8xf32>
    tpu.vector_store %arg32[%c0_166, %c24_167], %371 {strides = array<i32>} : memref<16x32xf32, #tpu.memory_space<vmem>>, vector<16x8xf32>,
    %c0_168 = arith.constant 0 : index
    %c0_169 = arith.constant 0 : index
    %373 = vector.load %arg32[%c0_168, %c0_169] : memref<16x32xf32, #tpu.memory_space<vmem>>, vector<16x32xf32>
    %c0_170 = arith.constant 0 : index
    %c0_171 = arith.constant 0 : index
    %374 = vector.load %arg23[%c0_170, %c0_171] : memref<32x32xf32, #tpu.memory_space<vmem>>, vector<32x32xf32>
    %cst_172 = arith.constant dense<0.000000e+00> : vector<16x32xf32>
    %375 = tpu.matmul %373, %374, %cst_172 {dimension_numbers = #tpu.dot_dimension_numbers<[1], [0], [0], [1], [0, 0, 1, 1], [], []>} : vector<16x32xf32>, vector<32x32xf32>, vector<16x32xf32> -> vector<16x32xf32>
    %c0_173 = arith.constant 0 : index
    %c0_174 = arith.constant 0 : index
    %376 = vector.load %arg24[%c0_173, %c0_174] : memref<1x32xf32, #tpu.memory_space<vmem>>, vector<1x32xf32>
    %377 = vector.broadcast %376 : vector<1x32xf32> to vector<16x32xf32>
    %378 = arith.addf %375, %377 : vector<16x32xf32>
    %cst_175 = arith.constant 0.000000e+00 : f32
    %379 = vector.broadcast %cst_175 : f32 to vector<16x32xf32>
    %380 = arith.maximumf %378, %379 : vector<16x32xf32>
    %381 = arith.addf %373, %380 : vector<16x32xf32>
    %c0_176 = arith.constant 0 : index
    %c0_177 = arith.constant 0 : index
    %382 = vector.load %arg4[%c0_176, %c0_177] : memref<1x32xf32, #tpu.memory_space<vmem>>, vector<1x32xf32>
    %c0_178 = arith.constant 0 : index
    %c0_179 = arith.constant 0 : index
    %383 = vector.load %arg25[%c0_178, %c0_179] : memref<32x64xf32, #tpu.memory_space<vmem>>, vector<32x64xf32>
    %cst_180 = arith.constant dense<0.000000e+00> : vector<16x64xf32>
    %384 = tpu.matmul %381, %383, %cst_180 {dimension_numbers = #tpu.dot_dimension_numbers<[1], [0], [0], [1], [0, 0, 1, 1], [], []>} : vector<16x32xf32>, vector<32x64xf32>, vector<16x64xf32> -> vector<16x64xf32>
    %c0_181 = arith.constant 0 : index
    %c0_182 = arith.constant 0 : index
    %385 = vector.load %arg26[%c0_181, %c0_182] : memref<1x64xf32, #tpu.memory_space<vmem>>, vector<1x64xf32>
    %386 = vector.broadcast %385 : vector<1x64xf32> to vector<16x64xf32>
    %387 = arith.addf %384, %386 : vector<16x64xf32>
    %388 = vector.extract_strided_slice %387 {offsets = [0, 0], sizes = [16, 32], strides = [1, 1]} : vector<16x64xf32> to vector<16x32xf32>
    %389 = vector.extract_strided_slice %387 {offsets = [0, 32], sizes = [16, 32], strides = [1, 1]} : vector<16x64xf32> to vector<16x32xf32>
    %390 = vector.extract_strided_slice %382 {offsets = [0, 0], sizes = [1, 8], strides = [1, 1]} : vector<1x32xf32> to vector<1x8xf32>
    %391 = vector.extract_strided_slice %388 {offsets = [0, 0], sizes = [16, 8], strides = [1, 1]} : vector<16x32xf32> to vector<16x8xf32>
    %392 = vector.extract_strided_slice %389 {offsets = [0, 0], sizes = [16, 8], strides = [1, 1]} : vector<16x32xf32> to vector<16x8xf32>
    %cst_183 = arith.constant dense<0.000000e+00> : vector<1x16xf32>
    %393 = tpu.matmul %390, %391, %cst_183 {dimension_numbers = #tpu.dot_dimension_numbers<[1], [1], [0], [0], [0, 0, 1, 0], [], []>} : vector<1x8xf32>, vector<16x8xf32>, vector<1x16xf32> -> vector<1x16xf32>
    %cst_184 = arith.constant 0.176776692 : f32
    %394 = vector.broadcast %cst_184 : f32 to vector<1x16xf32>
    %395 = arith.mulf %393, %394 : vector<1x16xf32>
    %cst_185 = arith.constant dense<0xFF800000> : vector<1xf32>
    %396 = vector.multi_reduction <maximumf>, %395, %cst_185 [1] : vector<1x16xf32> to vector<1xf32>
    %397 = vector.shape_cast %396 : vector<1xf32> to vector<1x1xf32>
    %398 = vector.broadcast %397 : vector<1x1xf32> to vector<1x16xf32>
    %399 = arith.subf %395, %398 : vector<1x16xf32>
    %400 = math.exp %399 : vector<1x16xf32>
    %cst_186 = arith.constant dense<0.000000e+00> : vector<1xf32>
    %401 = vector.multi_reduction <add>, %400, %cst_186 [1] : vector<1x16xf32> to vector<1xf32>
    %402 = vector.shape_cast %401 : vector<1xf32> to vector<1x1xf32>
    %403 = tpu.reciprocal %402 {approx = true} : vector<1x1xf32> -> vector<1x1xf32>
    %404 = vector.broadcast %403 : vector<1x1xf32> to vector<1x16xf32>
    %405 = arith.mulf %400, %404 : vector<1x16xf32>
    %cst_187 = arith.constant dense<0.000000e+00> : vector<1x8xf32>
    %406 = tpu.matmul %405, %392, %cst_187 {dimension_numbers = #tpu.dot_dimension_numbers<[1], [0], [0], [1], [0, 0, 1, 1], [], []>} : vector<1x16xf32>, vector<16x8xf32>, vector<1x8xf32> -> vector<1x8xf32>
    %407 = arith.addf %390, %406 : vector<1x8xf32>
    %c0_188 = arith.constant 0 : index
    %c0_189 = arith.constant 0 : index
    %408 = vector.load %arg32[%c0_188, %c0_189] : memref<16x32xf32, #tpu.memory_space<vmem>>, vector<1x8xf32>
    tpu.vector_store %arg32[%c0_188, %c0_189], %407 {strides = array<i32>} : memref<16x32xf32, #tpu.memory_space<vmem>>, vector<1x8xf32>,
    %409 = vector.extract_strided_slice %382 {offsets = [0, 8], sizes = [1, 8], strides = [1, 1]} : vector<1x32xf32> to vector<1x8xf32>
    %410 = vector.extract_strided_slice %388 {offsets = [0, 8], sizes = [16, 8], strides = [1, 1]} : vector<16x32xf32> to vector<16x8xf32>
    %411 = vector.extract_strided_slice %389 {offsets = [0, 8], sizes = [16, 8], strides = [1, 1]} : vector<16x32xf32> to vector<16x8xf32>
    %cst_190 = arith.constant dense<0.000000e+00> : vector<1x16xf32>
    %412 = tpu.matmul %409, %410, %cst_190 {dimension_numbers = #tpu.dot_dimension_numbers<[1], [1], [0], [0], [0, 0, 1, 0], [], []>} : vector<1x8xf32>, vector<16x8xf32>, vector<1x16xf32> -> vector<1x16xf32>
    %cst_191 = arith.constant 0.176776692 : f32
    %413 = vector.broadcast %cst_191 : f32 to vector<1x16xf32>
    %414 = arith.mulf %412, %413 : vector<1x16xf32>
    %cst_192 = arith.constant dense<0xFF800000> : vector<1xf32>
    %415 = vector.multi_reduction <maximumf>, %414, %cst_192 [1] : vector<1x16xf32> to vector<1xf32>
    %416 = vector.shape_cast %415 : vector<1xf32> to vector<1x1xf32>
    %417 = vector.broadcast %416 : vector<1x1xf32> to vector<1x16xf32>
    %418 = arith.subf %414, %417 : vector<1x16xf32>
    %419 = math.exp %418 : vector<1x16xf32>
    %cst_193 = arith.constant dense<0.000000e+00> : vector<1xf32>
    %420 = vector.multi_reduction <add>, %419, %cst_193 [1] : vector<1x16xf32> to vector<1xf32>
    %421 = vector.shape_cast %420 : vector<1xf32> to vector<1x1xf32>
    %422 = tpu.reciprocal %421 {approx = true} : vector<1x1xf32> -> vector<1x1xf32>
    %423 = vector.broadcast %422 : vector<1x1xf32> to vector<1x16xf32>
    %424 = arith.mulf %419, %423 : vector<1x16xf32>
    %cst_194 = arith.constant dense<0.000000e+00> : vector<1x8xf32>
    %425 = tpu.matmul %424, %411, %cst_194 {dimension_numbers = #tpu.dot_dimension_numbers<[1], [0], [0], [1], [0, 0, 1, 1], [], []>} : vector<1x16xf32>, vector<16x8xf32>, vector<1x8xf32> -> vector<1x8xf32>
    %426 = arith.addf %409, %425 : vector<1x8xf32>
    %c0_195 = arith.constant 0 : index
    %c8_196 = arith.constant 8 : index
    %427 = vector.load %arg32[%c0_195, %c8_196] : memref<16x32xf32, #tpu.memory_space<vmem>>, vector<1x8xf32>
    tpu.vector_store %arg32[%c0_195, %c8_196], %426 {strides = array<i32>} : memref<16x32xf32, #tpu.memory_space<vmem>>, vector<1x8xf32>,
    %428 = vector.extract_strided_slice %382 {offsets = [0, 16], sizes = [1, 8], strides = [1, 1]} : vector<1x32xf32> to vector<1x8xf32>
    %429 = vector.extract_strided_slice %388 {offsets = [0, 16], sizes = [16, 8], strides = [1, 1]} : vector<16x32xf32> to vector<16x8xf32>
    %430 = vector.extract_strided_slice %389 {offsets = [0, 16], sizes = [16, 8], strides = [1, 1]} : vector<16x32xf32> to vector<16x8xf32>
    %cst_197 = arith.constant dense<0.000000e+00> : vector<1x16xf32>
    %431 = tpu.matmul %428, %429, %cst_197 {dimension_numbers = #tpu.dot_dimension_numbers<[1], [1], [0], [0], [0, 0, 1, 0], [], []>} : vector<1x8xf32>, vector<16x8xf32>, vector<1x16xf32> -> vector<1x16xf32>
    %cst_198 = arith.constant 0.176776692 : f32
    %432 = vector.broadcast %cst_198 : f32 to vector<1x16xf32>
    %433 = arith.mulf %431, %432 : vector<1x16xf32>
    %cst_199 = arith.constant dense<0xFF800000> : vector<1xf32>
    %434 = vector.multi_reduction <maximumf>, %433, %cst_199 [1] : vector<1x16xf32> to vector<1xf32>
    %435 = vector.shape_cast %434 : vector<1xf32> to vector<1x1xf32>
    %436 = vector.broadcast %435 : vector<1x1xf32> to vector<1x16xf32>
    %437 = arith.subf %433, %436 : vector<1x16xf32>
    %438 = math.exp %437 : vector<1x16xf32>
    %cst_200 = arith.constant dense<0.000000e+00> : vector<1xf32>
    %439 = vector.multi_reduction <add>, %438, %cst_200 [1] : vector<1x16xf32> to vector<1xf32>
    %440 = vector.shape_cast %439 : vector<1xf32> to vector<1x1xf32>
    %441 = tpu.reciprocal %440 {approx = true} : vector<1x1xf32> -> vector<1x1xf32>
    %442 = vector.broadcast %441 : vector<1x1xf32> to vector<1x16xf32>
    %443 = arith.mulf %438, %442 : vector<1x16xf32>
    %cst_201 = arith.constant dense<0.000000e+00> : vector<1x8xf32>
    %444 = tpu.matmul %443, %430, %cst_201 {dimension_numbers = #tpu.dot_dimension_numbers<[1], [0], [0], [1], [0, 0, 1, 1], [], []>} : vector<1x16xf32>, vector<16x8xf32>, vector<1x8xf32> -> vector<1x8xf32>
    %445 = arith.addf %428, %444 : vector<1x8xf32>
    %c0_202 = arith.constant 0 : index
    %c16_203 = arith.constant 16 : index
    %446 = vector.load %arg32[%c0_202, %c16_203] : memref<16x32xf32, #tpu.memory_space<vmem>>, vector<1x8xf32>
    tpu.vector_store %arg32[%c0_202, %c16_203], %445 {strides = array<i32>} : memref<16x32xf32, #tpu.memory_space<vmem>>, vector<1x8xf32>,
    %447 = vector.extract_strided_slice %382 {offsets = [0, 24], sizes = [1, 8], strides = [1, 1]} : vector<1x32xf32> to vector<1x8xf32>
    %448 = vector.extract_strided_slice %388 {offsets = [0, 24], sizes = [16, 8], strides = [1, 1]} : vector<16x32xf32> to vector<16x8xf32>
    %449 = vector.extract_strided_slice %389 {offsets = [0, 24], sizes = [16, 8], strides = [1, 1]} : vector<16x32xf32> to vector<16x8xf32>
    %cst_204 = arith.constant dense<0.000000e+00> : vector<1x16xf32>
    %450 = tpu.matmul %447, %448, %cst_204 {dimension_numbers = #tpu.dot_dimension_numbers<[1], [1], [0], [0], [0, 0, 1, 0], [], []>} : vector<1x8xf32>, vector<16x8xf32>, vector<1x16xf32> -> vector<1x16xf32>
    %cst_205 = arith.constant 0.176776692 : f32
    %451 = vector.broadcast %cst_205 : f32 to vector<1x16xf32>
    %452 = arith.mulf %450, %451 : vector<1x16xf32>
    %cst_206 = arith.constant dense<0xFF800000> : vector<1xf32>
    %453 = vector.multi_reduction <maximumf>, %452, %cst_206 [1] : vector<1x16xf32> to vector<1xf32>
    %454 = vector.shape_cast %453 : vector<1xf32> to vector<1x1xf32>
    %455 = vector.broadcast %454 : vector<1x1xf32> to vector<1x16xf32>
    %456 = arith.subf %452, %455 : vector<1x16xf32>
    %457 = math.exp %456 : vector<1x16xf32>
    %cst_207 = arith.constant dense<0.000000e+00> : vector<1xf32>
    %458 = vector.multi_reduction <add>, %457, %cst_207 [1] : vector<1x16xf32> to vector<1xf32>
    %459 = vector.shape_cast %458 : vector<1xf32> to vector<1x1xf32>
    %460 = tpu.reciprocal %459 {approx = true} : vector<1x1xf32> -> vector<1x1xf32>
    %461 = vector.broadcast %460 : vector<1x1xf32> to vector<1x16xf32>
    %462 = arith.mulf %457, %461 : vector<1x16xf32>
    %cst_208 = arith.constant dense<0.000000e+00> : vector<1x8xf32>
    %463 = tpu.matmul %462, %449, %cst_208 {dimension_numbers = #tpu.dot_dimension_numbers<[1], [0], [0], [1], [0, 0, 1, 1], [], []>} : vector<1x16xf32>, vector<16x8xf32>, vector<1x8xf32> -> vector<1x8xf32>
    %464 = arith.addf %447, %463 : vector<1x8xf32>
    %c0_209 = arith.constant 0 : index
    %c24_210 = arith.constant 24 : index
    %465 = vector.load %arg32[%c0_209, %c24_210] : memref<16x32xf32, #tpu.memory_space<vmem>>, vector<1x8xf32>
    tpu.vector_store %arg32[%c0_209, %c24_210], %464 {strides = array<i32>} : memref<16x32xf32, #tpu.memory_space<vmem>>, vector<1x8xf32>,
    %c0_211 = arith.constant 0 : index
    %c0_212 = arith.constant 0 : index
    %466 = vector.load %arg32[%c0_211, %c0_212] : memref<16x32xf32, #tpu.memory_space<vmem>>, vector<1x32xf32>
    %c0_213 = arith.constant 0 : index
    %c0_214 = arith.constant 0 : index
    %467 = vector.load %arg27[%c0_213, %c0_214] : memref<32x32xf32, #tpu.memory_space<vmem>>, vector<32x32xf32>
    %cst_215 = arith.constant dense<0.000000e+00> : vector<1x32xf32>
    %468 = tpu.matmul %466, %467, %cst_215 {dimension_numbers = #tpu.dot_dimension_numbers<[1], [0], [0], [1], [0, 0, 1, 1], [], []>} : vector<1x32xf32>, vector<32x32xf32>, vector<1x32xf32> -> vector<1x32xf32>
    %c0_216 = arith.constant 0 : index
    %c0_217 = arith.constant 0 : index
    %469 = vector.load %arg28[%c0_216, %c0_217] : memref<1x32xf32, #tpu.memory_space<vmem>>, vector<1x32xf32>
    %470 = arith.addf %468, %469 : vector<1x32xf32>
    %cst_218 = arith.constant 0.000000e+00 : f32
    %471 = vector.broadcast %cst_218 : f32 to vector<1x32xf32>
    %472 = arith.maximumf %470, %471 : vector<1x32xf32>
    %473 = arith.addf %466, %472 : vector<1x32xf32>
    %c0_219 = arith.constant 0 : index
    %c0_220 = arith.constant 0 : index
    %474 = vector.load %arg29[%c0_219, %c0_220] : memref<32x8xf32, #tpu.memory_space<vmem>>, vector<32x8xf32>
    %cst_221 = arith.constant dense<0.000000e+00> : vector<1x8xf32>
    %475 = tpu.matmul %473, %474, %cst_221 {dimension_numbers = #tpu.dot_dimension_numbers<[1], [0], [0], [1], [0, 0, 1, 1], [], []>} : vector<1x32xf32>, vector<32x8xf32>, vector<1x8xf32> -> vector<1x8xf32>
    %c0_222 = arith.constant 0 : index
    %c0_223 = arith.constant 0 : index
    %476 = vector.load %arg30[%c0_222, %c0_223] : memref<1x8xf32, #tpu.memory_space<vmem>>, vector<1x8xf32>
    %477 = arith.addf %475, %476 : vector<1x8xf32>
    %c0_224 = arith.constant 0 : index
    %c0_225 = arith.constant 0 : index
    %c0_226 = arith.constant 0 : index
    %478 = vector.load %arg31[%c0_224, %c0_225, %c0_226] : memref<1x1x8xf32, #tpu.memory_space<vmem>>, vector<1x1x8xf32>
    %479 = vector.shape_cast %478 : vector<1x1x8xf32> to vector<1x8xf32>
    %480 = vector.shape_cast %477 : vector<1x8xf32> to vector<1x1x8xf32>
    tpu.vector_store %arg31[%c0_224, %c0_225, %c0_226], %480 {strides = array<i32>} : memref<1x1x8xf32, #tpu.memory_space<vmem>>, vector<1x1x8xf32>,
    return
  }
  func.func @transform_0(%arg0: i32) -> (i32, i32, i32) {
    %c0_i32 = arith.constant 0 : i32
    %c0_i32_0 = arith.constant 0 : i32
    %c0_i32_1 = arith.constant 0 : i32
    return %arg0, %c0_i32, %c0_i32_0 : i32, i32, i32
  }
  func.func @transform_1(%arg0: i32) -> (i32, i32) {
    %c0_i32 = arith.constant 0 : i32
    %c0_i32_0 = arith.constant 0 : i32
    %c0_i32_1 = arith.constant 0 : i32
    return %c0_i32, %c0_i32_0 : i32, i32
  }
  func.func @transform_2(%arg0: i32) -> (i32, i32) {
    %c0_i32 = arith.constant 0 : i32
    %c0_i32_0 = arith.constant 0 : i32
    %c0_i32_1 = arith.constant 0 : i32
    return %c0_i32, %c0_i32_0 : i32, i32
  }
  func.func @transform_3(%arg0: i32) -> (i32, i32) {
    %c0_i32 = arith.constant 0 : i32
    %c0_i32_0 = arith.constant 0 : i32
    %c0_i32_1 = arith.constant 0 : i32
    return %c0_i32, %c0_i32_0 : i32, i32
  }
  func.func @transform_4(%arg0: i32) -> (i32, i32) {
    %c0_i32 = arith.constant 0 : i32
    %c0_i32_0 = arith.constant 0 : i32
    %c0_i32_1 = arith.constant 0 : i32
    return %c0_i32, %c0_i32_0 : i32, i32
  }
  func.func @transform_5(%arg0: i32) -> (i32, i32) {
    %c0_i32 = arith.constant 0 : i32
    %c0_i32_0 = arith.constant 0 : i32
    %c0_i32_1 = arith.constant 0 : i32
    return %c0_i32, %c0_i32_0 : i32, i32
  }
  func.func @transform_6(%arg0: i32) -> (i32, i32) {
    %c0_i32 = arith.constant 0 : i32
    %c0_i32_0 = arith.constant 0 : i32
    %c0_i32_1 = arith.constant 0 : i32
    return %c0_i32, %c0_i32_0 : i32, i32
  }
  func.func @transform_7(%arg0: i32) -> (i32, i32) {
    %c0_i32 = arith.constant 0 : i32
    %c0_i32_0 = arith.constant 0 : i32
    %c0_i32_1 = arith.constant 0 : i32
    return %c0_i32, %c0_i32_0 : i32, i32
  }
  func.func @transform_8(%arg0: i32) -> (i32, i32) {
    %c0_i32 = arith.constant 0 : i32
    %c0_i32_0 = arith.constant 0 : i32
    %c0_i32_1 = arith.constant 0 : i32
    return %c0_i32, %c0_i32_0 : i32, i32
  }
  func.func @transform_9(%arg0: i32) -> (i32, i32) {
    %c0_i32 = arith.constant 0 : i32
    %c0_i32_0 = arith.constant 0 : i32
    %c0_i32_1 = arith.constant 0 : i32
    return %c0_i32, %c0_i32_0 : i32, i32
  }
  func.func @transform_10(%arg0: i32) -> (i32, i32) {
    %c0_i32 = arith.constant 0 : i32
    %c0_i32_0 = arith.constant 0 : i32
    %c0_i32_1 = arith.constant 0 : i32
    return %c0_i32, %c0_i32_0 : i32, i32
  }
  func.func @transform_11(%arg0: i32) -> (i32, i32) {
    %c0_i32 = arith.constant 0 : i32
    %c0_i32_0 = arith.constant 0 : i32
    %c0_i32_1 = arith.constant 0 : i32
    return %c0_i32, %c0_i32_0 : i32, i32
  }
  func.func @transform_12(%arg0: i32) -> (i32, i32) {
    %c0_i32 = arith.constant 0 : i32
    %c0_i32_0 = arith.constant 0 : i32
    %c0_i32_1 = arith.constant 0 : i32
    return %c0_i32, %c0_i32_0 : i32, i32
  }
  func.func @transform_13(%arg0: i32) -> (i32, i32) {
    %c0_i32 = arith.constant 0 : i32
    %c0_i32_0 = arith.constant 0 : i32
    %c0_i32_1 = arith.constant 0 : i32
    return %c0_i32, %c0_i32_0 : i32, i32
  }
  func.func @transform_14(%arg0: i32) -> (i32, i32) {
    %c0_i32 = arith.constant 0 : i32
    %c0_i32_0 = arith.constant 0 : i32
    %c0_i32_1 = arith.constant 0 : i32
    return %c0_i32, %c0_i32_0 : i32, i32
  }
  func.func @transform_15(%arg0: i32) -> (i32, i32) {
    %c0_i32 = arith.constant 0 : i32
    %c0_i32_0 = arith.constant 0 : i32
    %c0_i32_1 = arith.constant 0 : i32
    return %c0_i32, %c0_i32_0 : i32, i32
  }
  func.func @transform_16(%arg0: i32) -> (i32, i32) {
    %c0_i32 = arith.constant 0 : i32
    %c0_i32_0 = arith.constant 0 : i32
    %c0_i32_1 = arith.constant 0 : i32
    return %c0_i32, %c0_i32_0 : i32, i32
  }
  func.func @transform_17(%arg0: i32) -> (i32, i32) {
    %c0_i32 = arith.constant 0 : i32
    %c0_i32_0 = arith.constant 0 : i32
    %c0_i32_1 = arith.constant 0 : i32
    return %c0_i32, %c0_i32_0 : i32, i32
  }
  func.func @transform_18(%arg0: i32) -> (i32, i32) {
    %c0_i32 = arith.constant 0 : i32
    %c0_i32_0 = arith.constant 0 : i32
    %c0_i32_1 = arith.constant 0 : i32
    return %c0_i32, %c0_i32_0 : i32, i32
  }
  func.func @transform_19(%arg0: i32) -> (i32, i32) {
    %c0_i32 = arith.constant 0 : i32
    %c0_i32_0 = arith.constant 0 : i32
    %c0_i32_1 = arith.constant 0 : i32
    return %c0_i32, %c0_i32_0 : i32, i32
  }
  func.func @transform_20(%arg0: i32) -> (i32, i32) {
    %c0_i32 = arith.constant 0 : i32
    %c0_i32_0 = arith.constant 0 : i32
    %c0_i32_1 = arith.constant 0 : i32
    return %c0_i32, %c0_i32_0 : i32, i32
  }
  func.func @transform_21(%arg0: i32) -> (i32, i32) {
    %c0_i32 = arith.constant 0 : i32
    %c0_i32_0 = arith.constant 0 : i32
    %c0_i32_1 = arith.constant 0 : i32
    return %c0_i32, %c0_i32_0 : i32, i32
  }
  func.func @transform_22(%arg0: i32) -> (i32, i32) {
    %c0_i32 = arith.constant 0 : i32
    %c0_i32_0 = arith.constant 0 : i32
    %c0_i32_1 = arith.constant 0 : i32
    return %c0_i32, %c0_i32_0 : i32, i32
  }
  func.func @transform_23(%arg0: i32) -> (i32, i32) {
    %c0_i32 = arith.constant 0 : i32
    %c0_i32_0 = arith.constant 0 : i32
    %c0_i32_1 = arith.constant 0 : i32
    return %c0_i32, %c0_i32_0 : i32, i32
  }
  func.func @transform_24(%arg0: i32) -> (i32, i32) {
    %c0_i32 = arith.constant 0 : i32
    %c0_i32_0 = arith.constant 0 : i32
    %c0_i32_1 = arith.constant 0 : i32
    return %c0_i32, %c0_i32_0 : i32, i32
  }
  func.func @transform_25(%arg0: i32) -> (i32, i32) {
    %c0_i32 = arith.constant 0 : i32
    %c0_i32_0 = arith.constant 0 : i32
    %c0_i32_1 = arith.constant 0 : i32
    return %c0_i32, %c0_i32_0 : i32, i32
  }
  func.func @transform_26(%arg0: i32) -> (i32, i32) {
    %c0_i32 = arith.constant 0 : i32
    %c0_i32_0 = arith.constant 0 : i32
    %c0_i32_1 = arith.constant 0 : i32
    return %c0_i32, %c0_i32_0 : i32, i32
  }
  func.func @transform_27(%arg0: i32) -> (i32, i32) {
    %c0_i32 = arith.constant 0 : i32
    %c0_i32_0 = arith.constant 0 : i32
    %c0_i32_1 = arith.constant 0 : i32
    return %c0_i32, %c0_i32_0 : i32, i32
  }
  func.func @transform_28(%arg0: i32) -> (i32, i32) {
    %c0_i32 = arith.constant 0 : i32
    %c0_i32_0 = arith.constant 0 : i32
    %c0_i32_1 = arith.constant 0 : i32
    return %c0_i32, %c0_i32_0 : i32, i32
  }
  func.func @transform_29(%arg0: i32) -> (i32, i32) {
    %c0_i32 = arith.constant 0 : i32
    %c0_i32_0 = arith.constant 0 : i32
    %c0_i32_1 = arith.constant 0 : i32
    return %c0_i32, %c0_i32_0 : i32, i32
  }
  func.func @transform_30(%arg0: i32) -> (i32, i32, i32) {
    %c0_i32 = arith.constant 0 : i32
    %c0_i32_0 = arith.constant 0 : i32
    %c0_i32_1 = arith.constant 0 : i32
    return %arg0, %c0_i32, %c0_i32_0 : i32, i32, i32
  }
}

</mosaic_0001>

<bundles_post_ra>
// kernel: tpu_custom_call.1
= control target key start
LH: loop header
LB: loop body
LE: loop exit
PB: predicated region body
PF: predicated region fallthrough
CT: control target
= control target key end

     0   :  { %s8518_s6 = smov 1   ;;  %s8519_s10 = smov 2   ;;  %s9744_s0 = inlined_call_operand.smem [shape: u32[31], index: -1, kind: input, shape index: {}] }
   0x1   :  { %s8593_s5 = sld [smem:[%s9744_s0]]   ;;  %s8520_s14 = smov 3  }
   0x2   :  { %s8598_s9 = sld [smem:[%s9744_s0 + %s8518_s6]]   ;;  %s8521_s18 = smov 4  }
   0x3   :  { %s8603_s13 = sld [smem:[%s9744_s0 + %s8519_s10]]   ;;  %s8522_s22 = smov 5  }
   0x4   :  { %s8608_s17 = sld [smem:[%s9744_s0 + %s8520_s14]]   ;;  %s8523_s26 = smov 6  }
   0x5   :  { %s8613_s21 = sld [smem:[%s9744_s0 + %s8521_s18]]   ;;  %s8524_s30 = smov 7  }
   0x6   :  { %s8618_s25 = sld [smem:[%s9744_s0 + %s8522_s22]]   ;;  %s8525_s4 = smov 8  }
   0x7   :  { %9801 = sst [smem:[#allocation48_spill]] %s8593_s5  ;;  %s8526_s10 = smov 9  }
   0x8   :  { %9802 = sst [smem:[#allocation49_spill]] %s8598_s9  ;;  %s8527_s15 = smov 10  }
   0x9   :  { %9803 = sst [smem:[#allocation50_spill]] %s8603_s13  ;;  %s8528_s20 = smov 11  }
   0xa   :  { %s8623_s29 = sld [smem:[%s9744_s0 + %s8523_s26]]   ;;  %s8529_s26 = smov 12  }
   0xb   :  { %9804 = sst [smem:[#allocation51_spill]] %s8613_s21  ;;  %s8530_s1 = smov 13  }
   0xc   :  { %s8628_s3 = sld [smem:[%s9744_s0 + %s8524_s30]]   ;;  %s8531_s7 = smov 14  }
   0xd   :  { %s8633_s8 = sld [smem:[%s9744_s0 + %s8525_s4]]   ;;  %s8533_s22 = smov 16  }
   0xe   :  { %s8638_s14 = sld [smem:[%s9744_s0 + %s8526_s10]]   ;;  %s8534_s28 = smov 17  }
   0xf   :  { %s8643_s19 = sld [smem:[%s9744_s0 + %s8527_s15]]   ;;  %s8532_s15 = smov 15  }
  0x10   :  { %9805 = sst [smem:[#allocation52_spill]] %s8623_s29 }
  0x11   :  { %s8648_s24 = sld [smem:[%s9744_s0 + %s8528_s20]]  }
  0x12   :  { %9806 = sst [smem:[#allocation53_spill]] %s8628_s3 }
  0x13   :  { %9807 = sst [smem:[#allocation54_spill]] %s8633_s8 }
  0x14   :  { %s8653_s30 = sld [smem:[%s9744_s0 + %s8529_s26]]  }
  0x15   :  { %9808 = sst [smem:[#allocation55_spill]] %s8643_s19 }
  0x16   :  { %s8658_s6 = sld [smem:[%s9744_s0 + %s8530_s1]]  }
  0x17   :  { %s8663_s12 = sld [smem:[%s9744_s0 + %s8531_s7]]   ;;  %s8535_s7 = smov 18  }
  0x18   :  { %s8668_s20 = sld [smem:[%s9744_s0 + %s8532_s15]]   ;;  %s8536_s15 = smov 19  }
  0x19   :  { %s8673_s27 = sld [smem:[%s9744_s0 + %s8533_s22]]   ;;  %s8537_s22 = smov 20  }
  0x1a   :  { %9809 = sst [smem:[#allocation56_spill]] %s8653_s30 }
  0x1b   :  { %s8678_s4 = sld [smem:[%s9744_s0 + %s8534_s28]]   ;;  %s8538_s28 = smov 21  }
  0x1c   :  { %9810 = sst [smem:[#allocation57_spill]] %s8658_s6 }
  0x1d   :  { %9811 = sst [smem:[#allocation58_spill]] %s8663_s12 }
  0x1e   :  { %9812 = sst [smem:[#allocation59_spill]] %s8668_s20 }
  0x1f   :  { %s8683_s12 = sld [smem:[%s9744_s0 + %s8535_s7]]   ;;  %s8539_s7 = smov 22  }
  0x20   :  { %s8688_s30 = sld [smem:[%s9744_s0 + %s8536_s15]]   ;;  %s8540_s15 = smov 23  }
  0x21   :  { %9813 = sst [smem:[#allocation60_spill]] %s8678_s4 }
  0x22   :  { %s8693_s19 = sld [smem:[%s9744_s0 + %s8537_s22]]   ;;  %s8541_s22 = smov 24  }
  0x23   :  { %s8698_s29 = sld [smem:[%s9744_s0 + %s8538_s28]]   ;;  %s8542_s28 = smov 25  }
  0x24   :  { %s8703_s5 = sld [smem:[%s9744_s0 + %s8539_s7]]   ;;  %s8543_s7 = smov 26  }
  0x25   :  { %s8713_s4 = sld [smem:[%s9744_s0 + %s8541_s22]]   ;;  %s8545_s22 = smov 28  }
  0x26   :  { %9814 = sst [smem:[#allocation61_spill]] %s8688_s30 }
  0x27   :  { %s8708_s30 = sld [smem:[%s9744_s0 + %s8540_s15]]   ;;  %s8544_s15 = smov 27  }
  0x28   :  { %s8728_s20 = sld [smem:[%s9744_s0 + %s8544_s15]]  }
  0x29   :  { %9815 = sst [smem:[#allocation62_spill]] %s8698_s29 }
  0x2a   :  { %9816 = sst [smem:[#allocation63_spill]] %s8703_s5 }
  0x2b   :  { %9817 = sst [smem:[#allocation64_spill]] %s8713_s4 }
  0x2c   :  { %s8718_s29 = sld [smem:[%s9744_s0 + %s8542_s28]]   ;;  %s8546_s28 = smov 29  }
  0x2d   :  { %s8723_s5 = sld [smem:[%s9744_s0 + %s8543_s7]]   ;;  %s8547_s7 = smov 30  }
  0x2e   :  { %s8733_s4 = sld [smem:[%s9744_s0 + %s8545_s22]]  }
  0x32   :  { %9818 = sst [smem:[#allocation65_spill]] %s8718_s29 }
  0x33   :  { %9819 = sst [smem:[#allocation66_spill]] %s8723_s5 }
  0x34   :  { %s8738_s29 = sld [smem:[%s9744_s0 + %s8546_s28]]  }
  0x35   :  { %s8743_s5 = sld [smem:[%s9744_s0 + %s8547_s7]]  }
  0x36   :  { %66 = vsyncpa [#allocation4], 0 }
  0x37   :  { %67 = vsyncpa [#allocation7], 0 }
  0x38   :  { %68 = vsyncpa [#allocation10], 0 }
  0x39   :  { %69 = vsyncpa [#allocation13], 0 }
  0x3a   :  { %70 = vsyncpa [#allocation16], 0 }
  0x3b   :  { %71 = vsyncpa [#allocation19], 0 }
  0x3c   :  { %72 = vsyncpa [#allocation22], 0 }
  0x3d   :  { %73 = vsyncpa [#allocation25], 0 }
  0x3e   :  { %74 = vsyncpa [#allocation28], 0 }
  0x3f   :  { %75 = vsyncpa [#allocation31], 0 }
  0x40   :  { %76 = vsyncpa [#allocation34], 0 }
  0x41   :  { %77 = vsyncpa [#allocation5], 0 }
  0x42   :  { %79 = vsyncpa [#allocation5 + $0x1], 0  ;;  %s8745_s15 = smov 0   ;;  %s8747_s16 = smov 0  }
  0x43   :  { %s8749_s18 = smov 0   ;;  %s8751_s0 = smov 0  }
  0x44 LB: > { %s9820_s9 = sld [smem:[#allocation49_spill]]  ;;  %s9821_s8 = sld [smem:[#allocation54_spill]]  ;;  %s8508_s16 = sphi %s8747_s16, %s9897_s16   ;;  %s8504_s15 = sphi %s8745_s15, %s9896_s15   ;;  %s8516_s0 = sphi %s8751_s0, %s9893_s0   ;;  %s8512_s18 = sphi %s8749_s18, %s9895_s18  }
  0x45   : > { %s9822_s6 = sld [smem:[#allocation57_spill]]  ;;  %s9823_s3 = sld [smem:[#allocation53_spill]] }
  0x46   : > { %s9824_s21 = sld [smem:[#allocation51_spill]]  ;;  %s9825_s13 = sld [smem:[#allocation50_spill]] }
  0x47   : > { %9826 = sst [smem:[#allocation67_spill]] %s8504_s15  ;;  %s8766_s22 = sadd.s32 4294967295, %s8516_s0  }
  0x48   : > { %9827 = sst [smem:[#allocation68_spill]] %s8512_s18  ;;  %s6451_s23 = sadd.s32 4294967294, %s8516_s0  }
  0x49   : > { %s8770_s26 = sadd.s32 1, %s8516_s0   ;;  %s727_s28 = sadd.s32 1, %s8512_s18 }
  0x4a   : > { %9828 = sst [smem:[#allocation69_spill]] %s8770_s26  ;;  %s724_s1 = ssub.s32 %s8516_s0, %s8770_s26 }
  0x4b   : > { %p737_p0 = scmp.ne.s32.totalorder %s8512_s18, %s8508_s16  ;;  %p725_p1 = scmp.eq.s32.totalorder %s724_s1, 0 }
  0x4c   : > { %p738_p2 = scmp.eq.s32.totalorder %s8766_s22, 1  ;;  %p743_p3 = scmp.ne.s32.totalorder %s8508_s16, %s8504_s15 }
  0x4d   : > { %p744_p4 = scmp.eq.s32.totalorder %s6451_s23, 1  ;;  %p6452_p7 = scmp.ge.s32.totalorder %s8516_s0, 1 }
  0x4e   : > { %s8781_s2 = scalar_select %p725_p1, %s8512_s18, %s727_s28  }
  0x4f   : > { %p8783_p5 = por %p738_p2, %p737_p0  ;;  %p8787_p6 = por %p744_p4, %p743_p3 }
  0x50   : > { %9829 = sst [smem:[#allocation70_spill]] %s8781_s2  ;;  %p751_p8 = scmp.lt.s32.totalorder %s8516_s0, 3 }
  0x51   : > { %s9830_s7 = scalar_select %p8783_p5, 1, 0 }
  0x52   : > { %s9831_s10 = scalar_select %p8787_p6, 1, 0 }
  0x53   : > { %p9761_p9 = scmp.eq.s32.totalorder %s8766_s22, 0  ;;  %p8794_p10 = pnand %p6452_p7, %p751_p8 }
  0x54   : > { %9832 = sst [smem:[#allocation71_spill]] %s9831_s10  ;;  %s8548_s23 = smov [#allocation6]  }
  0x55   : > { %s9833_s11 = scalar_select %p8794_p10, 1, 0 }
  0x56   : > { %s775_s28 = sshll.u32 %s8548_s23, 4  ;;  %p7429_p11 = pneg %p8794_p10  ;;  %s776_s28 = int_to_ptr.vmem [resolvable:$true] %s775_s28 }
  0x57   : > { %s8549_s1 = smov [#allocation9]   ;;  %s8550_s26 = smov [#allocation12]  }
  0x58   : > { %s797_s2 = sshll.u32 %s8549_s1, 4  ;;  %p8802_p12 = pnand %p9761_p9, %p7429_p11  ;;  %s8806_s2 = int_to_ptr.vmem [resolvable:$true] %s797_s2 }
  0x59   : > { %s822_s10 = sshll.u32 %s8550_s26, 4  ;;  %s7850_s15 = scalar_lea.hbm %s9825_s13, 128  ;;  %s8808_s10 = int_to_ptr.vmem [resolvable:$true] %s822_s10 }
  0x5a   : > { %p7851_p13 = scmp.ne.s32.totalorder %s9825_s13, %s7850_s15  ;;  %p8814_p0 = pneg %p8802_p12 }
  0x5b   : > { %p7857_p3 = scmp.lt.u32.totalorder %s7850_s15, %s9825_s13 }
  0x5c   : > { %p7853_p1 = pnand %p8814_p0, %p7851_p13 }
  0x5e   : > { %p7854_p2 = pneg %p7853_p1 }
  0x60   : > { %p7859_p4 = pnand %p7857_p3, %p7854_p2 }
  0x62   : > { %7862 = shalt.err (!%p7859_p4)
}
  0x63   : > { %s7863_s1 = scalar_lea.vmem %s776_s28, 128  ;;  %p7871_p9 = scmp.lt.s32.totalorder %s776_s28, %s776_s28 }
  0x64   : > { %p7864_p7 = scmp.ne.s32.totalorder %s776_s28, %s7863_s1  ;;  %p7872_p6 = scmp.lt.s32.totalorder %s7863_s1, %s7863_s1 }
  0x66   : > { %p7866_p8 = pnand %p7864_p7, %p8814_p0  ;;  %p7873_p5 = por %p7872_p6, %p7871_p9 }
  0x68   : > { %p7867_p11 = pneg %p7866_p8 }
  0x6a   : > { %p7874_p10 = pnand %p7873_p5, %p7867_p11 }
  0x6c   : > { %7877 = shalt.err (!%p7874_p10)
}
  0x6d   : > { %7435 = dma.hbm_to_vmem [thread:$0]  (!%p8802_p12), %s9825_s13, 128, %s776_s28, [#allocation7]  }
  0x6e   : > { %s7878_s15 = scalar_lea.hbm %s9824_s21, 64 }
  0x6f   : > { %p7879_p13 = scmp.ne.s32.totalorder %s9824_s21, %s7878_s15  ;;  %p7885_p3 = scmp.lt.u32.totalorder %s7878_s15, %s9824_s21 }
  0x71   : > { %p7881_p1 = pnand %p7879_p13, %p8814_p0 }
  0x73   : > { %p7882_p2 = pneg %p7881_p1 }
  0x75   : > { %p7887_p4 = pnand %p7885_p3, %p7882_p2 }
  0x77   : > { %7890 = shalt.err (!%p7887_p4)
}
  0x78   : > { %s7891_s26 = scalar_lea.vmem %s8806_s2, 64  ;;  %p7899_p10 = scmp.lt.s32.totalorder %s8806_s2, %s8806_s2 }
  0x79   : > { %p7892_p5 = scmp.ne.s32.totalorder %s8806_s2, %s7891_s26  ;;  %p7900_p7 = scmp.lt.s32.totalorder %s7891_s26, %s7891_s26 }
  0x7b   : > { %p7894_p6 = pnand %p7892_p5, %p8814_p0  ;;  %p7901_p8 = por %p7900_p7, %p7899_p10 }
  0x7d   : > { %p7895_p9 = pneg %p7894_p6 }
  0x7f   : > { %p7902_p11 = pnand %p7901_p8, %p7895_p9 }
  0x81   : > { %7905 = shalt.err (!%p7902_p11)
}
  0x82   : > { %7441 = dma.hbm_to_vmem [thread:$0]  (!%p8802_p12), %s9824_s21, 64, %s8806_s2, [#allocation10]  }
  0x83   : > { %s7906_s28 = scalar_lea.hbm %s9823_s3, 16 }
  0x84   : > { %p7907_p13 = scmp.ne.s32.totalorder %s9823_s3, %s7906_s28  ;;  %p7913_p3 = scmp.lt.u32.totalorder %s7906_s28, %s9823_s3 }
  0x86   : > { %p7909_p1 = pnand %p7907_p13, %p8814_p0 }
  0x88   : > { %p7910_p2 = pneg %p7909_p1 }
  0x8a   : > { %p7915_p4 = pnand %p7913_p3, %p7910_p2 }
  0x8c   : > { %7918 = shalt.err (!%p7915_p4)
}
  0x8d   : > { %s7919_s1 = scalar_lea.vmem %s8808_s10, 16  ;;  %s7926_s15 = scalar_lea.vmem %s8808_s10, 32 }
  0x8e   : > { %p7920_p5 = scmp.ne.s32.totalorder %s8808_s10, %s7919_s1  ;;  %p7927_p10 = scmp.lt.s32.totalorder %s8808_s10, %s8808_s10 }
  0x8f   : > { %p7928_p7 = scmp.lt.s32.totalorder %s7926_s15, %s7919_s1 }
  0x90   : > { %p7922_p6 = pnand %p7920_p5, %p8814_p0 }
  0x91   : > { %p7929_p8 = por %p7928_p7, %p7927_p10 }
  0x92   : > { %p7923_p9 = pneg %p7922_p6 }
  0x94   : > { %p7930_p11 = pnand %p7929_p8, %p7923_p9 }
  0x96   : > { %7933 = shalt.err (!%p7930_p11)
}
  0x97   : > { %7447 = dma.hbm_to_vmem [thread:$0]  (!%p8802_p12), %s9823_s3, 16, %s8808_s10, [#allocation13]  }
  0x98   : > { %s8551_s2 = smov [#allocation15]   ;;  %s8552_s28 = smov [#allocation18]  }
  0x99   : > { %s844_s26 = sshll.u32 %s8551_s2, 4  ;;  %s872_s13 = sshll.u32 %s8552_s28, 4  ;;  %s845_s26 = int_to_ptr.vmem [resolvable:$true] %s844_s26  ;;  %s873_s13 = int_to_ptr.vmem [resolvable:$true] %s872_s13 }
  0x9a   : > { %s7934_s21 = scalar_lea.hbm %s8638_s14, 16 }
  0x9b   : > { %p7935_p13 = scmp.ne.s32.totalorder %s8638_s14, %s7934_s21  ;;  %p7941_p3 = scmp.lt.u32.totalorder %s7934_s21, %s8638_s14 }
  0x9d   : > { %p7937_p1 = pnand %p7935_p13, %p8814_p0 }
  0x9f   : > { %p7938_p2 = pneg %p7937_p1 }
  0xa1   : > { %p7943_p4 = pnand %p7941_p3, %p7938_p2 }
  0xa3   : > { %7946 = shalt.err (!%p7943_p4)
}
  0xa4   : > { %s7947_s1 = scalar_lea.vmem %s845_s26, 16  ;;  %s7954_s10 = scalar_lea.vmem %s845_s26, 32 }
  0xa5   : > { %p7948_p5 = scmp.ne.s32.totalorder %s845_s26, %s7947_s1  ;;  %p7955_p10 = scmp.lt.s32.totalorder %s845_s26, %s845_s26 }
  0xa6   : > { %p7956_p7 = scmp.lt.s32.totalorder %s7954_s10, %s7947_s1 }
  0xa7   : > { %p7950_p6 = pnand %p7948_p5, %p8814_p0 }
  0xa8   : > { %p7957_p8 = por %p7956_p7, %p7955_p10 }
  0xa9   : > { %p7951_p9 = pneg %p7950_p6 }
  0xab   : > { %p7958_p11 = pnand %p7957_p8, %p7951_p9 }
  0xad   : > { %7961 = shalt.err (!%p7958_p11)
}
  0xae   : > { %7453 = dma.hbm_to_vmem [thread:$0]  (!%p8802_p12), %s8638_s14, 16, %s845_s26, [#allocation16]  }
  0xaf   : > { %s7962_s21 = scalar_lea.hbm %s9822_s6, 16 }
  0xb0   : > { %p7963_p13 = scmp.ne.s32.totalorder %s9822_s6, %s7962_s21  ;;  %p7969_p3 = scmp.lt.u32.totalorder %s7962_s21, %s9822_s6 }
  0xb2   : > { %p7965_p1 = pnand %p7963_p13, %p8814_p0 }
  0xb4   : > { %p7966_p2 = pneg %p7965_p1 }
  0xb6   : > { %p7971_p4 = pnand %p7969_p3, %p7966_p2 }
  0xb8   : > { %7974 = shalt.err (!%p7971_p4)
}
  0xb9   : > { %s7975_s15 = scalar_lea.vmem %s873_s13, 16  ;;  %s7982_s2 = scalar_lea.vmem %s873_s13, 32 }
  0xba   : > { %p7976_p5 = scmp.ne.s32.totalorder %s873_s13, %s7975_s15  ;;  %p7983_p10 = scmp.lt.s32.totalorder %s873_s13, %s873_s13 }
  0xbb   : > { %p7984_p7 = scmp.lt.s32.totalorder %s7982_s2, %s7975_s15 }
  0xbc   : > { %p7978_p6 = pnand %p7976_p5, %p8814_p0 }
  0xbd   : > { %p7985_p8 = por %p7984_p7, %p7983_p10 }
  0xbe   : > { %p7979_p9 = pneg %p7978_p6 }
  0xc0   : > { %p7986_p11 = pnand %p7985_p8, %p7979_p9 }
  0xc2   : > { %7989 = shalt.err (!%p7986_p11)
}
  0xc3   : > { %7459 = dma.hbm_to_vmem [thread:$0]  (!%p8802_p12), %s9822_s6, 16, %s873_s13, [#allocation19]  }
  0xc4   : > { %s8553_s26 = smov [#allocation21]   ;;  %s7990_s1 = scalar_lea.hbm %s8673_s27, 512 }
  0xc5   : > { %s896_s28 = sshll.u32 %s8553_s26, 4  ;;  %p7991_p13 = scmp.ne.s32.totalorder %s8673_s27, %s7990_s1  ;;  %s897_s28 = int_to_ptr.vmem [resolvable:$true] %s896_s28 }
  0xc6   : > { %p7997_p3 = scmp.lt.u32.totalorder %s7990_s1, %s8673_s27 }
  0xc7   : > { %p7993_p1 = pnand %p7991_p13, %p8814_p0 }
  0xc9   : > { %p7994_p2 = pneg %p7993_p1 }
  0xcb   : > { %p7999_p4 = pnand %p7997_p3, %p7994_p2 }
  0xcd   : > { %8002 = shalt.err (!%p7999_p4)
}
  0xce   : > { %s8003_s10 = scalar_lea.vmem %s897_s28, 512  ;;  %p8011_p10 = scmp.lt.s32.totalorder %s897_s28, %s897_s28 }
  0xcf   : > { %p8004_p5 = scmp.ne.s32.totalorder %s897_s28, %s8003_s10  ;;  %p8012_p7 = scmp.lt.s32.totalorder %s8003_s10, %s8003_s10 }
  0xd1   : > { %p8006_p6 = pnand %p8004_p5, %p8814_p0  ;;  %p8013_p8 = por %p8012_p7, %p8011_p10 }
  0xd3   : > { %p8007_p9 = pneg %p8006_p6 }
  0xd5   : > { %p8014_p11 = pnand %p8013_p8, %p8007_p9 }
  0xd7   : > { %8017 = shalt.err (!%p8014_p11)
}
  0xd8   : > { %s9767_s13 = smov 128   ;;  %s9769_s21 = smov 8  }
  0xd9   : > { %7465 = dma.hbm_to_vmem [thread:$0]  (!%p8802_p12), %s8673_s27, 512, %s897_s28, [#allocation22], %s9767_s13, %s9767_s13, %s9769_s21  }
  0xda   : > { %s8556_s15 = smov [#allocation24]   ;;  %s8557_s26 = smov [#allocation27]  }
  0xdb   : > { %s920_s2 = sshll.u32 %s8556_s15, 4  ;;  %s944_s1 = sshll.u32 %s8557_s26, 4  ;;  %s921_s2 = int_to_ptr.vmem [resolvable:$true] %s920_s2  ;;  %s8890_s1 = int_to_ptr.vmem [resolvable:$true] %s944_s1 }
  0xdc   : > { %s8018_s10 = scalar_lea.hbm %s8683_s12, 512 }
  0xdd   : > { %p8019_p13 = scmp.ne.s32.totalorder %s8683_s12, %s8018_s10  ;;  %p8025_p3 = scmp.lt.u32.totalorder %s8018_s10, %s8683_s12 }
  0xdf   : > { %p8021_p1 = pnand %p8019_p13, %p8814_p0 }
  0xe1   : > { %p8022_p2 = pneg %p8021_p1 }
  0xe3   : > { %p8027_p4 = pnand %p8025_p3, %p8022_p2 }
  0xe5   : > { %8030 = shalt.err (!%p8027_p4)
}
  0xe6   : > { %s8031_s3 = scalar_lea.vmem %s921_s2, 512  ;;  %p8039_p10 = scmp.lt.s32.totalorder %s921_s2, %s921_s2 }
  0xe7   : > { %p8032_p5 = scmp.ne.s32.totalorder %s921_s2, %s8031_s3  ;;  %p8040_p7 = scmp.lt.s32.totalorder %s8031_s3, %s8031_s3 }
  0xe9   : > { %p8034_p6 = pnand %p8032_p5, %p8814_p0  ;;  %p8041_p8 = por %p8040_p7, %p8039_p10 }
  0xeb   : > { %p8035_p9 = pneg %p8034_p6 }
  0xed   : > { %p8042_p11 = pnand %p8041_p8, %p8035_p9 }
  0xef   : > { %8045 = shalt.err (!%p8042_p11)
}
  0xf0   : > { %7471 = dma.hbm_to_vmem [thread:$0]  (!%p8802_p12), %s8683_s12, 512, %s921_s2, [#allocation25], %s9767_s13, %s9767_s13, %s9769_s21  }
  0xf1   : > { %s8046_s28 = scalar_lea.hbm %s8693_s19, 512 }
  0xf2   : > { %p8047_p13 = scmp.ne.s32.totalorder %s8693_s19, %s8046_s28  ;;  %p8053_p3 = scmp.lt.u32.totalorder %s8046_s28, %s8693_s19 }
  0xf4   : > { %p8049_p1 = pnand %p8047_p13, %p8814_p0 }
  0xf6   : > { %p8050_p2 = pneg %p8049_p1 }
  0xf8   : > { %p8055_p4 = pnand %p8053_p3, %p8050_p2 }
  0xfa   : > { %8058 = shalt.err (!%p8055_p4)
}
  0xfb   : > { %s8059_s3 = scalar_lea.vmem %s8890_s1, 512  ;;  %p8067_p10 = scmp.lt.s32.totalorder %s8890_s1, %s8890_s1 }
  0xfc   : > { %p8060_p5 = scmp.ne.s32.totalorder %s8890_s1, %s8059_s3  ;;  %p8068_p7 = scmp.lt.s32.totalorder %s8059_s3, %s8059_s3 }
  0xfe   : > { %p8062_p6 = pnand %p8060_p5, %p8814_p0  ;;  %p8069_p8 = por %p8068_p7, %p8067_p10 }
 0x100   : > { %p8063_p9 = pneg %p8062_p6 }
 0x102   : > { %p8070_p11 = pnand %p8069_p8, %p8063_p9 }
 0x104   : > { %8073 = shalt.err (!%p8070_p11)
}
 0x105   : > { %7477 = dma.hbm_to_vmem [thread:$0]  (!%p8802_p12), %s8693_s19, 512, %s8890_s1, [#allocation28], %s9767_s13, %s9767_s13, %s9769_s21  }
 0x106   : > { %s8558_s15 = smov [#allocation30]   ;;  %s8559_s26 = smov [#allocation3]  }
 0x107   : > { %s972_s2 = sshll.u32 %s8558_s15, 4  ;;  %s764_s10 = sshll.u32 %s8559_s26, 4  ;;  %s973_s2 = int_to_ptr.vmem [resolvable:$true] %s972_s2  ;;  %s8923_s10 = int_to_ptr.vmem [resolvable:$true] %s764_s10 }
 0x108   : > { %s8074_s28 = scalar_lea.hbm %s8708_s30, 16 }
 0x109   : > { %p8075_p13 = scmp.ne.s32.totalorder %s8708_s30, %s8074_s28  ;;  %p8081_p3 = scmp.lt.u32.totalorder %s8074_s28, %s8708_s30 }
 0x10b   : > { %p8077_p1 = pnand %p8075_p13, %p8814_p0 }
 0x10d   : > { %p8078_p2 = pneg %p8077_p1 }
 0x10f   : > { %p8083_p4 = pnand %p8081_p3, %p8078_p2 }
 0x111   : > { %8086 = shalt.err (!%p8083_p4)
}
 0x112   : > { %s8087_s3 = scalar_lea.vmem %s973_s2, 16  ;;  %s8094_s1 = scalar_lea.vmem %s973_s2, 32 }
 0x113   : > { %p8088_p5 = scmp.ne.s32.totalorder %s973_s2, %s8087_s3  ;;  %p8095_p10 = scmp.lt.s32.totalorder %s973_s2, %s973_s2 }
 0x114   : > { %p8096_p7 = scmp.lt.s32.totalorder %s8094_s1, %s8087_s3 }
 0x115   : > { %p8090_p6 = pnand %p8088_p5, %p8814_p0 }
 0x116   : > { %p8097_p8 = por %p8096_p7, %p8095_p10 }
 0x117   : > { %p8091_p9 = pneg %p8090_p6 }
 0x119   : > { %p8098_p11 = pnand %p8097_p8, %p8091_p9 }
 0x11b   : > { %8101 = shalt.err (!%p8098_p11)
}
 0x11c   : > { %7483 = dma.hbm_to_vmem [thread:$0]  (!%p8802_p12), %s8708_s30, 16, %s973_s2, [#allocation31]  }
 0x11d   : > { %s8102_s15 = scalar_lea.hbm %s9820_s9, 128 }
 0x11e   : > { %p8103_p13 = scmp.ne.s32.totalorder %s9820_s9, %s8102_s15  ;;  %p8109_p3 = scmp.lt.u32.totalorder %s8102_s15, %s9820_s9 }
 0x120   : > { %p8105_p1 = pnand %p8103_p13, %p8814_p0 }
 0x122   : > { %p8106_p2 = pneg %p8105_p1 }
 0x124   : > { %p8111_p4 = pnand %p8109_p3, %p8106_p2 }
 0x126   : > { %8114 = shalt.err (!%p8111_p4)
}
 0x127   : > { %s8115_s26 = scalar_lea.vmem %s8923_s10, 128  ;;  %p8123_p10 = scmp.lt.s32.totalorder %s8923_s10, %s8923_s10 }
 0x128   : > { %p8116_p5 = scmp.ne.s32.totalorder %s8923_s10, %s8115_s26  ;;  %p8124_p7 = scmp.lt.s32.totalorder %s8115_s26, %s8115_s26 }
 0x12a   : > { %p8118_p6 = pnand %p8116_p5, %p8814_p0  ;;  %p8125_p8 = por %p8124_p7, %p8123_p10 }
 0x12c   : > { %p8119_p9 = pneg %p8118_p6 }
 0x12e   : > { %p8126_p11 = pnand %p8125_p8, %p8119_p9 }
 0x130   : > { %8129 = shalt.err (!%p8126_p11)
}
 0x131   : > { %7432 = dma.hbm_to_vmem [thread:$0]  (!%p8802_p12), %s9820_s9, 128, %s8923_s10, [#allocation4]  }
 0x132   : > { %s8560_s2 = smov [#allocation8]   ;;  %s8561_s3 = smov [#allocation11]  }
 0x133   : > { %s786_s28 = sshll.u32 %s8560_s2, 4  ;;  %s808_s1 = sshll.u32 %s8561_s3, 4  ;;  %s787_s28 = int_to_ptr.vmem [resolvable:$true] %s786_s28  ;;  %s8950_s1 = int_to_ptr.vmem [resolvable:$true] %s808_s1 }
 0x134   : > { %s8130_s15 = scalar_lea.hbm %s8608_s17, 16 }
 0x135   : > { %p8131_p13 = scmp.ne.s32.totalorder %s8608_s17, %s8130_s15  ;;  %p8137_p3 = scmp.lt.u32.totalorder %s8130_s15, %s8608_s17 }
 0x137   : > { %p8133_p1 = pnand %p8131_p13, %p8814_p0 }
 0x139   : > { %p8134_p2 = pneg %p8133_p1 }
 0x13b   : > { %p8139_p4 = pnand %p8137_p3, %p8134_p2 }
 0x13d   : > { %8142 = shalt.err (!%p8139_p4)
}
 0x13e   : > { %s8143_s26 = scalar_lea.vmem %s787_s28, 16  ;;  %s8150_s10 = scalar_lea.vmem %s787_s28, 32 }
 0x13f   : > { %p8144_p5 = scmp.ne.s32.totalorder %s787_s28, %s8143_s26  ;;  %p8151_p10 = scmp.lt.s32.totalorder %s787_s28, %s787_s28 }
 0x140   : > { %p8152_p7 = scmp.lt.s32.totalorder %s8150_s10, %s8143_s26 }
 0x141   : > { %p8146_p6 = pnand %p8144_p5, %p8814_p0 }
 0x142   : > { %p8153_p8 = por %p8152_p7, %p8151_p10 }
 0x143   : > { %p8147_p9 = pneg %p8146_p6 }
 0x145   : > { %p8154_p11 = pnand %p8153_p8, %p8147_p9 }
 0x147   : > { %8157 = shalt.err (!%p8154_p11)
}
 0x148   : > { %7438 = dma.hbm_to_vmem [thread:$0]  (!%p8802_p12), %s8608_s17, 16, %s787_s28, [#allocation7]  }
 0x149   : > { %s8158_s2 = scalar_lea.hbm %s8618_s25, 16 }
 0x14a   : > { %p8159_p13 = scmp.ne.s32.totalorder %s8618_s25, %s8158_s2  ;;  %p8165_p3 = scmp.lt.u32.totalorder %s8158_s2, %s8618_s25 }
 0x14c   : > { %p8161_p1 = pnand %p8159_p13, %p8814_p0 }
 0x14e   : > { %p8162_p2 = pneg %p8161_p1 }
 0x150   : > { %p8167_p4 = pnand %p8165_p3, %p8162_p2 }
 0x152   : > { %8170 = shalt.err (!%p8167_p4)
}
 0x153   : > { %s8171_s3 = scalar_lea.vmem %s8950_s1, 16  ;;  %s8178_s15 = scalar_lea.vmem %s8950_s1, 32 }
 0x154   : > { %p8172_p5 = scmp.ne.s32.totalorder %s8950_s1, %s8171_s3  ;;  %p8179_p10 = scmp.lt.s32.totalorder %s8950_s1, %s8950_s1 }
 0x155   : > { %p8180_p7 = scmp.lt.s32.totalorder %s8178_s15, %s8171_s3 }
 0x156   : > { %p8174_p6 = pnand %p8172_p5, %p8814_p0 }
 0x157   : > { %p8181_p8 = por %p8180_p7, %p8179_p10 }
 0x158   : > { %p8175_p9 = pneg %p8174_p6 }
 0x15a   : > { %p8182_p11 = pnand %p8181_p8, %p8175_p9 }
 0x15c   : > { %8185 = shalt.err (!%p8182_p11)
}
 0x15d   : > { %7444 = dma.hbm_to_vmem [thread:$0]  (!%p8802_p12), %s8618_s25, 16, %s8950_s1, [#allocation10]  }
 0x15e   : > { %s8562_s28 = smov [#allocation14]   ;;  %s8563_s10 = smov [#allocation17]  }
 0x15f   : > { %s833_s26 = sshll.u32 %s8562_s28, 4  ;;  %s858_s2 = sshll.u32 %s8563_s10, 4  ;;  %s834_s26 = int_to_ptr.vmem [resolvable:$true] %s833_s26  ;;  %s8978_s2 = int_to_ptr.vmem [resolvable:$true] %s858_s2 }
 0x160   : > { %s8186_s3 = scalar_lea.hbm %s9821_s8, 64 }
 0x161   : > { %p8187_p13 = scmp.ne.s32.totalorder %s9821_s8, %s8186_s3  ;;  %p8193_p3 = scmp.lt.u32.totalorder %s8186_s3, %s9821_s8 }
 0x163   : > { %p8189_p1 = pnand %p8187_p13, %p8814_p0 }
 0x165   : > { %p8190_p2 = pneg %p8189_p1 }
 0x167   : > { %p8195_p4 = pnand %p8193_p3, %p8190_p2 }
 0x169   : > { %8198 = shalt.err (!%p8195_p4)
}
 0x16a   : > { %s8199_s15 = scalar_lea.vmem %s834_s26, 64  ;;  %p8207_p10 = scmp.lt.s32.totalorder %s834_s26, %s834_s26 }
 0x16b   : > { %p8200_p5 = scmp.ne.s32.totalorder %s834_s26, %s8199_s15  ;;  %p8208_p7 = scmp.lt.s32.totalorder %s8199_s15, %s8199_s15 }
 0x16d   : > { %p8202_p6 = pnand %p8200_p5, %p8814_p0  ;;  %p8209_p8 = por %p8208_p7, %p8207_p10 }
 0x16f   : > { %p8203_p9 = pneg %p8202_p6 }
 0x171   : > { %p8210_p11 = pnand %p8209_p8, %p8203_p9 }
 0x173   : > { %8213 = shalt.err (!%p8210_p11)
}
 0x174   : > { %7450 = dma.hbm_to_vmem [thread:$0]  (!%p8802_p12), %s9821_s8, 64, %s834_s26, [#allocation13]  }
 0x175   : > { %s8214_s1 = scalar_lea.hbm %s8648_s24, 16 }
 0x176   : > { %p8215_p13 = scmp.ne.s32.totalorder %s8648_s24, %s8214_s1  ;;  %p8221_p3 = scmp.lt.u32.totalorder %s8214_s1, %s8648_s24 }
 0x178   : > { %p8217_p1 = pnand %p8215_p13, %p8814_p0 }
 0x17a   : > { %p8218_p2 = pneg %p8217_p1 }
 0x17c   : > { %p8223_p4 = pnand %p8221_p3, %p8218_p2 }
 0x17e   : > { %8226 = shalt.err (!%p8223_p4)
}
 0x17f   : > { %s8227_s28 = scalar_lea.vmem %s8978_s2, 16  ;;  %s8234_s10 = scalar_lea.vmem %s8978_s2, 32 }
 0x180   : > { %p8228_p5 = scmp.ne.s32.totalorder %s8978_s2, %s8227_s28  ;;  %p8235_p10 = scmp.lt.s32.totalorder %s8978_s2, %s8978_s2 }
 0x181   : > { %p8236_p7 = scmp.lt.s32.totalorder %s8234_s10, %s8227_s28 }
 0x182   : > { %p8230_p6 = pnand %p8228_p5, %p8814_p0 }
 0x183   : > { %p8237_p8 = por %p8236_p7, %p8235_p10 }
 0x184   : > { %p8231_p9 = pneg %p8230_p6 }
 0x186   : > { %p8238_p11 = pnand %p8237_p8, %p8231_p9 }
 0x188   : > { %8241 = shalt.err (!%p8238_p11)
}
 0x189   : > { %s9836_s26 = sld [smem:[#allocation59_spill]]  ;;  %s8564_s3 = smov [#allocation20]  }
 0x18a   : > { %7456 = dma.hbm_to_vmem [thread:$0]  (!%p8802_p12), %s8648_s24, 16, %s8978_s2, [#allocation16]  }
 0x18b   : > { %s886_s15 = sshll.u32 %s8564_s3, 4  ;;  %s8565_s1 = smov [#allocation23]   ;;  %s887_s15 = int_to_ptr.vmem [resolvable:$true] %s886_s15 }
 0x18c   : > { %s910_s13 = sshll.u32 %s8565_s1, 4  ;;  %s9006_s13 = int_to_ptr.vmem [resolvable:$true] %s910_s13 }
 0x18f   : > { %s8242_s28 = scalar_lea.hbm %s9836_s26, 16 }
 0x190   : > { %p8243_p13 = scmp.ne.s32.totalorder %s9836_s26, %s8242_s28  ;;  %p8249_p3 = scmp.lt.u32.totalorder %s8242_s28, %s9836_s26 }
 0x192   : > { %p8245_p1 = pnand %p8243_p13, %p8814_p0 }
 0x194   : > { %p8246_p2 = pneg %p8245_p1 }
 0x196   : > { %p8251_p4 = pnand %p8249_p3, %p8246_p2 }
 0x198   : > { %8254 = shalt.err (!%p8251_p4)
}
 0x199   : > { %s8255_s10 = scalar_lea.vmem %s887_s15, 16  ;;  %s8262_s2 = scalar_lea.vmem %s887_s15, 32 }
 0x19a   : > { %p8256_p5 = scmp.ne.s32.totalorder %s887_s15, %s8255_s10  ;;  %p8263_p10 = scmp.lt.s32.totalorder %s887_s15, %s887_s15 }
 0x19b   : > { %p8264_p7 = scmp.lt.s32.totalorder %s8262_s2, %s8255_s10 }
 0x19c   : > { %p8258_p6 = pnand %p8256_p5, %p8814_p0 }
 0x19d   : > { %p8265_p8 = por %p8264_p7, %p8263_p10 }
 0x19e   : > { %p8259_p9 = pneg %p8258_p6 }
 0x1a0   : > { %p8266_p11 = pnand %p8265_p8, %p8259_p9 }
 0x1a2   : > { %8269 = shalt.err (!%p8266_p11)
}
 0x1a3   : > { %s9837_s3 = sld [smem:[#allocation60_spill]] }
 0x1a4   : > { %7462 = dma.hbm_to_vmem [thread:$0]  (!%p8802_p12), %s9836_s26, 16, %s887_s15, [#allocation19]  }
 0x1a9   : > { %s8270_s1 = scalar_lea.hbm %s9837_s3, 16 }
 0x1aa   : > { %p8271_p13 = scmp.ne.s32.totalorder %s9837_s3, %s8270_s1  ;;  %p8277_p3 = scmp.lt.u32.totalorder %s8270_s1, %s9837_s3 }
 0x1ac   : > { %p8273_p1 = pnand %p8271_p13, %p8814_p0 }
 0x1ae   : > { %p8274_p2 = pneg %p8273_p1 }
 0x1b0   : > { %p8279_p4 = pnand %p8277_p3, %p8274_p2 }
 0x1b2   : > { %8282 = shalt.err (!%p8279_p4)
}
 0x1b3   : > { %s8283_s28 = scalar_lea.vmem %s9006_s13, 16  ;;  %s8290_s10 = scalar_lea.vmem %s9006_s13, 32 }
 0x1b4   : > { %p8284_p5 = scmp.ne.s32.totalorder %s9006_s13, %s8283_s28  ;;  %p8291_p10 = scmp.lt.s32.totalorder %s9006_s13, %s9006_s13 }
 0x1b5   : > { %p8292_p7 = scmp.lt.s32.totalorder %s8290_s10, %s8283_s28 }
 0x1b6   : > { %p8286_p6 = pnand %p8284_p5, %p8814_p0 }
 0x1b7   : > { %p8293_p8 = por %p8292_p7, %p8291_p10 }
 0x1b8   : > { %p8287_p9 = pneg %p8286_p6 }
 0x1ba   : > { %p8294_p11 = pnand %p8293_p8, %p8287_p9 }
 0x1bc   : > { %8297 = shalt.err (!%p8294_p11)
}
 0x1bd   : > { %s9838_s15 = sld [smem:[#allocation61_spill]]  ;;  %s8566_s1 = smov [#allocation26]  }
 0x1be   : > { %7468 = dma.hbm_to_vmem [thread:$0]  (!%p8802_p12), %s9837_s3, 16, %s9006_s13, [#allocation22]  }
 0x1bf   : > { %s934_s21 = sshll.u32 %s8566_s1, 4  ;;  %s8567_s6 = smov [#allocation29]   ;;  %s935_s21 = int_to_ptr.vmem [resolvable:$true] %s934_s21 }
 0x1c0   : > { %s958_s8 = sshll.u32 %s8567_s6, 4  ;;  %s9034_s8 = int_to_ptr.vmem [resolvable:$true] %s958_s8 }
 0x1c3   : > { %s9839_s2 = smov %s9838_s15  ;;  %s8298_s28 = scalar_lea.hbm %s9838_s15, 16 }
 0x1c4   : > { %p8299_p13 = scmp.ne.s32.totalorder %s9839_s2, %s8298_s28  ;;  %p8305_p3 = scmp.lt.u32.totalorder %s8298_s28, %s9839_s2 }
 0x1c6   : > { %p8301_p1 = pnand %p8299_p13, %p8814_p0 }
 0x1c8   : > { %p8302_p2 = pneg %p8301_p1 }
 0x1ca   : > { %p8307_p4 = pnand %p8305_p3, %p8302_p2 }
 0x1cc   : > { %8310 = shalt.err (!%p8307_p4)
}
 0x1cd   : > { %s8311_s10 = scalar_lea.vmem %s935_s21, 16  ;;  %s8318_s13 = scalar_lea.vmem %s935_s21, 32 }
 0x1ce   : > { %p8312_p5 = scmp.ne.s32.totalorder %s935_s21, %s8311_s10  ;;  %p8319_p10 = scmp.lt.s32.totalorder %s935_s21, %s935_s21 }
 0x1cf   : > { %p8320_p7 = scmp.lt.s32.totalorder %s8318_s13, %s8311_s10 }
 0x1d0   : > { %p8314_p6 = pnand %p8312_p5, %p8814_p0 }
 0x1d1   : > { %p8321_p8 = por %p8320_p7, %p8319_p10 }
 0x1d2   : > { %p8315_p9 = pneg %p8314_p6 }
 0x1d4   : > { %p8322_p11 = pnand %p8321_p8, %p8315_p9 }
 0x1d6   : > { %8325 = shalt.err (!%p8322_p11)
}
 0x1d7   : > { %s9840_s6 = sld [smem:[#allocation62_spill]] }
 0x1d8   : > { %7474 = dma.hbm_to_vmem [thread:$0]  (!%p8802_p12), %s9839_s2, 16, %s935_s21, [#allocation25]  }
 0x1dd   : > { %s8326_s15 = scalar_lea.hbm %s9840_s6, 16 }
 0x1de   : > { %p8327_p13 = scmp.ne.s32.totalorder %s9840_s6, %s8326_s15  ;;  %p8333_p3 = scmp.lt.u32.totalorder %s8326_s15, %s9840_s6 }
 0x1e0   : > { %p8329_p1 = pnand %p8327_p13, %p8814_p0 }
 0x1e2   : > { %p8330_p2 = pneg %p8329_p1 }
 0x1e4   : > { %p8335_p4 = pnand %p8333_p3, %p8330_p2 }
 0x1e6   : > { %8338 = shalt.err (!%p8335_p4)
}
 0x1e7   : > { %s8339_s1 = scalar_lea.vmem %s9034_s8, 16  ;;  %s8346_s28 = scalar_lea.vmem %s9034_s8, 32 }
 0x1e8   : > { %p8340_p5 = scmp.ne.s32.totalorder %s9034_s8, %s8339_s1  ;;  %p8347_p10 = scmp.lt.s32.totalorder %s9034_s8, %s9034_s8 }
 0x1e9   : > { %p8348_p7 = scmp.lt.s32.totalorder %s8346_s28, %s8339_s1 }
 0x1ea   : > { %p8342_p6 = pnand %p8340_p5, %p8814_p0 }
 0x1eb   : > { %p8349_p8 = por %p8348_p7, %p8347_p10 }
 0x1ec   : > { %p8343_p9 = pneg %p8342_p6 }
 0x1ee   : > { %p8350_p11 = pnand %p8349_p8, %p8343_p9 }
 0x1f0   : > { %8353 = shalt.err (!%p8350_p11)
}
 0x1f1   : > { %s9841_s21 = sld [smem:[#allocation64_spill]]  ;;  %s8568_s10 = smov [#allocation32]  }
 0x1f2   : > { %7480 = dma.hbm_to_vmem [thread:$0]  (!%p8802_p12), %s9840_s6, 16, %s9034_s8, [#allocation28]  }
 0x1f3   : > { %s982_s13 = sshll.u32 %s8568_s10, 4  ;;  %s8569_s15 = smov [#allocation33]   ;;  %s983_s13 = int_to_ptr.vmem [resolvable:$true] %s982_s13 }
 0x1f4   : > { %s998_s2 = sshll.u32 %s8569_s15, 4  ;;  %s9062_s2 = int_to_ptr.vmem [resolvable:$true] %s998_s2 }
 0x1f7   : > { %s8354_s1 = scalar_lea.hbm %s9841_s21, 512 }
 0x1f8   : > { %p8355_p13 = scmp.ne.s32.totalorder %s9841_s21, %s8354_s1  ;;  %p8361_p3 = scmp.lt.u32.totalorder %s8354_s1, %s9841_s21 }
 0x1fa   : > { %p8357_p1 = pnand %p8355_p13, %p8814_p0 }
 0x1fc   : > { %p8358_p2 = pneg %p8357_p1 }
 0x1fe   : > { %p8363_p4 = pnand %p8361_p3, %p8358_p2 }
 0x200   : > { %8366 = shalt.err (!%p8363_p4)
}
 0x201   : > { %s8367_s28 = scalar_lea.vmem %s983_s13, 512  ;;  %p8375_p10 = scmp.lt.s32.totalorder %s983_s13, %s983_s13 }
 0x202   : > { %p8368_p5 = scmp.ne.s32.totalorder %s983_s13, %s8367_s28  ;;  %p8376_p7 = scmp.lt.s32.totalorder %s8367_s28, %s8367_s28 }
 0x204   : > { %p8370_p6 = pnand %p8368_p5, %p8814_p0  ;;  %p8377_p8 = por %p8376_p7, %p8375_p10 }
 0x206   : > { %p8371_p9 = pneg %p8370_p6 }
 0x208   : > { %p8378_p11 = pnand %p8377_p8, %p8371_p9 }
 0x20a   : > { %8381 = shalt.err (!%p8378_p11)
}
 0x20b   : > { %s9842_s8 = smov 8   ;;  %s9843_s10 = smov 128  }
 0x20c   : > { %s9844_s15 = sld [smem:[#allocation66_spill]] }
 0x20d   : > { %7486 = dma.hbm_to_vmem [thread:$0]  (!%p8802_p12), %s9841_s21, 512, %s983_s13, [#allocation31], %s9843_s10, %s9843_s10, %s9842_s8  }
 0x212   : > { %s9845_s1 = smov %s9844_s15  ;;  %s8382_s3 = scalar_lea.hbm %s9844_s15, 512 }
 0x213   : > { %p8383_p13 = scmp.ne.s32.totalorder %s9845_s1, %s8382_s3  ;;  %p8389_p3 = scmp.lt.u32.totalorder %s8382_s3, %s9845_s1 }
 0x215   : > { %p8385_p1 = pnand %p8383_p13, %p8814_p0 }
 0x217   : > { %p8386_p2 = pneg %p8385_p1 }
 0x219   : > { %p8391_p4 = pnand %p8389_p3, %p8386_p2 }
 0x21b   : > { %8394 = shalt.err (!%p8391_p4)
}
 0x21c   : > { %s8395_s28 = scalar_lea.vmem %s9062_s2, 512  ;;  %p8403_p10 = scmp.lt.s32.totalorder %s9062_s2, %s9062_s2 }
 0x21d   : > { %p8396_p5 = scmp.ne.s32.totalorder %s9062_s2, %s8395_s28  ;;  %p8404_p7 = scmp.lt.s32.totalorder %s8395_s28, %s8395_s28 }
 0x21f   : > { %p8398_p6 = pnand %p8396_p5, %p8814_p0  ;;  %p8405_p8 = por %p8404_p7, %p8403_p10 }
 0x221   : > { %p8399_p9 = pneg %p8398_p6 }
 0x223   : > { %p8406_p11 = pnand %p8405_p8, %p8399_p9 }
 0x225   : > { %8409 = shalt.err (!%p8406_p11)
}
 0x226   : > { %7489 = dma.hbm_to_vmem [thread:$0]  (!%p8802_p12), %s9845_s1, 512, %s9062_s2, [#allocation34], %s9843_s10, %s9843_s10, %s9842_s8  }
 0x227   : > { %p9846_p13 = scmp.ne.s32.totalorder %s9833_s11, 0 }
 0x228   : > { %p9847_p0 = scmp.eq.s32.totalorder (!%p9846_p13), %s8766_s22, 0 }
 0x229   : > { %1031 = sbr.rel (%p9846_p13) target bundleno = 12450 (0x30a2), region = 140 }
 0x230   : > { %8455 = dma.done.wait (%p9847_p0), [#allocation4], 128   ;;  %p9848_p1 = pmov %p9847_p0 }
 0x231   : > { %p9849_p2 = pmov %p9847_p0 }
 0x232   : > { %8457 = vsyncadd (%p9848_p1), [#allocation4], 4294967168 }
 0x233   : > { %8459 = dma.done.wait (%p9849_p2), [#allocation7], 144   ;;  %p9850_p3 = pmov %p9847_p0 }
 0x234   : > { %p9851_p4 = pmov %p9847_p0 }
 0x235   : > { %8461 = vsyncadd (%p9850_p3), [#allocation7], 4294967152 }
 0x236   : > { %8463 = dma.done.wait (%p9851_p4), [#allocation10], 80   ;;  %p9852_p12 = pmov %p9847_p0 }
 0x237   : > { %p9853_p5 = pmov %p9847_p0 }
 0x238   : > { %8465 = vsyncadd (%p9852_p12), [#allocation10], 4294967216 }
 0x239   : > { %8467 = dma.done.wait (%p9853_p5), [#allocation13], 80   ;;  %p9854_p6 = pmov %p9847_p0 }
 0x23a   : > { %p9855_p9 = pmov %p9847_p0 }
 0x23b   : > { %8469 = vsyncadd (%p9854_p6), [#allocation13], 4294967216 }
 0x23c   : > { %8471 = dma.done.wait (%p9855_p9), [#allocation16], 32   ;;  %p9856_p10 = pmov %p9847_p0 }
 0x23d   : > { %p9857_p7 = pmov %p9847_p0 }
 0x23e   : > { %8473 = vsyncadd (%p9856_p10), [#allocation16], 4294967264 }
 0x23f   : > { %8475 = dma.done.wait (%p9857_p7), [#allocation19], 32   ;;  %p9858_p8 = pmov %p9847_p0 }
 0x240   : > { %p9859_p11 = pmov %p9847_p0 }
 0x241   : > { %8477 = vsyncadd (%p9858_p8), [#allocation19], 4294967264 }
 0x242   : > { %8479 = dma.done.wait (%p9859_p11), [#allocation22], 528   ;;  %p9860_p13 = pmov %p9847_p0 }
 0x244   : > { %8481 = vsyncadd (%p9860_p13), [#allocation22], 4294966768 }
 0x245   : > { %8483 = dma.done.wait (%p9847_p0), [#allocation25], 528   ;;  %p9861_p1 = pmov %p9847_p0 }
 0x246   : > { %p9862_p2 = pmov %p9847_p0 }
 0x247   : > { %8485 = vsyncadd (%p9861_p1), [#allocation25], 4294966768 }
 0x248   : > { %8487 = dma.done.wait (%p9862_p2), [#allocation28], 528   ;;  %p9863_p3 = pmov %p9847_p0 }
 0x249   : > { %p9864_p4 = pmov %p9847_p0 }
 0x24a   : > { %8489 = vsyncadd (%p9863_p3), [#allocation28], 4294966768 }
 0x24b   : > { %8491 = dma.done.wait (%p9864_p4), [#allocation31], 528   ;;  %p9865_p12 = pmov %p9847_p0 }
 0x24c   : > { %p9866_p5 = pmov %p9847_p0 }
 0x24d   : > { %8493 = vsyncadd (%p9865_p12), [#allocation31], 4294966768 }
 0x24e   : > { %8495 = dma.done.wait (%p9866_p5), [#allocation34], 512   ;;  %p9867_p6 = pmov %p9847_p0 }
 0x24f   : > { %s9868_s18 = sld [smem:[#allocation48_spill]]  ;;  %p1184_p9 = scmp.lt.s32.totalorder %s8766_s22, 1  ;;  %vm1207_vm0 = vcmask 1042432   ;;  %vm1200_vm1 = vcmask 23552   ;;  %v1192_v0 = vld [vmem:[#allocation9] sm:$0x7] }
 0x250   : > { %8497 = vsyncadd (%p9867_p6), [#allocation34], 4294966784  ;;  %6808 = vmatprep.subr.msk.mxu0 %vm1207_vm0, %v1192_v0  ;;  %v8570_v3 = vmov 0.0|0.0   ;;  %vm8571_vm2 = vmmov 0   ;;  %v8572_v4 = vmov 0.0   ;;  %vm1286_vm3 = vcmask 64512  }
 0x251   : > { %s1185_s11 = scalar_select %p1184_p9, %s8766_s22, 1  ;;  %6809 = vmatpush3.msk.msra.mxu0 %vm1207_vm0, %v1192_v0  ;;  %7187 = vmatprep.subr.bf16.mxu1 %v8570_v3  ;;  %v6497_v5 = vld [vmem:[#allocation11] ss:$0 sm:$0xff]  ;;  %vm9162_vm4 = vmpackc.low %vm1286_vm3, %vm1286_vm3  ;;  %v9175_v13 = vld [vmem:[#allocation3] sm:$0xff]  ;;  %vm1367_vm5 = vcmask 130048   ;;  %vm1638_vm6 = vcmask 130112  }
 0x252   : > { %7191 = vmatprep.subr.bf16.mxu0 %v8570_v3  ;;  %6817 = vmatprep.mubr.msk.f32.mxu1 %vm8571_vm2, %v8572_v4  ;;  %s9789_s2 = smov 96   ;;  %s9793_s13 = smov 120   ;;  %vm1818_vm7 = vcmask 195712   ;;  %vm1998_vm8 = vcmask 261312   ;;  %vm2012_vm9 = vcmask 261120   ;;  %vm5320_vm10 = vcmask 122880  }
 0x253   : > { %s6621_s23 = sshll.u32 %s1185_s11, 4  ;;  %s9787_s8 = smov 88   ;;  %vm5412_vm11 = vcmask 57344   ;;  %vm5610_vm12 = vcmask 122944   ;;  %vm5804_vm13 = vcmask 188544   ;;  %vm5998_vm14 = vcmask 254144  }
 0x254   : > { %s9785_s10 = smov 112   ;;  %s9783_s15 = smov 80  }
 0x255   : > { %s1188_s3 = scalar_lea.vmem %s9868_s18, %s6621_s23  ;;  %s9781_s28 = smov 104  }
 0x256   : > { %v9144_v1 = vld [vmem:[%s1188_s3] sm:$0xff]  ;;  %v9146_v2 = vld [vmem:[%s1188_s3 + $0x8] sm:$0xff]  ;;  %s9779_s18 = smov 72   ;;  %s9775_s11 = smov 16  }
 0x257   : > { %6810 = vmatprep.mubr.msk.f32.mxu0 %vm1200_vm1, %v9144_v1  ;;  %s9777_s23 = smov 8   ;;  %s9871_s3 = sld [smem:[#allocation52_spill]] }
 0x258   : > { %6811 = vmatmul.mubr.msk.f32.vlgmr.msra.gmra.mrb[0].mxu0 %vm1200_vm1, %v9146_v2  ;;  %s9883_s1 = smov 72   ;;  %s9885_s6 = smov 24  }
 0x259   : > { %6824 = vmatprep.mubr.msk.f32.mxu0 %vm8571_vm2, %v8572_v4  ;;  %s9887_s9 = sld [smem:[#allocation63_spill]]  ;;  %p9889_p7 = scmp.ne.s32.totalorder %s9830_s7, 0 }
 0x32b   : > { %v6812_v6 = vpop.f32.mrb[0].mxu0 }
 0x32c   : > { %v1283_v7 = vadd.f32 %v6812_v6, %v6497_v5  ;;  %v1277_v8 = vpop.f32.mrb[1].mxu0 }
 0x32d   : > { %v1278_v9 = vadd.f32 %v6497_v5, %v1277_v8 }
 0x32f   : > { %v9166_v11 = vpack.i.bf16 %v1283_v7, %v1278_v9  ;;  %v7188_v12 = vpack.c.bf16 %v1283_v7, %v1278_v9 }
 0x331   : > { %7634 = vrot.lane.b32.xlu1 %v9166_v11, %s9789_s2  ;;  %7190 = vmatpush3.bf16.xpose.msk.msra.mxu1 %vm9162_vm4, %v7188_v12 }
 0x332   : > { %7198 = vmatprep.subr.bf16.mxu1 %v8570_v3 }
 0x335   : > { %7639 = vrot.lane.b32.xlu1 %v9166_v11, %s9793_s13 }
 0x338   : > { %6818 = vmatmul.mubr.msk.f32.vlgmr.msra.gmra.mrb[0].mxu1 %vm1286_vm3, %v9175_v13 }
 0x339   : > { %6838 = vmatprep.mubr.msk.f32.mxu1 %vm8571_vm2, %v8572_v4 }
 0x3a3   : > { %v7635_v14 = vpop.permute.xlu1 %7634 }
 0x3a4   : > { %v7637_v15 = vunpack.i.h.bf16 %v7635_v14  ;;  %v7636_v16 = vunpack.i.l.bf16 %v7635_v14 }
 0x3a6   : > { %v7192_v17 = vpack.c.bf16 %v7637_v15, %v7636_v16 }
 0x3a7   : > { %v7640_v28 = vpop.permute.xlu1 %7639 }
 0x3a8   : > { %7193 = vmatpush3.bf16.msra.mxu0 %v7192_v17  ;;  %v7642_v29 = vunpack.i.h.bf16 %v7640_v28  ;;  %v7641_v30 = vunpack.i.l.bf16 %v7640_v28 }
 0x3a9   : > { %7194 = vmatprep.subr.bf16.mxu0 %v8570_v3 }
 0x3aa   : > { %v7195_v33 = vpack.c.bf16 %v7642_v29, %v7641_v30 }
 0x40b   : > { %v1362_v18 = vpop.f32.mrb[0].mxu1 }
 0x40c   : > { %v1366_v19 = vmul.f32 0.17677669, %v1362_v18  ;;  %v6819_v20 = vpop.f32.mrb[1].mxu1 }
 0x40e   : > { %v1368_v21 = vsel %vm1367_vm5, %v1366_v19, -inf }
 0x40f   : > { %1369 = vmax.xlane.f32.xlu0 %v1368_v21 }
 0x49c   : > { %v1370_v22 = vpop.xlane.xlu0 %1369 }
 0x49d   : > { %v1371_v23 = vsub.f32 %v1366_v19, %v1370_v22 }
 0x49f   : > { %v1372_v24 = vmul.f32 1.442695, %v1371_v23 }
 0x4a1   : > { %7738 = vpow2.f32 %v1372_v24 }
 0x4ab   : > { %v7739_v25 = vpop.eup %7738 }
 0x4ac   : > { %v1374_v26 = vsel %vm1367_vm5, %v7739_v25, 0.0 }
 0x4ad   : > { %1375 = vadd.xlane.f32.xlu0 %v1374_v26 }
 0x4c3   : > { %1460 = vrot.lane.b32.xlu0 %v9175_v13, %s9793_s13 }
 0x53a   : > { %v1376_v27 = vpop.xlane.xlu0 %1375 }
 0x53b   : > { %7740 = vrcp.f32 %v1376_v27 }
 0x53e   : > { %v1461_v34 = vpop.permute.xlu0 %1460 }
 0x545   : > { %v7741_v31 = vpop.eup %7740 }
 0x546   : > { %v1378_v32 = vmul.f32 %v7741_v31, %v7739_v25 }
 0x548   : > { %6825 = vmatmul.mubr.msk.f32.vlgmr.msra.gmra.mrb[2].mxu0 %vm1367_vm5, %v1378_v32 }
 0x549   : > { %7197 = vmatpush3.bf16.xpose.msk.msra.mxu0 %vm9162_vm4, %v7195_v33  ;;  %6831 = vmatprep.mubr.msk.f32.mxu0 %vm8571_vm2, %v8572_v4 }
 0x54a   : > { %7205 = vmatprep.subr.bf16.mxu0 %v8570_v3 }
 0x550   : > { %6832 = vmatmul.mubr.msk.f32.vlgmr.msra.gmra.mrb[4].mxu0 %vm1286_vm3, %v1461_v34 }
 0x551   : > { %6852 = vmatprep.mubr.msk.f32.mxu0 %vm8571_vm2, %v8572_v4 }
 0x61b   : > { %v1454_v35 = vpop.f32.mrb[2].mxu0 }
 0x61c   : > { %v1458_v36 = vadd.f32 %v1454_v35, %v9175_v13  ;;  %v6826_v37 = vpop.f32.mrb[3].mxu0 }
 0x61e   : > { %1459 = vst.msk [vmem:[#allocation2] sm:$0xff] %vm1286_vm3, %v1458_v36 }
 0x623   : > { %v1538_v38 = vpop.f32.mrb[4].mxu0 }
 0x624   : > { %v1542_v39 = vmul.f32 0.17677669, %v1538_v38  ;;  %v6833_v40 = vpop.f32.mrb[5].mxu0 }
 0x626   : > { %v1543_v41 = vsel %vm1367_vm5, %v1542_v39, -inf }
 0x627   : > { %1544 = vmax.xlane.f32.xlu1 %v1543_v41 }
 0x638   : > { %7644 = vrot.lane.b32.xlu1 %v9166_v11, %s9787_s8 }
 0x63c   : > { %1640 = vrot.lane.b32.xlu1 %v9175_v13, %s9785_s10 }
 0x6b4   : > { %v1545_v42 = vpop.xlane.xlu1 %1544 }
 0x6b5   : > { %v1546_v43 = vsub.f32 %v1542_v39, %v1545_v42 }
 0x6b7   : > { %v1547_v44 = vmul.f32 1.442695, %v1546_v43 }
 0x6b8   : > { %v7645_v45 = vpop.permute.xlu1 %7644 }
 0x6b9   : > { %7742 = vpow2.f32 %v1547_v44  ;;  %v7647_v46 = vunpack.i.h.bf16 %v7645_v45  ;;  %v7646_v47 = vunpack.i.l.bf16 %v7645_v45  ;;  %v2001_v45 = vld [vmem:[%s9871_s3] sm:$0xff] }
 0x6bb   : > { %v7199_v48 = vpack.c.bf16 %v7647_v46, %v7646_v47  ;;  %v2002_v46 = vld [vmem:[%s9871_s3 + $0x8] sm:$0xff] }
 0x6bc   : > { %v1641_v58 = vpop.permute.xlu1 %1640  ;;  %v7216_v47 = vpack.c.bf16 %v2002_v46, %v2001_v45 }
 0x6bd   : > { %7200 = vmatpush3.bf16.msra.mxu1 %v7199_v48  ;;  %v2003_v48 = vld [vmem:[%s9871_s3 + $0x10] sm:$0xff] }
 0x6be   : > { %7201 = vmatprep.subr.bf16.mxu1 %v8570_v3 }
 0x6c3   : > { %v7743_v49 = vpop.eup %7742 }
 0x6c4   : > { %v1549_v50 = vsel %vm1367_vm5, %v7743_v49, 0.0 }
 0x6c5   : > { %1550 = vadd.xlane.f32.xlu0 %v1549_v50 }
 0x6db   : > { %7649 = vrot.lane.b32.xlu0 %v9166_v11, %s9785_s10 }
 0x752   : > { %v1551_v51 = vpop.xlane.xlu0 %1550 }
 0x753   : > { %7744 = vrcp.f32 %v1551_v51  ;;  %v2088_v51 = vld [vmem:[#allocation14] sm:$0x7] }
 0x756   : > { %v7650_v52 = vpop.permute.xlu0 %7649 }
 0x757   : > { %v7652_v53 = vunpack.i.h.bf16 %v7650_v52  ;;  %v7651_v54 = vunpack.i.l.bf16 %v7650_v52 }
 0x759   : > { %v7202_v57 = vpack.c.bf16 %v7652_v53, %v7651_v54 }
 0x75d   : > { %v7745_v55 = vpop.eup %7744 }
 0x75e   : > { %v1553_v56 = vmul.f32 %v7745_v55, %v7743_v49  ;;  %v2004_v49 = vld [vmem:[%s9871_s3 + $0x18] sm:$0xff]  ;;  %s9884_s3 = smov 120  }
 0x75f   : > { %v7219_v50 = vpack.c.bf16 %v2004_v49, %v2003_v48 }
 0x760   : > { %6839 = vmatmul.mubr.msk.f32.vlgmr.msra.gmra.mrb[2].mxu1 %vm1367_vm5, %v1553_v56 }
 0x761   : > { %7204 = vmatpush3.bf16.xpose.msk.msra.mxu1 %vm9162_vm4, %v7202_v57  ;;  %6845 = vmatprep.mubr.msk.f32.mxu1 %vm8571_vm2, %v8572_v4 }
 0x762   : > { %7212 = vmatprep.subr.bf16.mxu1 %v8570_v3 }
 0x768   : > { %6846 = vmatmul.mubr.msk.f32.vlgmr.msra.gmra.mrb[4].mxu1 %vm1286_vm3, %v1641_v58 }
 0x769   : > { %6866 = vmatprep.mubr.msk.f32.mxu1 %vm8571_vm2, %v8572_v4 }
 0x833   : > { %v9215_v59 = vpop.f32.mrb[2].mxu1 }
 0x834   : > { %v6840_v60 = vpop.f32.mrb[3].mxu1 }
 0x83b   : > { %v1718_v61 = vpop.f32.mrb[4].mxu1 }
 0x83c   : > { %v1722_v62 = vmul.f32 0.17677669, %v1718_v61  ;;  %v6847_v63 = vpop.f32.mrb[5].mxu1 }
 0x83d   : > { %v6519_v63 = vld [vmem:[#allocation15] ss:$0 sm:$0xff] }
 0x83e   : > { %v1723_v0 = vsel %vm1367_vm5, %v1722_v62, -inf }
 0x83f   : > { %1724 = vmax.xlane.f32.xlu1 %v1723_v0 }
 0x850   : > { %7654 = vrot.lane.b32.xlu1 %v9166_v11, %s9783_s15 }
 0x854   : > { %1820 = vrot.lane.b32.xlu1 %v9175_v13, %s9781_s28 }
 0x8cc   : > { %v1725_v5 = vpop.xlane.xlu1 %1724 }
 0x8cd   : > { %v1726_v6 = vsub.f32 %v1722_v62, %v1725_v5 }
 0x8cf   : > { %v1727_v7 = vmul.f32 1.442695, %v1726_v6  ;;  %v6517_v6 = vld [vmem:[#allocation12] ss:$0 sm:$0xff] }
 0x8d0   : > { %v7655_v8 = vpop.permute.xlu1 %7654 }
 0x8d1   : > { %7746 = vpow2.f32 %v1727_v7  ;;  %v7657_v9 = vunpack.i.h.bf16 %v7655_v8  ;;  %v7656_v12 = vunpack.i.l.bf16 %v7655_v8 }
 0x8d3   : > { %v7206_v14 = vpack.c.bf16 %v7657_v9, %v7656_v12 }
 0x8d4   : > { %v1821_v24 = vpop.permute.xlu1 %1820 }
 0x8d5   : > { %7207 = vmatpush3.bf16.msra.mxu0 %v7206_v14 }
 0x8d6   : > { %7208 = vmatprep.subr.bf16.mxu0 %v8570_v3 }
 0x8db   : > { %v7747_v15 = vpop.eup %7746 }
 0x8dc   : > { %v1729_v16 = vsel %vm1367_vm5, %v7747_v15, 0.0 }
 0x8dd   : > { %1730 = vadd.xlane.f32.xlu0 %v1729_v16  ;;  %v6523_v16 = vld [vmem:[#allocation17] ss:$0 sm:$0xff] }
 0x8f3   : > { %7659 = vrot.lane.b32.xlu0 %v9166_v11, %s9781_s28 }
 0x96a   : > { %v1731_v17 = vpop.xlane.xlu0 %1730 }
 0x96b   : > { %7748 = vrcp.f32 %v1731_v17 }
 0x96e   : > { %v7660_v18 = vpop.permute.xlu0 %7659 }
 0x96f   : > { %v7662_v19 = vunpack.i.h.bf16 %v7660_v18  ;;  %v7661_v20 = vunpack.i.l.bf16 %v7660_v18 }
 0x971   : > { %v7209_v23 = vpack.c.bf16 %v7662_v19, %v7661_v20 }
 0x975   : > { %v7749_v21 = vpop.eup %7748 }
 0x976   : > { %v1733_v22 = vmul.f32 %v7749_v21, %v7747_v15 }
 0x978   : > { %6853 = vmatmul.mubr.msk.f32.vlgmr.msra.gmra.mrb[6].mxu0 %vm1367_vm5, %v1733_v22 }
 0x979   : > { %7211 = vmatpush3.bf16.xpose.msk.msra.mxu0 %vm9162_vm4, %v7209_v23  ;;  %6859 = vmatprep.mubr.msk.f32.mxu0 %vm8571_vm2, %v8572_v4 }
 0x97a   : > { %6880 = vmatprep.subr.msk.mxu0 %vm1207_vm0, %v2088_v51 }
 0x980   : > { %6860 = vmatmul.mubr.msk.f32.vlgmr.msra.gmra.mrb[8].mxu0 %vm1286_vm3, %v1821_v24 }
 0x981   : > { %6882 = vmatprep.mubr.msk.f32.mxu0 %vm1200_vm1, %v9144_v1  ;;  %6881 = vmatpush3.msk.msra.mxu0 %vm1207_vm0, %v2088_v51 }
 0x982   : > { %7221 = vmatprep.subr.bf16.mxu0 %v8570_v3 }
 0x984   : > { %6883 = vmatmul.mubr.msk.f32.vlgmr.msra.gmra.mrb[10].mxu0 %vm1200_vm1, %v9146_v2 }
 0x985   : > { %6893 = vmatprep.mubr.msk.f32.mxu0 %vm8571_vm2, %v8572_v4 }
 0xa4b   : > { %v1809_v25 = vpop.f32.mrb[6].mxu0 }
 0xa4c   : > { %v6854_v26 = vpop.f32.mrb[7].mxu0 }
 0xa53   : > { %v1898_v27 = vpop.f32.mrb[8].mxu0 }
 0xa54   : > { %v1902_v28 = vmul.f32 0.17677669, %v1898_v27  ;;  %v6861_v29 = vpop.f32.mrb[9].mxu0 }
 0xa56   : > { %v1903_v30 = vsel %vm1367_vm5, %v1902_v28, -inf }
 0xa57   : > { %1904 = vmax.xlane.f32.xlu1 %v1903_v30  ;;  %v6884_v62 = vpop.f32.mrb[10].mxu0 }
 0xa58   : > { %v9270_v0 = vadd.f32 %v6884_v62, %v6519_v63 }
 0xa68   : > { %7664 = vrot.lane.b32.xlu1 %v9166_v11, %s9779_s18 }
 0xa6c   : > { %1814 = vrot.lane.b32.xlu1 %v1809_v25, %s9775_s11  ;;  %s9872_s11 = sld [smem:[#allocation55_spill]] }
 0xa72   : > { %v2174_v57 = vld [vmem:[%s9872_s11] sm:$0xff]  ;;  %v2175_v58 = vld [vmem:[%s9872_s11 + $0x8] sm:$0xff]  ;;  %v2176_v2 = vld [vmem:[%s9872_s11 + $0x10] sm:$0xff] }
 0xa73   : > { %v2177_v60 = vld [vmem:[%s9872_s11 + $0x18] sm:$0xff] }
 0xa74   : > { %v7225_v61 = vpack.c.bf16 %v2177_v60, %v2176_v2 }
 0xae4   : > { %v1905_v31 = vpop.xlane.xlu1 %1904 }
 0xae5   : > { %v1906_v32 = vsub.f32 %v1902_v28, %v1905_v31 }
 0xae7   : > { %v1907_v33 = vmul.f32 1.442695, %v1906_v32 }
 0xae8   : > { %v7665_v34 = vpop.permute.xlu1 %7664 }
 0xae9   : > { %7750 = vpow2.f32 %v1907_v33  ;;  %v7667_v1 = vunpack.i.h.bf16 %v7665_v34  ;;  %v7666_v35 = vunpack.i.l.bf16 %v7665_v34 }
 0xaeb   : > { %v7213_v36 = vpack.c.bf16 %v7667_v1, %v7666_v35 }
 0xaec   : > { %v1815_v39 = vpop.permute.xlu1 %1814 }
 0xaed   : > { %7214 = vmatpush3.bf16.msra.mxu1 %v7213_v36  ;;  %v1817_v42 = vadd.f32 %v1815_v39, %v9175_v13 }
 0xaee   : > { %7215 = vmatprep.subr.bf16.mxu1 %v8570_v3 }
 0xaf3   : > { %v7751_v37 = vpop.eup %7750 }
 0xaf4   : > { %v1909_v38 = vsel %vm1367_vm5, %v7751_v37, 0.0 }
 0xaf5   : > { %1910 = vadd.xlane.f32.xlu0 %v1909_v38 }
 0xb0b   : > { %1634 = vrot.lane.b32.xlu0 %v9215_v59, %s9777_s23  ;;  %s9791_s23 = smov 24   ;;  %v7222_v59 = vpack.c.bf16 %v2175_v58, %v2174_v57 }
 0xb0d   : > { %7223 = vmatpush3.bf16.msra.mxu0 %v7222_v59 }
 0xb0e   : > { %7224 = vmatprep.subr.bf16.mxu0 %v8570_v3 }
 0xb0f   : > { %2456 = vrot.lane.b32.xlu0 %v9270_v0, %s9793_s13 }
 0xb11   : > { %7226 = vmatpush3.bf16.msra.mxu0 %v7225_v61 }
 0xb82   : > { %v1911_v11 = vpop.xlane.xlu0 %1910 }
 0xb83   : > { %7752 = vrcp.f32 %v1911_v11 }
 0xb86   : > { %v1635_v40 = vpop.permute.xlu0 %1634 }
 0xb87   : > { %v1637_v41 = vadd.f32 %v1635_v40, %v9175_v13 }
 0xb89   : > { %1639 = vst.msk [vmem:[#allocation2] sm:$0xff] %vm1638_vm6, %v1637_v41 }
 0xb8a   : > { %1819 = vst.msk [vmem:[#allocation2] sm:$0xff] %vm1818_vm7, %v1817_v42  ;;  %v2457_v20 = vpop.permute.xlu0 %2456 }
 0xb8d   : > { %v7753_v43 = vpop.eup %7752 }
 0xb8e   : > { %v1913_v44 = vmul.f32 %v7753_v43, %v7751_v37 }
 0xb90   : > { %6867 = vmatmul.mubr.msk.f32.vlgmr.msra.gmra.mrb[6].mxu1 %vm1367_vm5, %v1913_v44 }
 0xb91   : > { %6877 = vmatprep.mubr.msk.f32.mxu1 %vm8571_vm2, %v8572_v4  ;;  %7217 = vmatpush3.bf16.msra.mxu1 %v7216_v47 }
 0xb92   : > { %7218 = vmatprep.subr.bf16.mxu1 %v8570_v3 }
 0xb95   : > { %7220 = vmatpush3.bf16.msra.mxu1 %v7219_v50 }
 0xc63   : > { %v1989_v52 = vpop.f32.mrb[6].mxu1 }
 0xc64   : > { %1994 = vrot.lane.b32.xlu1 %v1989_v52, %s9791_s23  ;;  %v6868_v53 = vpop.f32.mrb[7].mxu1 }
 0xcd6   : > { %v1995_v54 = vpop.permute.xlu1 %1994 }
 0xcd7   : > { %v1997_v55 = vadd.f32 %v1995_v54, %v9175_v13  ;;  %v2165_v13 = vpop.f32.mrb[11].mxu0 }
 0xcd8   : > { %v9272_v5 = vadd.f32 %v6519_v63, %v2165_v13 }
 0xcd9   : > { %1999 = vst.msk [vmem:[#allocation2] sm:$0xff] %vm1998_vm8, %v1997_v55 }
 0xcda   : > { %2454 = vrot.lane.b32.xlu1 %v9272_v5, %s9793_s13  ;;  %2661 = vrot.lane.b32.xlu0 %v9272_v5, %s9785_s10 }
 0xce0   : > { %v2000_v56 = vld [vmem:[#allocation2] sm:$0xff] }
 0xce1   : > { %6878 = vmatmul.mubr.msk.f32.vlgmr.msra.gmra.mrb[8].mxu1 %vm2012_vm9, %v2000_v56 }
 0xce2   : > { %6898 = vmatprep.mubr.msk.f32.mxu1 %vm1286_vm3, %v9272_v5 }
 0xd4c   : > { %v2455_v15 = vpop.permute.xlu1 %2454  ;;  %v2662_v22 = vpop.permute.xlu0 %2661 }
 0xdb4   : > { %v2082_v7 = vpop.f32.mrb[8].mxu1 }
 0xdb5   : > { %v2083_v8 = vadd.f32 %v6517_v6, %v2082_v7  ;;  %v6879_v9 = vpop.f32.mrb[9].mxu1 }
 0xdb7   : > { %v2086_v12 = vmax.f32 %v2083_v8, 0.0 }
 0xdb9   : > { %v2087_v14 = vadd.f32 %v2086_v12, %v2000_v56 }
 0xdbb   : > { %6894 = vmatmul.mubr.msk.f32.vlgmr.msra.gmra.mrb[12].mxu0 %vm2012_vm9, %v2087_v14 }
 0xdbc   : > { %6908 = vmatprep.mubr.msk.f32.mxu0 %vm1286_vm3, %v2455_v15 }
 0xe8e   : > { %v2254_v17 = vpop.f32.mrb[12].mxu0 }
 0xe8f   : > { %v9284_v18 = vadd.f32 %v6523_v16, %v2254_v17  ;;  %v6895_v19 = vpop.f32.mrb[13].mxu0 }
 0xe91   : > { %2872 = vrot.lane.b32.xlu0 %v9284_v18, %s9781_s28  ;;  %2458 = vrot.lane.b32.xlu1 %v9284_v18, %s9793_s13 }
 0xe92   : > { %6896 = vmatprep.subr.msk.mxu1 %vm1286_vm3, %v9284_v18 }
 0xe93   : > { %6897 = vmatpush3.xpose.msk.msra.mxu1 %vm1286_vm3, %v9284_v18 }
 0xe95   : > { %2870 = vrot.lane.b32.xlu0 %v9270_v0, %s9781_s28  ;;  %2665 = vrot.lane.b32.xlu1 %v9284_v18, %s9785_s10 }
 0xe96   : > { %6899 = vmatmul.mubr.msk.f32.vlgmr.msra.gmra.mrb[10].mxu1 %vm1286_vm3, %v9270_v0 }
 0xe99   : > { %2663 = vrot.lane.b32.xlu1 %v9270_v0, %s9785_s10  ;;  %s9876_s10 = smov 16  }
 0xe9d   : > { %2868 = vrot.lane.b32.xlu1 %v9272_v5, %s9781_s28 }
 0xf03   : > { %v2459_v21 = vpop.permute.xlu1 %2458  ;;  %v2873_v24 = vpop.permute.xlu0 %2872 }
 0xf04   : > { %6906 = vmatprep.subr.msk.mxu0 %vm1286_vm3, %v2459_v21 }
 0xf05   : > { %6907 = vmatpush3.xpose.msk.msra.mxu0 %vm1286_vm3, %v2459_v21 }
 0xf07   : > { %v2666_v23 = vpop.permute.xlu1 %2665  ;;  %v2871_v27 = vpop.permute.xlu0 %2870 }
 0xf08   : > { %6909 = vmatmul.mubr.msk.f32.vlgmr.msra.gmra.mrb[14].mxu0 %vm1286_vm3, %v2457_v20  ;;  %6916 = vmatprep.subr.msk.mxu0 %vm1286_vm3, %v2666_v23 }
 0xf09   : > { %6917 = vmatpush3.xpose.msk.msra.mxu0 %vm1286_vm3, %v2666_v23  ;;  %6918 = vmatprep.mubr.msk.f32.mxu0 %vm1286_vm3, %v2662_v22 }
 0xf0a   : > { %6926 = vmatprep.subr.msk.mxu0 %vm1286_vm3, %v2873_v24 }
 0xf0b   : > { %v2664_v25 = vpop.permute.xlu1 %2663 }
 0xf0c   : > { %6919 = vmatmul.mubr.msk.f32.vlgmr.msra.gmra.mrb[16].mxu0 %vm1286_vm3, %v2664_v25 }
 0xf0d   : > { %6927 = vmatpush3.xpose.msk.msra.mxu0 %vm1286_vm3, %v2873_v24 }
 0xf0f   : > { %v2869_v26 = vpop.permute.xlu1 %2868 }
 0xf10   : > { %6928 = vmatprep.mubr.msk.f32.mxu0 %vm1286_vm3, %v2869_v26 }
 0xf11   : > { %6929 = vmatmul.mubr.msk.f32.vlgmr.msra.gmra.mrb[18].mxu0 %vm1286_vm3, %v2871_v27 }
 0xf69   : > { %v6900_v28 = vpop.f32.mrb[10].mxu1 }
 0xf6a   : > { %v2343_v29 = vmul.f32 0.17677669, %v6900_v28  ;;  %v2333_v30 = vpop.f32.mrb[11].mxu1 }
 0xf6b   : > { %v2342_v31 = vmul.f32 0.17677669, %v2333_v30 }
 0xf6c   : > { %v2347_v32 = vsel %vm1286_vm3, %v2343_v29, -inf }
 0xf6d   : > { %2348 = vmax.xlane.f32.xlu0 %v2347_v32  ;;  %v2344_v33 = vsel %vm1286_vm3, %v2342_v31, -inf }
 0xf6e   : > { %2345 = vmax.xlane.f32.xlu1 %v2344_v33 }
 0xfdb   : > { %v6910_v34 = vpop.f32.mrb[14].mxu0 }
 0xfdc   : > { %v2542_v1 = vmul.f32 0.17677669, %v6910_v34  ;;  %v2532_v35 = vpop.f32.mrb[15].mxu0 }
 0xfdd   : > { %v2541_v36 = vmul.f32 0.17677669, %v2532_v35 }
 0xfde   : > { %v2546_v37 = vsel %vm1286_vm3, %v2542_v1, -inf }
 0xfdf   : > { %v6920_v38 = vpop.f32.mrb[16].mxu0  ;;  %2547 = vmax.xlane.f32.xlu1 %v2546_v37  ;;  %v2543_v11 = vsel %vm1286_vm3, %v2541_v36, -inf }
 0xfe0   : > { %v2749_v39 = vmul.f32 0.17677669, %v6920_v38  ;;  %v2739_v40 = vpop.f32.mrb[17].mxu0  ;;  %2544 = vmax.xlane.f32.xlu0 %v2543_v11 }
 0xfe1   : > { %v2748_v41 = vmul.f32 0.17677669, %v2739_v40 }
 0xfe2   : > { %v2753_v42 = vsel %vm1286_vm3, %v2749_v39, -inf }
 0xfe3   : > { %2754 = vmax.xlane.f32.xlu1 %v2753_v42  ;;  %v2750_v43 = vsel %vm1286_vm3, %v2748_v41, -inf }
 0xfe4   : > { %v6930_v44 = vpop.f32.mrb[18].mxu0  ;;  %2751 = vmax.xlane.f32.xlu0 %v2750_v43 }
 0xfe5   : > { %v2956_v45 = vmul.f32 0.17677669, %v6930_v44  ;;  %v2946_v46 = vpop.f32.mrb[19].mxu0 }
 0xfe6   : > { %v2955_v47 = vmul.f32 0.17677669, %v2946_v46 }
 0xfe7   : > { %v2960_v48 = vsel %vm1286_vm3, %v2956_v45, -inf }
 0xfe8   : > { %2961 = vmax.xlane.f32.xlu1 %v2960_v48  ;;  %v2957_v49 = vsel %vm1286_vm3, %v2955_v47, -inf }
 0xfe9   : > { %2958 = vmax.xlane.f32.xlu0 %v2957_v49 }
 0xff9   : > { %2565 = vrot.lane.b32.xlu1 %v9284_v18, %s9787_s8 }
 0xffa   : > { %v2349_v50 = vpop.xlane.xlu0 %2348 }
 0xffb   : > { %v2346_v51 = vpop.xlane.xlu1 %2345  ;;  %v2351_v52 = vsub.f32 %v2343_v29, %v2349_v50 }
 0xffc   : > { %v2350_v53 = vsub.f32 %v2342_v31, %v2346_v51 }
 0xffd   : > { %v2354_v54 = vmul.f32 1.442695, %v2351_v52 }
 0xffe   : > { %v2352_v55 = vmul.f32 1.442695, %v2350_v53 }
 0xfff   : > { %2366 = vrot.lane.b32.xlu0 %v9284_v18, %s9789_s2  ;;  %7754 = vpow2.f32 %v2354_v54 }
0x1000   : > { %7756 = vpow2.f32 %v2352_v55 }
0x1009   : > { %v7755_v56 = vpop.eup %7754 }
0x100a   : > { %v7757_v57 = vpop.eup %7756  ;;  %v2359_v58 = vsel %vm1286_vm3, %v7755_v56, 0.0 }
0x100b   : > { %v2356_v59 = vsel %vm1286_vm3, %v7757_v57, 0.0 }
0x101d   : > { %2360 = vadd.xlane.f32.xlu1 %v2359_v58 }
0x101e   : > { %2357 = vadd.xlane.f32.xlu0 %v2356_v59 }
0x106c   : > { %v2548_v2 = vpop.xlane.xlu1 %2547 }
0x106d   : > { %v2550_v60 = vsub.f32 %v2542_v1, %v2548_v2  ;;  %v2545_v61 = vpop.xlane.xlu0 %2544 }
0x106e   : > { %v2549_v62 = vsub.f32 %v2541_v36, %v2545_v61 }
0x106f   : > { %v2553_v63 = vmul.f32 1.442695, %v2550_v60 }
0x1070   : > { %v2551_v13 = vmul.f32 1.442695, %v2549_v62  ;;  %v2755_v6 = vpop.xlane.xlu1 %2754 }
0x1071   : > { %7758 = vpow2.f32 %v2553_v63  ;;  %v2757_v7 = vsub.f32 %v2749_v39, %v2755_v6  ;;  %v2752_v8 = vpop.xlane.xlu0 %2751 }
0x1072   : > { %7760 = vpow2.f32 %v2551_v13  ;;  %v2756_v9 = vsub.f32 %v2748_v41, %v2752_v8 }
0x1073   : > { %v2760_v12 = vmul.f32 1.442695, %v2757_v7 }
0x1074   : > { %v2758_v14 = vmul.f32 1.442695, %v2756_v9 }
0x1075   : > { %7762 = vpow2.f32 %v2760_v12  ;;  %v2962_v15 = vpop.xlane.xlu1 %2961 }
0x1076   : > { %7764 = vpow2.f32 %v2758_v14  ;;  %v2964_v16 = vsub.f32 %v2956_v45, %v2962_v15  ;;  %v2959_v17 = vpop.xlane.xlu0 %2958 }
0x1077   : > { %v2963_v19 = vsub.f32 %v2955_v47, %v2959_v17 }
0x1078   : > { %v2967_v20 = vmul.f32 1.442695, %v2964_v16 }
0x1079   : > { %v2965_v21 = vmul.f32 1.442695, %v2963_v19  ;;  %v2566_v25 = vpop.permute.xlu1 %2565 }
0x107a   : > { %7766 = vpow2.f32 %v2967_v20  ;;  %v2367_v22 = vpop.permute.xlu0 %2366 }
0x107b   : > { %v7759_v23 = vpop.eup %7758  ;;  %7768 = vpow2.f32 %v2965_v21  ;;  %6901 = vmatprep.subr.mxu1 %v2367_v22 }
0x107c   : > { %v7761_v24 = vpop.eup %7760  ;;  %6902 = vmatpush3.msra.mxu1 %v2367_v22  ;;  %v2558_v26 = vsel %vm1286_vm3, %v7759_v23, 0.0 }
0x107d   : > { %2559 = vadd.xlane.f32.xlu1 %v2558_v26  ;;  %6911 = vmatprep.subr.mxu1 %v2566_v25  ;;  %v2555_v27 = vsel %vm1286_vm3, %v7761_v24, 0.0 }
0x107e   : > { %2556 = vadd.xlane.f32.xlu0 %v2555_v27 }
0x107f   : > { %v7763_v28 = vpop.eup %7762 }
0x1080   : > { %v7765_v29 = vpop.eup %7764  ;;  %v2765_v30 = vsel %vm1286_vm3, %v7763_v28, 0.0 }
0x1081   : > { %2766 = vadd.xlane.f32.xlu1 %v2765_v30  ;;  %v2762_v31 = vsel %vm1286_vm3, %v7765_v29, 0.0 }
0x1082   : > { %2763 = vadd.xlane.f32.xlu0 %v2762_v31 }
0x1084   : > { %v7767_v32 = vpop.eup %7766 }
0x1085   : > { %v7769_v33 = vpop.eup %7768  ;;  %v2972_v34 = vsel %vm1286_vm3, %v7767_v32, 0.0 }
0x1086   : > { %2973 = vadd.xlane.f32.xlu1 %v2972_v34  ;;  %v2969_v1 = vsel %vm1286_vm3, %v7769_v33, 0.0 }
0x1087   : > { %2970 = vadd.xlane.f32.xlu0 %v2969_v1 }
0x1097   : > { %2772 = vrot.lane.b32.xlu1 %v9284_v18, %s9783_s15  ;;  %s9875_s15 = smov 8  }
0x109d   : > { %2979 = vrot.lane.b32.xlu0 %v9284_v18, %s9779_s18  ;;  %s9873_s18 = sld [smem:[#allocation56_spill]] }
0x10a3   : > { %s9874_s28 = smov %s9873_s18  ;;  %v3077_v62 = vld [vmem:[%s9873_s18] sm:$0xff]  ;;  %s9877_s18 = sld [smem:[#allocation58_spill]] }
0x10a4   : > { %v3078_v63 = vld [vmem:[%s9874_s28 + $0x8] sm:$0xff]  ;;  %v3079_v7 = vld [vmem:[%s9874_s28 + $0x10] sm:$0xff]  ;;  %v3080_v8 = vld [vmem:[%s9874_s28 + $0x18] sm:$0xff] }
0x10a5   : > { %v7227_v6 = vpack.c.bf16 %v3078_v63, %v3077_v62  ;;  %v7231_v12 = vpack.c.bf16 %v3080_v8, %v3079_v7 }
0x10a7   : > { %7228 = vmatprep.subr.bf16.mxu0 %v7227_v6 }
0x10a8   : > { %7230 = vmatpush3.bf16.msra.mxu0 %v7227_v6 }
0x10a9   : > { %7232 = vmatprep.subr.bf16.mxu0 %v7231_v12  ;;  %s9878_s8 = smov %s9877_s18 }
0x10aa   : > { %v2361_v35 = vpop.xlane.xlu1 %2360  ;;  %v3175_v34 = vld [vmem:[%s9878_s8 + $0x8] sm:$0xff]  ;;  %v3176_v1 = vld [vmem:[%s9878_s8 + $0x10] sm:$0xff] }
0x10ab   : > { %7770 = vrcp.f32 %v2361_v35  ;;  %v2358_v36 = vpop.xlane.xlu0 %2357 }
0x10ac   : > { %7772 = vrcp.f32 %v2358_v36  ;;  %7234 = vmatpush3.bf16.msra.mxu0 %v7231_v12  ;;  %v6545_v36 = vld [vmem:[#allocation18] ss:$0 sm:$0xff] }
0x10ad   : > { %7243 = vmatprep.subr.bf16.mxu0 %v8570_v3 }
0x10b5   : > { %v7771_v37 = vpop.eup %7770 }
0x10b6   : > { %v7773_v38 = vpop.eup %7772  ;;  %v2365_v39 = vmul.f32 %v7771_v37, %v7755_v56 }
0x10b7   : > { %v2364_v11 = vmul.f32 %v7773_v38, %v7757_v57 }
0x10b9   : > { %6903 = vmatprep.mubr.msk.f32.mxu1 %vm1286_vm3, %v2364_v11 }
0x10ba   : > { %6904 = vmatmul.mubr.msk.f32.vlgmr.msra.gmra.mrb[12].mxu1 %vm1286_vm3, %v2365_v39 }
0x10bb   : > { %6912 = vmatpush3.msra.mxu1 %v2566_v25 }
0x110a   : > { %v2560_v40 = vpop.xlane.xlu1 %2559 }
0x110b   : > { %7774 = vrcp.f32 %v2560_v40  ;;  %v2557_v41 = vpop.xlane.xlu0 %2556 }
0x110c   : > { %7776 = vrcp.f32 %v2557_v41 }
0x110e   : > { %v2767_v42 = vpop.xlane.xlu1 %2766 }
0x110f   : > { %7778 = vrcp.f32 %v2767_v42  ;;  %v2764_v18 = vpop.xlane.xlu0 %2763 }
0x1110   : > { %7780 = vrcp.f32 %v2764_v18 }
0x1113   : > { %v2974_v43 = vpop.xlane.xlu1 %2973 }
0x1114   : > { %7782 = vrcp.f32 %v2974_v43  ;;  %v2971_v44 = vpop.xlane.xlu0 %2970  ;;  %v6548_v43 = vld [vmem:[#allocation20] ss:$0 sm:$0xff] }
0x1115   : > { %v7775_v45 = vpop.eup %7774  ;;  %7784 = vrcp.f32 %v2971_v44 }
0x1116   : > { %v7777_v46 = vpop.eup %7776  ;;  %v2564_v49 = vmul.f32 %v7775_v45, %v7759_v23 }
0x1117   : > { %v2773_v47 = vpop.permute.xlu1 %2772  ;;  %v2563_v48 = vmul.f32 %v7777_v46, %v7761_v24 }
0x1118   : > { %6921 = vmatprep.subr.mxu1 %v2773_v47  ;;  %v2980_v52 = vpop.permute.xlu0 %2979 }
0x1119   : > { %v7779_v50 = vpop.eup %7778  ;;  %6913 = vmatprep.mubr.msk.f32.mxu1 %vm1286_vm3, %v2563_v48 }
0x111a   : > { %v7781_v51 = vpop.eup %7780  ;;  %6914 = vmatmul.mubr.msk.f32.vlgmr.msra.gmra.mrb[14].mxu1 %vm1286_vm3, %v2564_v49  ;;  %v2771_v54 = vmul.f32 %v7779_v50, %v7763_v28  ;;  %v9398_v50 = vld [vmem:[#allocation6] sm:$0xff] }
0x111b   : > { %6922 = vmatpush3.msra.mxu1 %v2773_v47  ;;  %v2770_v53 = vmul.f32 %v7781_v51, %v7765_v29 }
0x111c   : > { %6931 = vmatprep.subr.mxu1 %v2980_v52 }
0x111d   : > { %6923 = vmatprep.mubr.msk.f32.mxu1 %vm1286_vm3, %v2770_v53 }
0x111e   : > { %v7783_v55 = vpop.eup %7782  ;;  %6924 = vmatmul.mubr.msk.f32.vlgmr.msra.gmra.mrb[16].mxu1 %vm1286_vm3, %v2771_v54 }
0x111f   : > { %v7785_v56 = vpop.eup %7784  ;;  %6932 = vmatpush3.msra.mxu1 %v2980_v52  ;;  %v2978_v58 = vmul.f32 %v7783_v55, %v7767_v32 }
0x1120   : > { %v2977_v57 = vmul.f32 %v7785_v56, %v7769_v33  ;;  %v3174_v33 = vld [vmem:[%s9877_s18] sm:$0xff]  ;;  %s9879_s18 = smov 88  }
0x1122   : > { %6933 = vmatprep.mubr.msk.f32.mxu1 %vm1286_vm3, %v2977_v57 }
0x1123   : > { %6934 = vmatmul.mubr.msk.f32.vlgmr.msra.gmra.mrb[18].mxu1 %vm1286_vm3, %v2978_v58 }
0x118d   : > { %v6905_v59 = vpop.f32.mrb[12].mxu1 }
0x118e   : > { %v2451_v2 = vadd.f32 %v6905_v59, %v9270_v0  ;;  %v2441_v60 = vpop.f32.mrb[13].mxu1 }
0x118f   : > { %v2450_v61 = vadd.f32 %v2441_v60, %v9272_v5 }
0x1190   : > { %2453 = vst.msk [vmem:[#allocation2 + $0x8] sm:$0xff] %vm1286_vm3, %v2451_v2 }
0x1191   : > { %2452 = vst.msk [vmem:[#allocation2] sm:$0xff] %vm1286_vm3, %v2450_v61 }
0x11ed   : > { %v6915_v13 = vpop.f32.mrb[14].mxu1 }
0x11ee   : > { %2653 = vrot.lane.b32.xlu0 %v6915_v13, %s9875_s15  ;;  %v2640_v9 = vpop.f32.mrb[15].mxu1 }
0x11ef   : > { %2651 = vrot.lane.b32.xlu1 %v2640_v9, %s9875_s15 }
0x11f1   : > { %v6925_v14 = vpop.f32.mrb[16].mxu1 }
0x11f2   : > { %2860 = vrot.lane.b32.xlu0 %v6925_v14, %s9876_s10  ;;  %v2847_v15 = vpop.f32.mrb[17].mxu1 }
0x11f3   : > { %2858 = vrot.lane.b32.xlu1 %v2847_v15, %s9876_s10 }
0x11f6   : > { %v6935_v16 = vpop.f32.mrb[18].mxu1 }
0x11f7   : > { %3067 = vrot.lane.b32.xlu0 %v6935_v16, %s9791_s23  ;;  %v3054_v17 = vpop.f32.mrb[19].mxu1 }
0x11f8   : > { %3065 = vrot.lane.b32.xlu1 %v3054_v17, %s9791_s23  ;;  %s9881_s23 = smov 104  }
0x1260   : > { %v2654_v19 = vpop.permute.xlu0 %2653 }
0x1261   : > { %v2658_v20 = vadd.f32 %v2654_v19, %v9270_v0  ;;  %v2652_v21 = vpop.permute.xlu1 %2651 }
0x1262   : > { %v2657_v22 = vadd.f32 %v2652_v21, %v9272_v5 }
0x1263   : > { %2660 = vst.msk [vmem:[#allocation2 + $0x8] sm:$0xff] %vm1638_vm6, %v2658_v20 }
0x1264   : > { %2659 = vst.msk [vmem:[#allocation2] sm:$0xff] %vm1638_vm6, %v2657_v22  ;;  %v2861_v23 = vpop.permute.xlu0 %2860 }
0x1265   : > { %v2865_v24 = vadd.f32 %v2861_v23, %v9270_v0  ;;  %v2859_v25 = vpop.permute.xlu1 %2858 }
0x1266   : > { %v2864_v26 = vadd.f32 %v2859_v25, %v9272_v5 }
0x1267   : > { %2867 = vst.msk [vmem:[#allocation2 + $0x8] sm:$0xff] %vm1818_vm7, %v2865_v24 }
0x1268   : > { %2866 = vst.msk [vmem:[#allocation2] sm:$0xff] %vm1818_vm7, %v2864_v26 }
0x1269   : > { %v3068_v27 = vpop.permute.xlu0 %3067 }
0x126a   : > { %v3072_v28 = vadd.f32 %v3068_v27, %v9270_v0  ;;  %v3066_v29 = vpop.permute.xlu1 %3065  ;;  %v7235_v0 = vpack.c.bf16 %v3175_v34, %v3174_v33 }
0x126b   : > { %v3071_v30 = vadd.f32 %v3066_v29, %v9272_v5  ;;  %v3177_v5 = vld [vmem:[%s9878_s8 + $0x18] sm:$0xff]  ;;  %s9886_s8 = smov 96  }
0x126c   : > { %3074 = vst.msk [vmem:[#allocation2 + $0x8] sm:$0xff] %vm1998_vm8, %v3072_v28  ;;  %7236 = vmatprep.subr.bf16.mxu1 %v7235_v0  ;;  %v7239_v35 = vpack.c.bf16 %v3177_v5, %v3176_v1 }
0x126d   : > { %3073 = vst.msk [vmem:[#allocation2] sm:$0xff] %vm1998_vm8, %v3071_v30  ;;  %7238 = vmatpush3.bf16.msra.mxu1 %v7235_v0 }
0x126e   : > { %7240 = vmatprep.subr.bf16.mxu1 %v7239_v35 }
0x1271   : > { %7242 = vmatpush3.bf16.msra.mxu1 %v7239_v35 }
0x1272   : > { %7247 = vmatprep.subr.bf16.mxu1 %v8570_v3 }
0x1273   : > { %v3076_v32 = vld [vmem:[#allocation2 + $0x8] sm:$0xff] }
0x1274   : > { %v3075_v31 = vld [vmem:[#allocation2] sm:$0xff] }
0x1275   : > { %6944 = vmatprep.mubr.msk.f32.mxu0 %vm2012_vm9, %v3075_v31 }
0x1276   : > { %6945 = vmatmul.mubr.msk.f32.vlgmr.msra.gmra.mrb[20].mxu0 %vm2012_vm9, %v3076_v32 }
0x1277   : > { %6962 = vmatprep.mubr.msk.f32.mxu0 %vm8571_vm2, %v8572_v4 }
0x1349   : > { %v6946_v37 = vpop.f32.mrb[20].mxu0 }
0x134a   : > { %v3166_v38 = vadd.f32 %v6946_v37, %v6545_v36  ;;  %v3160_v11 = vpop.f32.mrb[21].mxu0 }
0x134b   : > { %v3161_v39 = vadd.f32 %v6545_v36, %v3160_v11 }
0x134c   : > { %v3170_v40 = vmax.f32 %v3166_v38, 0.0 }
0x134d   : > { %v3169_v41 = vmax.f32 %v3161_v39, 0.0 }
0x134e   : > { %v9385_v18 = vadd.f32 %v3170_v40, %v3076_v32 }
0x134f   : > { %v9383_v42 = vadd.f32 %v3169_v41, %v3075_v31 }
0x1351   : > { %6955 = vmatprep.mubr.msk.f32.mxu1 %vm2012_vm9, %v9383_v42 }
0x1352   : > { %6956 = vmatmul.mubr.msk.f32.vlgmr.msra.gmra.mrb[20].mxu1 %vm2012_vm9, %v9385_v18 }
0x1353   : > { %6969 = vmatprep.mubr.msk.f32.mxu1 %vm8571_vm2, %v8572_v4 }
0x1425   : > { %v6957_v44 = vpop.f32.mrb[20].mxu1 }
0x1426   : > { %v3263_v45 = vadd.f32 %v6957_v44, %v6548_v43  ;;  %v3257_v46 = vpop.f32.mrb[21].mxu1 }
0x1427   : > { %v3258_v47 = vadd.f32 %v6548_v43, %v3257_v46 }
0x1429   : > { %v7244_v48 = vpack.c.bf16 %v3263_v45, %v3258_v47  ;;  %v9393_v49 = vpack.i.bf16 %v3263_v45, %v3258_v47 }
0x142b   : > { %7246 = vmatpush3.bf16.xpose.msk.msra.mxu0 %vm9162_vm4, %v7244_v48 }
0x142c   : > { %7254 = vmatprep.subr.bf16.mxu0 %v8570_v3 }
0x1432   : > { %6963 = vmatmul.mubr.msk.f32.vlgmr.msra.gmra.mrb[22].mxu0 %vm1286_vm3, %v9398_v50 }
0x1433   : > { %6983 = vmatprep.mubr.msk.f32.mxu0 %vm8571_vm2, %v8572_v4 }
0x1505   : > { %v3341_v51 = vpop.f32.mrb[22].mxu0 }
0x1506   : > { %v3345_v52 = vmul.f32 0.17677669, %v3341_v51  ;;  %v6964_v53 = vpop.f32.mrb[23].mxu0 }
0x1508   : > { %v3346_v54 = vsel %vm1367_vm5, %v3345_v52, -inf }
0x1509   : > { %3347 = vmax.xlane.f32.xlu1 %v3346_v54 }
0x151a   : > { %7674 = vrot.lane.b32.xlu1 %v9393_v49, %s9793_s13 }
0x151e   : > { %3438 = vrot.lane.b32.xlu1 %v9398_v50, %s9793_s13  ;;  %s9882_s13 = smov 80  }
0x1596   : > { %v3348_v55 = vpop.xlane.xlu1 %3347 }
0x1597   : > { %v3349_v56 = vsub.f32 %v3345_v52, %v3348_v55 }
0x1599   : > { %v3350_v57 = vmul.f32 1.442695, %v3349_v56 }
0x159a   : > { %v7675_v13 = vpop.permute.xlu1 %7674 }
0x159b   : > { %7786 = vpow2.f32 %v3350_v57  ;;  %v7677_v7 = vunpack.i.h.bf16 %v7675_v13  ;;  %v7676_v8 = vunpack.i.l.bf16 %v7675_v13  ;;  %v4065_v13 = vld [vmem:[#allocation24 + $0x18] sm:$0xff] }
0x159d   : > { %v7251_v12 = vpack.c.bf16 %v7677_v7, %v7676_v8 }
0x159e   : > { %v3439_v14 = vpop.permute.xlu1 %3438 }
0x15a5   : > { %v7787_v58 = vpop.eup %7786 }
0x15a6   : > { %v3352_v59 = vsel %vm1367_vm5, %v7787_v58, 0.0 }
0x15a7   : > { %3353 = vadd.xlane.f32.xlu0 %v3352_v59 }
0x15bd   : > { %7669 = vrot.lane.b32.xlu0 %v9393_v49, %s9789_s2  ;;  %s9880_s2 = smov 112  }
0x1634   : > { %v3354_v2 = vpop.xlane.xlu0 %3353 }
0x1635   : > { %7788 = vrcp.f32 %v3354_v2  ;;  %v4062_v2 = vld [vmem:[#allocation24] sm:$0xff] }
0x1638   : > { %v7670_v60 = vpop.permute.xlu0 %7669 }
0x1639   : > { %v7672_v61 = vunpack.i.h.bf16 %v7670_v60  ;;  %v7671_v62 = vunpack.i.l.bf16 %v7670_v60  ;;  %v4063_v60 = vld [vmem:[#allocation24 + $0x8] sm:$0xff] }
0x163b   : > { %v7248_v63 = vpack.c.bf16 %v7672_v61, %v7671_v62  ;;  %v7277_v61 = vpack.c.bf16 %v4063_v60, %v4062_v2 }
0x163d   : > { %7249 = vmatpush3.bf16.msra.mxu1 %v7248_v63  ;;  %v4064_v63 = vld [vmem:[#allocation24 + $0x10] sm:$0xff] }
0x163e   : > { %7250 = vmatprep.subr.bf16.mxu1 %v8570_v3  ;;  %v7281_v7 = vpack.c.bf16 %v4065_v13, %v4064_v63 }
0x163f   : > { %v7789_v6 = vpop.eup %7788 }
0x1640   : > { %v3356_v9 = vmul.f32 %v7789_v6, %v7787_v58 }
0x1642   : > { %6970 = vmatmul.mubr.msk.f32.vlgmr.msra.gmra.mrb[22].mxu1 %vm1367_vm5, %v3356_v9 }
0x1643   : > { %6976 = vmatprep.mubr.msk.f32.mxu1 %vm8571_vm2, %v8572_v4 }
0x1646   : > { %7253 = vmatpush3.bf16.xpose.msk.msra.mxu1 %vm9162_vm4, %v7251_v12 }
0x1647   : > { %7261 = vmatprep.subr.bf16.mxu1 %v8570_v3 }
0x164d   : > { %6977 = vmatmul.mubr.msk.f32.vlgmr.msra.gmra.mrb[24].mxu1 %vm1286_vm3, %v3439_v14 }
0x164e   : > { %6997 = vmatprep.mubr.msk.f32.mxu1 %vm8571_vm2, %v8572_v4 }
0x1715   : > { %v3432_v15 = vpop.f32.mrb[22].mxu1 }
0x1716   : > { %v3436_v16 = vadd.f32 %v3432_v15, %v9398_v50  ;;  %v6971_v17 = vpop.f32.mrb[23].mxu1 }
0x1717   : > { %v6569_v17 = vld [vmem:[#allocation26] ss:$0 sm:$0xff] }
0x1718   : > { %3437 = vst.msk [vmem:[#allocation2] sm:$0xff] %vm1286_vm3, %v3436_v16 }
0x1720   : > { %v3516_v19 = vpop.f32.mrb[24].mxu1 }
0x1721   : > { %v3520_v20 = vmul.f32 0.17677669, %v3516_v19  ;;  %v6978_v21 = vpop.f32.mrb[25].mxu1 }
0x1723   : > { %v3521_v22 = vsel %vm1367_vm5, %v3520_v20, -inf }
0x1724   : > { %3522 = vmax.xlane.f32.xlu0 %v3521_v22 }
0x173a   : > { %7679 = vrot.lane.b32.xlu0 %v9393_v49, %s9879_s18 }
0x173e   : > { %3617 = vrot.lane.b32.xlu0 %v9398_v50, %s9880_s2 }
0x17b1   : > { %v3523_v23 = vpop.xlane.xlu0 %3522 }
0x17b2   : > { %v3524_v24 = vsub.f32 %v3520_v20, %v3523_v23 }
0x17b4   : > { %v3525_v25 = vmul.f32 1.442695, %v3524_v24 }
0x17b5   : > { %v7680_v26 = vpop.permute.xlu0 %7679 }
0x17b6   : > { %7790 = vpow2.f32 %v3525_v25  ;;  %v7682_v27 = vunpack.i.h.bf16 %v7680_v26  ;;  %v7681_v28 = vunpack.i.l.bf16 %v7680_v26 }
0x17b8   : > { %v7255_v29 = vpack.c.bf16 %v7682_v27, %v7681_v28 }
0x17b9   : > { %v3618_v36 = vpop.permute.xlu0 %3617 }
0x17ba   : > { %7256 = vmatpush3.bf16.msra.mxu0 %v7255_v29 }
0x17bb   : > { %7257 = vmatprep.subr.bf16.mxu0 %v8570_v3 }
0x17c0   : > { %v7791_v30 = vpop.eup %7790 }
0x17c1   : > { %v3527_v31 = vsel %vm1367_vm5, %v7791_v30, 0.0 }
0x17c2   : > { %3528 = vadd.xlane.f32.xlu1 %v3527_v31 }
0x17d3   : > { %7684 = vrot.lane.b32.xlu1 %v9393_v49, %s9880_s2 }
0x184f   : > { %v3529_v32 = vpop.xlane.xlu1 %3528 }
0x1850   : > { %7792 = vrcp.f32 %v3529_v32 }
0x1853   : > { %v7685_v33 = vpop.permute.xlu1 %7684 }
0x1854   : > { %v7687_v34 = vunpack.i.h.bf16 %v7685_v33  ;;  %v7686_v0 = vunpack.i.l.bf16 %v7685_v33 }
0x1856   : > { %v7258_v35 = vpack.c.bf16 %v7687_v34, %v7686_v0 }
0x185a   : > { %v7793_v1 = vpop.eup %7792 }
0x185b   : > { %v3531_v5 = vmul.f32 %v7793_v1, %v7791_v30  ;;  %v3976_v1 = vld [vmem:[#allocation21] sm:$0xff] }
0x185d   : > { %6984 = vmatmul.mubr.msk.f32.vlgmr.msra.gmra.mrb[24].mxu0 %vm1367_vm5, %v3531_v5  ;;  %v3977_v5 = vld [vmem:[#allocation21 + $0x8] sm:$0xff] }
0x185e   : > { %7260 = vmatpush3.bf16.xpose.msk.msra.mxu0 %vm9162_vm4, %v7258_v35  ;;  %6990 = vmatprep.mubr.msk.f32.mxu0 %vm8571_vm2, %v8572_v4  ;;  %v7272_v35 = vpack.c.bf16 %v3977_v5, %v3976_v1 }
0x185f   : > { %7268 = vmatprep.subr.bf16.mxu0 %v8570_v3 }
0x1865   : > { %6991 = vmatmul.mubr.msk.f32.vlgmr.msra.gmra.mrb[26].mxu0 %vm1286_vm3, %v3618_v36  ;;  %v3978_v36 = vld [vmem:[#allocation21 + $0x10] sm:$0xff] }
0x1866   : > { %7011 = vmatprep.mubr.msk.f32.mxu0 %vm8571_vm2, %v8572_v4 }
0x1930   : > { %v9442_v37 = vpop.f32.mrb[24].mxu0 }
0x1931   : > { %v6985_v38 = vpop.f32.mrb[25].mxu0 }
0x1938   : > { %v3695_v11 = vpop.f32.mrb[26].mxu0 }
0x1939   : > { %v3699_v39 = vmul.f32 0.17677669, %v3695_v11  ;;  %v6992_v40 = vpop.f32.mrb[27].mxu0 }
0x193b   : > { %v3700_v41 = vsel %vm1367_vm5, %v3699_v39, -inf }
0x193c   : > { %3701 = vmax.xlane.f32.xlu1 %v3700_v41 }
0x194d   : > { %7694 = vrot.lane.b32.xlu1 %v9393_v49, %s9881_s23 }
0x1951   : > { %3796 = vrot.lane.b32.xlu1 %v9398_v50, %s9881_s23 }
0x19c9   : > { %v3702_v43 = vpop.xlane.xlu1 %3701 }
0x19ca   : > { %v3703_v44 = vsub.f32 %v3699_v39, %v3702_v43 }
0x19cc   : > { %v3704_v45 = vmul.f32 1.442695, %v3703_v44  ;;  %v4148_v44 = vld [vmem:[#allocation27] sm:$0xff] }
0x19cd   : > { %v7695_v55 = vpop.permute.xlu1 %7694 }
0x19ce   : > { %7794 = vpow2.f32 %v3704_v45  ;;  %v7697_v57 = vunpack.i.h.bf16 %v7695_v55  ;;  %v7696_v58 = vunpack.i.l.bf16 %v7695_v55  ;;  %v4149_v45 = vld [vmem:[#allocation27 + $0x8] sm:$0xff] }
0x19d0   : > { %v7265_v62 = vpack.c.bf16 %v7697_v57, %v7696_v58  ;;  %v6572_v58 = vld [vmem:[#allocation29] ss:$0 sm:$0xff] }
0x19d1   : > { %v3797_v6 = vpop.permute.xlu1 %3796 }
0x19d8   : > { %v7795_v46 = vpop.eup %7794 }
0x19d9   : > { %v3706_v47 = vsel %vm1367_vm5, %v7795_v46, 0.0 }
0x19da   : > { %3707 = vadd.xlane.f32.xlu0 %v3706_v47  ;;  %v4150_v47 = vld [vmem:[#allocation27 + $0x10] sm:$0xff] }
0x19f0   : > { %7689 = vrot.lane.b32.xlu0 %v9393_v49, %s9882_s13 }
0x1a67   : > { %v3708_v48 = vpop.xlane.xlu0 %3707 }
0x1a68   : > { %7796 = vrcp.f32 %v3708_v48  ;;  %v4151_v48 = vld [vmem:[#allocation27 + $0x18] sm:$0xff] }
0x1a6b   : > { %v7690_v51 = vpop.permute.xlu0 %7689 }
0x1a6c   : > { %v7692_v52 = vunpack.i.h.bf16 %v7690_v51  ;;  %v7691_v53 = vunpack.i.l.bf16 %v7690_v51  ;;  %v7289_v51 = vpack.c.bf16 %v4151_v48, %v4150_v47 }
0x1a6e   : > { %v7262_v54 = vpack.c.bf16 %v7692_v52, %v7691_v53  ;;  %v6567_v52 = vld [vmem:[#allocation23] ss:$0 sm:$0xff] }
0x1a70   : > { %7263 = vmatpush3.bf16.msra.mxu1 %v7262_v54 }
0x1a71   : > { %7264 = vmatprep.subr.bf16.mxu1 %v8570_v3 }
0x1a72   : > { %v7797_v56 = vpop.eup %7796 }
0x1a73   : > { %v3710_v59 = vmul.f32 %v7797_v56, %v7795_v46  ;;  %v7286_v46 = vpack.c.bf16 %v4149_v45, %v4148_v44 }
0x1a75   : > { %6998 = vmatmul.mubr.msk.f32.vlgmr.msra.gmra.mrb[26].mxu1 %vm1367_vm5, %v3710_v59 }
0x1a76   : > { %7004 = vmatprep.mubr.msk.f32.mxu1 %vm8571_vm2, %v8572_v4 }
0x1a79   : > { %7267 = vmatpush3.bf16.xpose.msk.msra.mxu1 %vm9162_vm4, %v7265_v62 }
0x1a7a   : > { %7278 = vmatprep.subr.bf16.mxu1 %v7277_v61 }
0x1a80   : > { %7005 = vmatmul.mubr.msk.f32.vlgmr.msra.gmra.mrb[28].mxu1 %vm1286_vm3, %v3797_v6 }
0x1a81   : > { %7280 = vmatpush3.bf16.msra.mxu1 %v7277_v61  ;;  %7033 = vmatprep.mubr.msk.f32.mxu1 %vm2012_vm9, %v9383_v42 }
0x1a82   : > { %7282 = vmatprep.subr.bf16.mxu1 %v7281_v7 }
0x1a85   : > { %7284 = vmatpush3.bf16.msra.mxu1 %v7281_v7 }
0x1a88   : > { %7034 = vmatmul.mubr.msk.f32.vlgmr.msra.gmra.mrb[30].mxu1 %vm2012_vm9, %v9385_v18 }
0x1b48   : > { %v3786_v8 = vpop.f32.mrb[26].mxu1 }
0x1b49   : > { %v6999_v9 = vpop.f32.mrb[27].mxu1 }
0x1b53   : > { %v3874_v12 = vpop.f32.mrb[28].mxu1 }
0x1b54   : > { %v3878_v14 = vmul.f32 0.17677669, %v3874_v12  ;;  %v7006_v15 = vpop.f32.mrb[29].mxu1 }
0x1b56   : > { %v3879_v16 = vsel %vm1367_vm5, %v3878_v14, -inf }
0x1b57   : > { %3880 = vmax.xlane.f32.xlu0 %v3879_v16 }
0x1b5b   : > { %v7035_v19 = vpop.f32.mrb[30].mxu1 }
0x1b5c   : > { %v4139_v20 = vpop.f32.mrb[31].mxu1  ;;  %v9471_v42 = vadd.f32 %v7035_v19, %v6569_v17 }
0x1b5d   : > { %v9464_v21 = vadd.f32 %v6569_v17, %v4139_v20 }
0x1b5f   : > { %7049 = vmatprep.mubr.msk.f32.mxu1 %vm1286_vm3, %v9464_v21 }
0x1b6d   : > { %7699 = vrot.lane.b32.xlu0 %v9393_v49, %s9883_s1 }
0x1b71   : > { %3791 = vrot.lane.b32.xlu0 %v3786_v8, %s9876_s10 }
0x1b75   : > { %4430 = vrot.lane.b32.xlu0 %v9471_v42, %s9884_s3 }
0x1be4   : > { %v3881_v18 = vpop.xlane.xlu0 %3880 }
0x1be5   : > { %v3882_v22 = vsub.f32 %v3878_v14, %v3881_v18 }
0x1be7   : > { %v3883_v23 = vmul.f32 1.442695, %v3882_v22 }
0x1be8   : > { %v7700_v24 = vpop.permute.xlu0 %7699 }
0x1be9   : > { %7798 = vpow2.f32 %v3883_v23  ;;  %v7702_v25 = vunpack.i.h.bf16 %v7700_v24  ;;  %v7701_v26 = vunpack.i.l.bf16 %v7700_v24 }
0x1beb   : > { %v7269_v27 = vpack.c.bf16 %v7702_v25, %v7701_v26 }
0x1bec   : > { %v3792_v30 = vpop.permute.xlu0 %3791 }
0x1bed   : > { %7270 = vmatpush3.bf16.msra.mxu0 %v7269_v27  ;;  %v3794_v33 = vadd.f32 %v3792_v30, %v9398_v50 }
0x1bee   : > { %7271 = vmatprep.subr.bf16.mxu0 %v8570_v3 }
0x1bf0   : > { %v4431_v61 = vpop.permute.xlu0 %4430 }
0x1bf3   : > { %v7799_v28 = vpop.eup %7798 }
0x1bf4   : > { %v3885_v49 = vsel %vm1367_vm5, %v7799_v28, 0.0 }
0x1bf5   : > { %3886 = vadd.xlane.f32.xlu1 %v3885_v49 }
0x1c06   : > { %3612 = vrot.lane.b32.xlu1 %v9442_v37, %s9875_s15  ;;  %v3979_v37 = vld [vmem:[#allocation21 + $0x18] sm:$0xff] }
0x1c07   : > { %v7275_v38 = vpack.c.bf16 %v3979_v37, %v3978_v36 }
0x1c82   : > { %v3887_v29 = vpop.xlane.xlu1 %3886 }
0x1c83   : > { %7800 = vrcp.f32 %v3887_v29 }
0x1c86   : > { %v3613_v31 = vpop.permute.xlu1 %3612 }
0x1c87   : > { %v3615_v32 = vadd.f32 %v3613_v31, %v9398_v50 }
0x1c89   : > { %3616 = vst.msk [vmem:[#allocation2] sm:$0xff] %vm1638_vm6, %v3615_v32 }
0x1c8a   : > { %3795 = vst.msk [vmem:[#allocation2] sm:$0xff] %vm1818_vm7, %v3794_v33 }
0x1c8d   : > { %v7801_v34 = vpop.eup %7800 }
0x1c8e   : > { %v3889_v0 = vmul.f32 %v7801_v34, %v7799_v28 }
0x1c90   : > { %7012 = vmatmul.mubr.msk.f32.vlgmr.msra.gmra.mrb[28].mxu0 %vm1367_vm5, %v3889_v0 }
0x1c91   : > { %7022 = vmatprep.mubr.msk.f32.mxu0 %vm8571_vm2, %v8572_v4  ;;  %7273 = vmatpush3.bf16.msra.mxu0 %v7272_v35 }
0x1c92   : > { %7274 = vmatprep.subr.bf16.mxu0 %v8570_v3 }
0x1c95   : > { %7276 = vmatpush3.bf16.msra.mxu0 %v7275_v38 }
0x1c96   : > { %7285 = vmatprep.subr.bf16.mxu0 %v8570_v3 }
0x1d63   : > { %v3965_v11 = vpop.f32.mrb[28].mxu0 }
0x1d64   : > { %3970 = vrot.lane.b32.xlu1 %v3965_v11, %s9885_s6  ;;  %v7013_v39 = vpop.f32.mrb[29].mxu0 }
0x1d68   : > { %4428 = vrot.lane.b32.xlu1 %v9464_v21, %s9884_s3 }
0x1dd6   : > { %v3971_v40 = vpop.permute.xlu1 %3970 }
0x1dd7   : > { %v3973_v41 = vadd.f32 %v3971_v40, %v9398_v50 }
0x1dd9   : > { %3974 = vst.msk [vmem:[#allocation2] sm:$0xff] %vm1998_vm8, %v3973_v41 }
0x1dda   : > { %v4429_v57 = vpop.permute.xlu1 %4428 }
0x1de0   : > { %v3975_v43 = vld [vmem:[#allocation2] sm:$0xff] }
0x1de1   : > { %7023 = vmatmul.mubr.msk.f32.vlgmr.msra.gmra.mrb[30].mxu0 %vm2012_vm9, %v3975_v43 }
0x1de2   : > { %7044 = vmatprep.mubr.msk.f32.mxu0 %vm8571_vm2, %v8572_v4  ;;  %7287 = vmatpush3.bf16.msra.mxu0 %v7286_v46 }
0x1de3   : > { %7288 = vmatprep.subr.bf16.mxu0 %v8570_v3 }
0x1de6   : > { %7290 = vmatpush3.bf16.msra.mxu0 %v7289_v51 }
0x1eb4   : > { %v4056_v50 = vpop.f32.mrb[30].mxu0 }
0x1eb5   : > { %v4057_v53 = vadd.f32 %v6567_v52, %v4056_v50  ;;  %v7024_v54 = vpop.f32.mrb[31].mxu0 }
0x1eb7   : > { %v4060_v55 = vmax.f32 %v4057_v53, 0.0 }
0x1eb9   : > { %v4061_v56 = vadd.f32 %v4060_v55, %v3975_v43 }
0x1ebb   : > { %7045 = vmatmul.mubr.msk.f32.vlgmr.msra.gmra.mrb[32].mxu0 %vm2012_vm9, %v4061_v56 }
0x1ebc   : > { %7059 = vmatprep.mubr.msk.f32.mxu0 %vm1286_vm3, %v4429_v57 }
0x1f8e   : > { %v4228_v59 = vpop.f32.mrb[32].mxu0 }
0x1f8f   : > { %v9499_v2 = vadd.f32 %v6572_v58, %v4228_v59  ;;  %v7046_v60 = vpop.f32.mrb[33].mxu0 }
0x1f91   : > { %4639 = vrot.lane.b32.xlu1 %v9499_v2, %s9880_s2  ;;  %4432 = vrot.lane.b32.xlu0 %v9499_v2, %s9884_s3 }
0x1f92   : > { %7047 = vmatprep.subr.msk.mxu1 %vm1286_vm3, %v9499_v2 }
0x1f93   : > { %7048 = vmatpush3.xpose.msk.msra.mxu1 %vm1286_vm3, %v9499_v2 }
0x1f95   : > { %4637 = vrot.lane.b32.xlu1 %v9471_v42, %s9880_s2  ;;  %4635 = vrot.lane.b32.xlu0 %v9464_v21, %s9880_s2 }
0x1f96   : > { %7050 = vmatmul.mubr.msk.f32.vlgmr.msra.gmra.mrb[32].mxu1 %vm1286_vm3, %v9471_v42 }
0x1f99   : > { %4842 = vrot.lane.b32.xlu1 %v9464_v21, %s9881_s23  ;;  %4846 = vrot.lane.b32.xlu0 %v9499_v2, %s9881_s23 }
0x1f9d   : > { %4844 = vrot.lane.b32.xlu0 %v9471_v42, %s9881_s23 }
0x2003   : > { %v4640_v62 = vpop.permute.xlu1 %4639  ;;  %v4433_v63 = vpop.permute.xlu0 %4432 }
0x2004   : > { %7057 = vmatprep.subr.msk.mxu0 %vm1286_vm3, %v4433_v63 }
0x2005   : > { %7058 = vmatpush3.xpose.msk.msra.mxu0 %vm1286_vm3, %v4433_v63 }
0x2006   : > { %7067 = vmatprep.subr.msk.mxu0 %vm1286_vm3, %v4640_v62 }
0x2007   : > { %v4638_v13 = vpop.permute.xlu1 %4637  ;;  %v4636_v6 = vpop.permute.xlu0 %4635 }
0x2008   : > { %7060 = vmatmul.mubr.msk.f32.vlgmr.msra.gmra.mrb[34].mxu0 %vm1286_vm3, %v4431_v61 }
0x2009   : > { %7068 = vmatpush3.xpose.msk.msra.mxu0 %vm1286_vm3, %v4640_v62  ;;  %7069 = vmatprep.mubr.msk.f32.mxu0 %vm1286_vm3, %v4636_v6 }
0x200b   : > { %v4843_v7 = vpop.permute.xlu1 %4842  ;;  %v4847_v8 = vpop.permute.xlu0 %4846 }
0x200c   : > { %7070 = vmatmul.mubr.msk.f32.vlgmr.msra.gmra.mrb[36].mxu0 %vm1286_vm3, %v4638_v13  ;;  %7077 = vmatprep.subr.msk.mxu0 %vm1286_vm3, %v4847_v8 }
0x200d   : > { %7078 = vmatpush3.xpose.msk.msra.mxu0 %vm1286_vm3, %v4847_v8  ;;  %7079 = vmatprep.mubr.msk.f32.mxu0 %vm1286_vm3, %v4843_v7 }
0x200f   : > { %v4845_v9 = vpop.permute.xlu0 %4844 }
0x2010   : > { %7080 = vmatmul.mubr.msk.f32.vlgmr.msra.gmra.mrb[38].mxu0 %vm1286_vm3, %v4845_v9 }
0x2069   : > { %v7051_v12 = vpop.f32.mrb[32].mxu1 }
0x206a   : > { %v4317_v14 = vmul.f32 0.17677669, %v7051_v12  ;;  %v4307_v15 = vpop.f32.mrb[33].mxu1 }
0x206b   : > { %v4316_v16 = vmul.f32 0.17677669, %v4307_v15 }
0x206c   : > { %v4321_v17 = vsel %vm1286_vm3, %v4317_v14, -inf }
0x206d   : > { %4322 = vmax.xlane.f32.xlu0 %v4321_v17  ;;  %v4318_v19 = vsel %vm1286_vm3, %v4316_v16, -inf }
0x206e   : > { %4319 = vmax.xlane.f32.xlu1 %v4318_v19 }
0x20db   : > { %v7061_v20 = vpop.f32.mrb[34].mxu0 }
0x20dc   : > { %v4516_v18 = vmul.f32 0.17677669, %v7061_v20  ;;  %v4506_v22 = vpop.f32.mrb[35].mxu0 }
0x20dd   : > { %v4515_v23 = vmul.f32 0.17677669, %v4506_v22 }
0x20de   : > { %v4520_v24 = vsel %vm1286_vm3, %v4516_v18, -inf }
0x20df   : > { %4521 = vmax.xlane.f32.xlu1 %v4520_v24  ;;  %v7071_v25 = vpop.f32.mrb[36].mxu0  ;;  %v4517_v26 = vsel %vm1286_vm3, %v4515_v23, -inf }
0x20e0   : > { %v4723_v27 = vmul.f32 0.17677669, %v7071_v25  ;;  %v4713_v28 = vpop.f32.mrb[37].mxu0  ;;  %4518 = vmax.xlane.f32.xlu0 %v4517_v26 }
0x20e1   : > { %v4722_v49 = vmul.f32 0.17677669, %v4713_v28 }
0x20e2   : > { %v4727_v29 = vsel %vm1286_vm3, %v4723_v27, -inf }
0x20e3   : > { %4728 = vmax.xlane.f32.xlu1 %v4727_v29  ;;  %v7081_v30 = vpop.f32.mrb[38].mxu0  ;;  %v4724_v31 = vsel %vm1286_vm3, %v4722_v49, -inf }
0x20e4   : > { %v4930_v32 = vmul.f32 0.17677669, %v7081_v30  ;;  %v4920_v33 = vpop.f32.mrb[39].mxu0  ;;  %4725 = vmax.xlane.f32.xlu0 %v4724_v31 }
0x20e5   : > { %v4929_v34 = vmul.f32 0.17677669, %v4920_v33 }
0x20e6   : > { %v4934_v0 = vsel %vm1286_vm3, %v4930_v32, -inf }
0x20e7   : > { %4935 = vmax.xlane.f32.xlu1 %v4934_v0  ;;  %v4931_v1 = vsel %vm1286_vm3, %v4929_v34, -inf }
0x20e8   : > { %4932 = vmax.xlane.f32.xlu0 %v4931_v1 }
0x20f8   : > { %4539 = vrot.lane.b32.xlu1 %v9499_v2, %s9879_s18 }
0x20fa   : > { %v4323_v5 = vpop.xlane.xlu0 %4322 }
0x20fb   : > { %v4320_v35 = vpop.xlane.xlu1 %4319  ;;  %v4325_v36 = vsub.f32 %v4317_v14, %v4323_v5 }
0x20fc   : > { %v4324_v37 = vsub.f32 %v4316_v16, %v4320_v35 }
0x20fd   : > { %v4328_v38 = vmul.f32 1.442695, %v4325_v36 }
0x20fe   : > { %4340 = vrot.lane.b32.xlu0 %v9499_v2, %s9886_s8  ;;  %v4326_v11 = vmul.f32 1.442695, %v4324_v37 }
0x20ff   : > { %7802 = vpow2.f32 %v4328_v38 }
0x2100   : > { %7804 = vpow2.f32 %v4326_v11 }
0x2109   : > { %v7803_v39 = vpop.eup %7802 }
0x210a   : > { %v7805_v40 = vpop.eup %7804  ;;  %v4333_v41 = vsel %vm1286_vm3, %v7803_v39, 0.0 }
0x210b   : > { %v4330_v43 = vsel %vm1286_vm3, %v7805_v40, 0.0 }
0x211c   : > { %4334 = vadd.xlane.f32.xlu1 %v4333_v41 }
0x211d   : > { %4331 = vadd.xlane.f32.xlu0 %v4330_v43 }
0x216c   : > { %v4522_v44 = vpop.xlane.xlu1 %4521 }
0x216d   : > { %v4524_v45 = vsub.f32 %v4516_v18, %v4522_v44  ;;  %v4519_v46 = vpop.xlane.xlu0 %4518 }
0x216e   : > { %v4523_v47 = vsub.f32 %v4515_v23, %v4519_v46 }
0x216f   : > { %v4527_v48 = vmul.f32 1.442695, %v4524_v45 }
0x2170   : > { %v4525_v51 = vmul.f32 1.442695, %v4523_v47  ;;  %v4729_v52 = vpop.xlane.xlu1 %4728  ;;  %v5051_v47 = vld [vmem:[%s9887_s9] sm:$0xff] }
0x2171   : > { %7806 = vpow2.f32 %v4527_v48  ;;  %v4731_v50 = vsub.f32 %v4723_v27, %v4729_v52  ;;  %v4726_v53 = vpop.xlane.xlu0 %4725  ;;  %v5052_v48 = vld [vmem:[%s9887_s9 + $0x8] sm:$0xff]  ;;  %v5053_v52 = vld [vmem:[%s9887_s9 + $0x10] sm:$0xff] }
0x2172   : > { %7808 = vpow2.f32 %v4525_v51  ;;  %v4730_v54 = vsub.f32 %v4722_v49, %v4726_v53  ;;  %v7291_v51 = vpack.c.bf16 %v5052_v48, %v5051_v47 }
0x2173   : > { %v4734_v55 = vmul.f32 1.442695, %v4731_v50  ;;  %v5054_v50 = vld [vmem:[%s9887_s9 + $0x18] sm:$0xff]  ;;  %s9888_s9 = sld [smem:[#allocation65_spill]] }
0x2174   : > { %v4732_v56 = vmul.f32 1.442695, %v4730_v54  ;;  %v4936_v57 = vpop.xlane.xlu1 %4935  ;;  %v7295_v54 = vpack.c.bf16 %v5054_v50, %v5053_v52  ;;  %7292 = vmatprep.subr.bf16.mxu0 %v7291_v51 }
0x2175   : > { %7810 = vpow2.f32 %v4734_v55  ;;  %v4938_v58 = vsub.f32 %v4930_v32, %v4936_v57  ;;  %v4933_v59 = vpop.xlane.xlu0 %4932  ;;  %7294 = vmatpush3.bf16.msra.mxu0 %v7291_v51 }
0x2176   : > { %7812 = vpow2.f32 %v4732_v56  ;;  %v4937_v60 = vsub.f32 %v4929_v34, %v4933_v59  ;;  %7296 = vmatprep.subr.bf16.mxu0 %v7295_v54 }
0x2177   : > { %v4941_v61 = vmul.f32 1.442695, %v4938_v58 }
0x2178   : > { %v4939_v62 = vmul.f32 1.442695, %v4937_v60  ;;  %v4540_v6 = vpop.permute.xlu1 %4539 }
0x2179   : > { %7814 = vpow2.f32 %v4941_v61  ;;  %v4341_v63 = vpop.permute.xlu0 %4340  ;;  %7298 = vmatpush3.bf16.msra.mxu0 %v7295_v54 }
0x217a   : > { %7816 = vpow2.f32 %v4939_v62  ;;  %7052 = vmatprep.subr.mxu1 %v4341_v63  ;;  %7307 = vmatprep.subr.bf16.mxu0 %v8570_v3 }
0x217b   : > { %v7807_v13 = vpop.eup %7806  ;;  %7053 = vmatpush3.msra.mxu1 %v4341_v63 }
0x217c   : > { %v7809_v7 = vpop.eup %7808  ;;  %7062 = vmatprep.subr.mxu1 %v4540_v6  ;;  %v4532_v8 = vsel %vm1286_vm3, %v7807_v13, 0.0 }
0x217d   : > { %4533 = vadd.xlane.f32.xlu1 %v4532_v8  ;;  %v4529_v9 = vsel %vm1286_vm3, %v7809_v7, 0.0 }
0x217e   : > { %4530 = vadd.xlane.f32.xlu0 %v4529_v9 }
0x217f   : > { %v7811_v12 = vpop.eup %7810 }
0x2180   : > { %v7813_v14 = vpop.eup %7812  ;;  %v4739_v15 = vsel %vm1286_vm3, %v7811_v12, 0.0 }
0x2181   : > { %4740 = vadd.xlane.f32.xlu1 %v4739_v15  ;;  %v4736_v16 = vsel %vm1286_vm3, %v7813_v14, 0.0 }
0x2182   : > { %4737 = vadd.xlane.f32.xlu0 %v4736_v16 }
0x2183   : > { %v7815_v17 = vpop.eup %7814 }
0x2184   : > { %v7817_v19 = vpop.eup %7816  ;;  %v4946_v20 = vsel %vm1286_vm3, %v7815_v17, 0.0 }
0x2185   : > { %4947 = vadd.xlane.f32.xlu1 %v4946_v20  ;;  %v4943_v18 = vsel %vm1286_vm3, %v7817_v19, 0.0  ;;  %v5149_v20 = vld [vmem:[#allocation32 + $0x8] sm:$0xff] }
0x2186   : > { %4944 = vadd.xlane.f32.xlu0 %v4943_v18 }
0x2196   : > { %4746 = vrot.lane.b32.xlu1 %v9499_v2, %s9882_s13 }
0x219c   : > { %4953 = vrot.lane.b32.xlu0 %v9499_v2, %s9883_s1 }
0x21a9   : > { %v4335_v22 = vpop.xlane.xlu1 %4334 }
0x21aa   : > { %7818 = vrcp.f32 %v4335_v22  ;;  %v4332_v23 = vpop.xlane.xlu0 %4331 }
0x21ab   : > { %7820 = vrcp.f32 %v4332_v23  ;;  %v6594_v23 = vld [vmem:[#allocation30] ss:$0 sm:$0xff] }
0x21b4   : > { %v7819_v24 = vpop.eup %7818 }
0x21b5   : > { %v7821_v25 = vpop.eup %7820  ;;  %v4339_v27 = vmul.f32 %v7819_v24, %v7803_v39 }
0x21b6   : > { %v4338_v26 = vmul.f32 %v7821_v25, %v7805_v40 }
0x21b8   : > { %7054 = vmatprep.mubr.msk.f32.mxu1 %vm1286_vm3, %v4338_v26 }
0x21b9   : > { %7055 = vmatmul.mubr.msk.f32.vlgmr.msra.gmra.mrb[34].mxu1 %vm1286_vm3, %v4339_v27 }
0x21ba   : > { %7063 = vmatpush3.msra.mxu1 %v4540_v6 }
0x220a   : > { %v4534_v28 = vpop.xlane.xlu1 %4533 }
0x220b   : > { %7822 = vrcp.f32 %v4534_v28  ;;  %v4531_v49 = vpop.xlane.xlu0 %4530 }
0x220c   : > { %7824 = vrcp.f32 %v4531_v49 }
0x220e   : > { %v4741_v29 = vpop.xlane.xlu1 %4740 }
0x220f   : > { %7826 = vrcp.f32 %v4741_v29  ;;  %v4738_v2 = vpop.xlane.xlu0 %4737 }
0x2210   : > { %7828 = vrcp.f32 %v4738_v2 }
0x2212   : > { %v4948_v30 = vpop.xlane.xlu1 %4947 }
0x2213   : > { %7830 = vrcp.f32 %v4948_v30  ;;  %v4945_v31 = vpop.xlane.xlu0 %4944  ;;  %v6597_v30 = vld [vmem:[%s9888_s9] ss:$0 sm:$0xff]  ;;  %s1182_s9 = sand.u32 1, %s8508_s16  }
0x2214   : > { %7832 = vrcp.f32 %v4945_v31 }
0x2215   : > { %v7823_v32 = vpop.eup %7822 }
0x2216   : > { %v7825_v33 = vpop.eup %7824  ;;  %v4747_v34 = vpop.permute.xlu1 %4746  ;;  %v4538_v1 = vmul.f32 %v7823_v32, %v7807_v13 }
0x2217   : > { %7072 = vmatprep.subr.mxu1 %v4747_v34  ;;  %v4537_v0 = vmul.f32 %v7825_v33, %v7809_v7  ;;  %v4954_v36 = vpop.permute.xlu0 %4953 }
0x2219   : > { %v7827_v5 = vpop.eup %7826  ;;  %7064 = vmatprep.mubr.msk.f32.mxu1 %vm1286_vm3, %v4537_v0 }
0x221a   : > { %v7829_v35 = vpop.eup %7828  ;;  %7065 = vmatmul.mubr.msk.f32.vlgmr.msra.gmra.mrb[36].mxu1 %vm1286_vm3, %v4538_v1  ;;  %v4745_v38 = vmul.f32 %v7827_v5, %v7811_v12  ;;  %v9606_v5 = vld [vmem:[#allocation8] sm:$0x1] }
0x221b   : > { %7073 = vmatpush3.msra.mxu1 %v4747_v34  ;;  %v4744_v37 = vmul.f32 %v7829_v35, %v7813_v14 }
0x221c   : > { %7082 = vmatprep.subr.mxu1 %v4954_v36 }
0x221d   : > { %v7831_v11 = vpop.eup %7830  ;;  %7074 = vmatprep.mubr.msk.f32.mxu1 %vm1286_vm3, %v4744_v37 }
0x221e   : > { %v7833_v39 = vpop.eup %7832  ;;  %7075 = vmatmul.mubr.msk.f32.vlgmr.msra.gmra.mrb[38].mxu1 %vm1286_vm3, %v4745_v38  ;;  %v4952_v41 = vmul.f32 %v7831_v11, %v7815_v17  ;;  %v5414_v11 = vlaneseq }
0x221f   : > { %7083 = vmatpush3.msra.mxu1 %v4954_v36  ;;  %v4951_v40 = vmul.f32 %v7833_v39, %v7817_v19  ;;  %v5148_v19 = vld [vmem:[#allocation32] sm:$0xff] }
0x2220   : > { %v7299_v18 = vpack.c.bf16 %v5149_v20, %v5148_v19  ;;  %v9615_v39 = vshrl.u32 %v5414_v11, 7 }
0x2221   : > { %7084 = vmatprep.mubr.msk.f32.mxu1 %vm1286_vm3, %v4951_v40 }
0x2222   : > { %7085 = vmatmul.mubr.msk.f32.vlgmr.msra.gmra.mrb[40].mxu1 %vm1286_vm3, %v4952_v41  ;;  %7300 = vmatprep.subr.bf16.mxu1 %v7299_v18  ;;  %v5416_v40 = vsub.s32 0, %v9615_v39 }
0x2223   : > { %7302 = vmatpush3.bf16.msra.mxu1 %v7299_v18 }
0x2224   : > { %v9619_v41 = vrot.slane %v9606_v5, %v5416_v40 }
0x228c   : > { %v7056_v43 = vpop.f32.mrb[34].mxu1 }
0x228d   : > { %v4425_v44 = vadd.f32 %v7056_v43, %v9471_v42  ;;  %v4415_v45 = vpop.f32.mrb[35].mxu1 }
0x228e   : > { %v4424_v46 = vadd.f32 %v4415_v45, %v9464_v21 }
0x228f   : > { %4427 = vst.msk [vmem:[#allocation2 + $0x8] sm:$0xff] %vm1286_vm3, %v4425_v44 }
0x2290   : > { %4426 = vst.msk [vmem:[#allocation2] sm:$0xff] %vm1286_vm3, %v4424_v46 }
0x22ed   : > { %v7066_v53 = vpop.f32.mrb[36].mxu1 }
0x22ee   : > { %4627 = vrot.lane.b32.xlu0 %v7066_v53, %s9875_s15  ;;  %v4614_v55 = vpop.f32.mrb[37].mxu1 }
0x22ef   : > { %4625 = vrot.lane.b32.xlu1 %v4614_v55, %s9875_s15 }
0x22f1   : > { %v7076_v56 = vpop.f32.mrb[38].mxu1 }
0x22f2   : > { %4834 = vrot.lane.b32.xlu0 %v7076_v56, %s9876_s10  ;;  %v4821_v57 = vpop.f32.mrb[39].mxu1 }
0x22f3   : > { %4832 = vrot.lane.b32.xlu1 %v4821_v57, %s9876_s10 }
0x22f5   : > { %v7086_v58 = vpop.f32.mrb[40].mxu1 }
0x22f6   : > { %5041 = vrot.lane.b32.xlu0 %v7086_v58, %s9885_s6  ;;  %v5028_v59 = vpop.f32.mrb[41].mxu1 }
0x22f7   : > { %5039 = vrot.lane.b32.xlu1 %v5028_v59, %s9885_s6 }
0x2360   : > { %v4628_v60 = vpop.permute.xlu0 %4627 }
0x2361   : > { %v4632_v61 = vadd.f32 %v4628_v60, %v9471_v42  ;;  %v4626_v62 = vpop.permute.xlu1 %4625 }
0x2362   : > { %v4631_v63 = vadd.f32 %v4626_v62, %v9464_v21 }
0x2363   : > { %4634 = vst.msk [vmem:[#allocation2 + $0x8] sm:$0xff] %vm1638_vm6, %v4632_v61 }
0x2364   : > { %4633 = vst.msk [vmem:[#allocation2] sm:$0xff] %vm1638_vm6, %v4631_v63  ;;  %v4835_v13 = vpop.permute.xlu0 %4834 }
0x2365   : > { %v4839_v6 = vadd.f32 %v4835_v13, %v9471_v42  ;;  %v4833_v7 = vpop.permute.xlu1 %4832 }
0x2366   : > { %v4838_v8 = vadd.f32 %v4833_v7, %v9464_v21 }
0x2367   : > { %4841 = vst.msk [vmem:[#allocation2 + $0x8] sm:$0xff] %vm1818_vm7, %v4839_v6 }
0x2368   : > { %4840 = vst.msk [vmem:[#allocation2] sm:$0xff] %vm1818_vm7, %v4838_v8  ;;  %v5042_v9 = vpop.permute.xlu0 %5041 }
0x2369   : > { %v5046_v12 = vadd.f32 %v5042_v9, %v9471_v42  ;;  %v5040_v14 = vpop.permute.xlu1 %5039  ;;  %v5150_v42 = vld [vmem:[#allocation32 + $0x10] sm:$0xff] }
0x236a   : > { %v5045_v15 = vadd.f32 %v5040_v14, %v9464_v21  ;;  %v5151_v21 = vld [vmem:[#allocation32 + $0x18] sm:$0xff] }
0x236b   : > { %5048 = vst.msk [vmem:[#allocation2 + $0x8] sm:$0xff] %vm1998_vm8, %v5046_v12  ;;  %v7303_v22 = vpack.c.bf16 %v5151_v21, %v5150_v42 }
0x236c   : > { %5047 = vst.msk [vmem:[#allocation2] sm:$0xff] %vm1998_vm8, %v5045_v15 }
0x236d   : > { %7304 = vmatprep.subr.bf16.mxu1 %v7303_v22 }
0x236e   : > { %7306 = vmatpush3.bf16.msra.mxu1 %v7303_v22 }
0x236f   : > { %7311 = vmatprep.subr.bf16.mxu1 %v8570_v3 }
0x2372   : > { %v5050_v17 = vld [vmem:[#allocation2 + $0x8] sm:$0xff] }
0x2373   : > { %v5049_v16 = vld [vmem:[#allocation2] sm:$0xff] }
0x2374   : > { %7095 = vmatprep.mubr.msk.f32.mxu0 %vm2012_vm9, %v5049_v16 }
0x2375   : > { %7096 = vmatmul.mubr.msk.f32.vlgmr.msra.gmra.mrb[40].mxu0 %vm2012_vm9, %v5050_v17 }
0x2376   : > { %7113 = vmatprep.mubr.msk.f32.mxu0 %vm8571_vm2, %v8572_v4 }
0x2448   : > { %v7097_v24 = vpop.f32.mrb[40].mxu0 }
0x2449   : > { %v5140_v25 = vadd.f32 %v7097_v24, %v6594_v23  ;;  %v5134_v26 = vpop.f32.mrb[41].mxu0 }
0x244a   : > { %v5135_v27 = vadd.f32 %v6594_v23, %v5134_v26 }
0x244b   : > { %v5144_v28 = vmax.f32 %v5140_v25, 0.0 }
0x244c   : > { %v5143_v49 = vmax.f32 %v5135_v27, 0.0 }
0x244d   : > { %v5146_v2 = vadd.f32 %v5144_v28, %v5050_v17 }
0x244e   : > { %v5145_v29 = vadd.f32 %v5143_v49, %v5049_v16 }
0x2450   : > { %7106 = vmatprep.mubr.msk.f32.mxu1 %vm2012_vm9, %v5145_v29 }
0x2451   : > { %7107 = vmatmul.mubr.msk.f32.vlgmr.msra.gmra.mrb[42].mxu1 %vm2012_vm9, %v5146_v2 }
0x2452   : > { %7120 = vmatprep.mubr.msk.f32.mxu1 %vm8571_vm2, %v8572_v4 }
0x2524   : > { %v7108_v31 = vpop.f32.mrb[42].mxu1 }
0x2525   : > { %v5237_v32 = vadd.f32 %v7108_v31, %v6597_v30  ;;  %v5231_v33 = vpop.f32.mrb[43].mxu1 }
0x2526   : > { %v5232_v34 = vadd.f32 %v6597_v30, %v5231_v33 }
0x2528   : > { %v7308_v0 = vpack.c.bf16 %v5237_v32, %v5232_v34  ;;  %v9601_v1 = vpack.i.bf16 %v5237_v32, %v5232_v34 }
0x252a   : > { %7310 = vmatpush3.bf16.xpose.msk.msra.mxu0 %vm9162_vm4, %v7308_v0 }
0x252b   : > { %7318 = vmatprep.subr.bf16.mxu0 %v8570_v3 }
0x2531   : > { %7114 = vmatmul.mubr.msk.f32.vlgmr.msra.gmra.mrb[42].mxu0 %vm1286_vm3, %v9606_v5 }
0x2532   : > { %7134 = vmatprep.mubr.msk.f32.mxu0 %vm8571_vm2, %v8572_v4 }
0x2604   : > { %v5315_v35 = vpop.f32.mrb[42].mxu0 }
0x2605   : > { %v5319_v36 = vmul.f32 0.17677669, %v5315_v35  ;;  %v7115_v37 = vpop.f32.mrb[43].mxu0 }
0x2607   : > { %v5321_v38 = vsel %vm5320_vm10, %v5319_v36, -inf }
0x2608   : > { %5322 = vmax.xlane.f32.xlu1 %v5321_v38 }
0x2619   : > { %7709 = vrot.lane.b32.xlu1 %v9601_v1, %s9884_s3 }
0x261d   : > { %5418 = vrot.lane.b32.xlu1 %v9619_v41, %s9884_s3 }
0x2695   : > { %v5323_v43 = vpop.xlane.xlu1 %5322 }
0x2696   : > { %v5324_v44 = vsub.f32 %v5319_v36, %v5323_v43 }
0x2698   : > { %v5325_v45 = vmul.f32 1.442695, %v5324_v44 }
0x2699   : > { %v7710_v54 = vpop.permute.xlu1 %7709 }
0x269a   : > { %7834 = vpow2.f32 %v5325_v45  ;;  %v7712_v56 = vunpack.i.h.bf16 %v7710_v54  ;;  %v7711_v57 = vunpack.i.l.bf16 %v7710_v54 }
0x269c   : > { %v7315_v59 = vpack.c.bf16 %v7712_v56, %v7711_v57  ;;  %v8583_v56 = vmov 1966171168  }
0x269d   : > { %v5419_v60 = vpop.permute.xlu1 %5418  ;;  %v5593_v57 = vunpack.c.l.s4 %v8583_v56 }
0x269f   : > { %v5594_v10 = vunpack.c.0.s8 %v5593_v57 }
0x26a4   : > { %v7835_v46 = vpop.eup %7834 }
0x26a5   : > { %v5327_v47 = vsel %vm5320_vm10, %v7835_v46, 0.0 }
0x26a6   : > { %5328 = vadd.xlane.f32.xlu0 %v5327_v47 }
0x26bc   : > { %7704 = vrot.lane.b32.xlu0 %v9601_v1, %s9886_s8  ;;  %s6161_s8 = scalar_lea.sflag [#allocation5], %s1182_s9 }
0x2733   : > { %v5329_v48 = vpop.xlane.xlu0 %5328 }
0x2734   : > { %7836 = vrcp.f32 %v5329_v48 }
0x2737   : > { %v7705_v51 = vpop.permute.xlu0 %7704 }
0x2738   : > { %v7707_v52 = vunpack.i.h.bf16 %v7705_v51  ;;  %v7706_v50 = vunpack.i.l.bf16 %v7705_v51 }
0x273a   : > { %v7312_v53 = vpack.c.bf16 %v7707_v52, %v7706_v50 }
0x273c   : > { %7313 = vmatpush3.bf16.msra.mxu1 %v7312_v53 }
0x273d   : > { %7314 = vmatprep.subr.bf16.mxu1 %v8570_v3 }
0x273e   : > { %v7837_v55 = vpop.eup %7836 }
0x273f   : > { %v5331_v58 = vmul.f32 %v7837_v55, %v7835_v46 }
0x2741   : > { %7121 = vmatmul.mubr.msk.f32.vlgmr.msra.gmra.mrb[44].mxu1 %vm1367_vm5, %v5331_v58  ;;  %v5597_v58 = vsub.s32 %v5594_v10, %v9615_v39 }
0x2742   : > { %7127 = vmatprep.mubr.msk.f32.mxu1 %vm8571_vm2, %v8572_v4 }
0x2745   : > { %7317 = vmatpush3.bf16.xpose.msk.msra.mxu1 %vm9162_vm4, %v7315_v59 }
0x2746   : > { %7325 = vmatprep.subr.bf16.mxu1 %v8570_v3 }
0x274c   : > { %7128 = vmatmul.mubr.msk.f32.vlgmr.msra.gmra.mrb[46].mxu1 %vm1286_vm3, %v5419_v60 }
0x274d   : > { %7148 = vmatprep.mubr.msk.f32.mxu1 %vm8571_vm2, %v8572_v4 }
0x2814   : > { %v5407_v61 = vpop.f32.mrb[44].mxu1 }
0x2815   : > { %v5411_v62 = vadd.f32 %v5407_v61, %v9606_v5  ;;  %v7122_v63 = vpop.f32.mrb[45].mxu1 }
0x2817   : > { %5413 = vst.msk [vmem:[#allocation2] sm:$0x1] %vm5412_vm11, %v5411_v62 }
0x281f   : > { %v5496_v13 = vpop.f32.mrb[46].mxu1 }
0x2820   : > { %v5500_v6 = vmul.f32 0.17677669, %v5496_v13  ;;  %v7129_v7 = vpop.f32.mrb[47].mxu1 }
0x2822   : > { %v5501_v8 = vsel %vm5320_vm10, %v5500_v6, -inf }
0x2823   : > { %5502 = vmax.xlane.f32.xlu0 %v5501_v8 }
0x2839   : > { %7714 = vrot.lane.b32.xlu0 %v9601_v1, %s9879_s18 }
0x283d   : > { %5612 = vrot.lane.b32.xlu0 %v9619_v41, %s9880_s2 }
0x28b0   : > { %v5503_v9 = vpop.xlane.xlu0 %5502 }
0x28b1   : > { %v5504_v12 = vsub.f32 %v5500_v6, %v5503_v9 }
0x28b3   : > { %v5505_v14 = vmul.f32 1.442695, %v5504_v12 }
0x28b4   : > { %v7715_v15 = vpop.permute.xlu0 %7714 }
0x28b5   : > { %7838 = vpow2.f32 %v5505_v14  ;;  %v7717_v16 = vunpack.i.h.bf16 %v7715_v15  ;;  %v7716_v17 = vunpack.i.l.bf16 %v7715_v15 }
0x28b7   : > { %v7319_v19 = vpack.c.bf16 %v7717_v16, %v7716_v17 }
0x28b8   : > { %v5613_v27 = vpop.permute.xlu0 %5612 }
0x28b9   : > { %7320 = vmatpush3.bf16.msra.mxu0 %v7319_v19 }
0x28ba   : > { %7321 = vmatprep.subr.bf16.mxu0 %v8570_v3 }
0x28bf   : > { %v7839_v20 = vpop.eup %7838 }
0x28c0   : > { %v5507_v18 = vsel %vm5320_vm10, %v7839_v20, 0.0 }
0x28c1   : > { %5508 = vadd.xlane.f32.xlu1 %v5507_v18 }
0x28d2   : > { %7719 = vrot.lane.b32.xlu1 %v9601_v1, %s9880_s2 }
0x294e   : > { %v5509_v42 = vpop.xlane.xlu1 %5508 }
0x294f   : > { %7840 = vrcp.f32 %v5509_v42  ;;  %v6001_v42 = vld [vmem:[#allocation33] sm:$0xff] }
0x2952   : > { %v7720_v21 = vpop.permute.xlu1 %7719 }
0x2953   : > { %v7722_v22 = vunpack.i.h.bf16 %v7720_v21  ;;  %v7721_v23 = vunpack.i.l.bf16 %v7720_v21  ;;  %v6002_v21 = vld [vmem:[#allocation33 + $0x8] sm:$0xff] }
0x2955   : > { %v7322_v26 = vpack.c.bf16 %v7722_v22, %v7721_v23  ;;  %v7336_v22 = vpack.c.bf16 %v6002_v21, %v6001_v42  ;;  %v6003_v23 = vld [vmem:[#allocation33 + $0x10] sm:$0xff] }
0x2959   : > { %v7841_v24 = vpop.eup %7840 }
0x295a   : > { %v5511_v25 = vmul.f32 %v7841_v24, %v7839_v20  ;;  %v6004_v24 = vld [vmem:[#allocation33 + $0x18] sm:$0xff] }
0x295c   : > { %7135 = vmatmul.mubr.msk.f32.vlgmr.msra.gmra.mrb[44].mxu0 %vm1367_vm5, %v5511_v25  ;;  %v7339_v25 = vpack.c.bf16 %v6004_v24, %v6003_v23 }
0x295d   : > { %7324 = vmatpush3.bf16.xpose.msk.msra.mxu0 %vm9162_vm4, %v7322_v26  ;;  %7141 = vmatprep.mubr.msk.f32.mxu0 %vm8571_vm2, %v8572_v4 }
0x295e   : > { %7332 = vmatprep.subr.bf16.mxu0 %v8570_v3 }
0x2964   : > { %7142 = vmatmul.mubr.msk.f32.vlgmr.msra.gmra.mrb[46].mxu0 %vm1286_vm3, %v5613_v27 }
0x2965   : > { %7162 = vmatprep.mubr.msk.f32.mxu0 %vm8571_vm2, %v8572_v4 }
0x2a2f   : > { %v9656_v28 = vpop.f32.mrb[44].mxu0 }
0x2a30   : > { %v7136_v49 = vpop.f32.mrb[45].mxu0 }
0x2a37   : > { %v5690_v29 = vpop.f32.mrb[46].mxu0 }
0x2a38   : > { %v5694_v2 = vmul.f32 0.17677669, %v5690_v29  ;;  %v7143_v30 = vpop.f32.mrb[47].mxu0 }
0x2a39   : > { %v6081_v30 = vld [vmem:[%s8733_s4] sm:$0xff] }
0x2a3a   : > { %v5695_v31 = vsel %vm5320_vm10, %v5694_v2, -inf }
0x2a3b   : > { %5696 = vmax.xlane.f32.xlu1 %v5695_v31  ;;  %v6082_v31 = vld [vmem:[%s8733_s4 + $0x8] sm:$0xff] }
0x2a4c   : > { %7729 = vrot.lane.b32.xlu1 %v9601_v1, %s9881_s23 }
0x2a50   : > { %5806 = vrot.lane.b32.xlu1 %v9619_v41, %s9881_s23 }
0x2ac8   : > { %v5697_v32 = vpop.xlane.xlu1 %5696 }
0x2ac9   : > { %v5698_v33 = vsub.f32 %v5694_v2, %v5697_v32  ;;  %v7342_v32 = vpack.c.bf16 %v6082_v31, %v6081_v30 }
0x2acb   : > { %v5699_v34 = vmul.f32 1.442695, %v5698_v33  ;;  %v6083_v33 = vld [vmem:[%s8733_s4 + $0x10] sm:$0xff] }
0x2acc   : > { %v7730_v43 = vpop.permute.xlu1 %7729 }
0x2acd   : > { %7842 = vpow2.f32 %v5699_v34  ;;  %v7732_v44 = vunpack.i.h.bf16 %v7730_v43  ;;  %v7731_v45 = vunpack.i.l.bf16 %v7730_v43  ;;  %v6084_v34 = vld [vmem:[%s8733_s4 + $0x18] sm:$0xff] }
0x2acf   : > { %v7329_v47 = vpack.c.bf16 %v7732_v44, %v7731_v45 }
0x2ad0   : > { %v5807_v48 = vpop.permute.xlu1 %5806 }
0x2ad7   : > { %v7843_v0 = vpop.eup %7842 }
0x2ad8   : > { %v5701_v35 = vsel %vm5320_vm10, %v7843_v0, 0.0 }
0x2ad9   : > { %5702 = vadd.xlane.f32.xlu0 %v5701_v35  ;;  %v6005_v35 = vld [vmem:[%s8728_s20] sm:$0x1] }
0x2aef   : > { %7724 = vrot.lane.b32.xlu0 %v9601_v1, %s9882_s13 }
0x2b66   : > { %v5703_v36 = vpop.xlane.xlu0 %5702 }
0x2b67   : > { %7844 = vrcp.f32 %v5703_v36 }
0x2b6a   : > { %v7725_v37 = vpop.permute.xlu0 %7724 }
0x2b6b   : > { %v7727_v38 = vunpack.i.h.bf16 %v7725_v37  ;;  %v7726_v11 = vunpack.i.l.bf16 %v7725_v37 }
0x2b6d   : > { %v7326_v40 = vpack.c.bf16 %v7727_v38, %v7726_v11 }
0x2b6f   : > { %7327 = vmatpush3.bf16.msra.mxu1 %v7326_v40  ;;  %v6085_v40 = vld [vmem:[%s8738_s29] sm:$0x1] }
0x2b70   : > { %7328 = vmatprep.subr.bf16.mxu1 %v8570_v3 }
0x2b71   : > { %v7845_v41 = vpop.eup %7844 }
0x2b72   : > { %v5705_v46 = vmul.f32 %v7845_v41, %v7843_v0  ;;  %v7345_v0 = vpack.c.bf16 %v6084_v34, %v6083_v33 }
0x2b74   : > { %7149 = vmatmul.mubr.msk.f32.vlgmr.msra.gmra.mrb[48].mxu1 %vm1367_vm5, %v5705_v46 }
0x2b75   : > { %7155 = vmatprep.mubr.msk.f32.mxu1 %vm8571_vm2, %v8572_v4 }
0x2b78   : > { %7331 = vmatpush3.bf16.xpose.msk.msra.mxu1 %vm9162_vm4, %v7329_v47 }
0x2b79   : > { %7341 = vmatprep.subr.bf16.mxu1 %v8570_v3 }
0x2b7f   : > { %7156 = vmatmul.mubr.msk.f32.vlgmr.msra.gmra.mrb[50].mxu1 %vm1286_vm3, %v5807_v48 }
0x2b80   : > { %7184 = vmatprep.mubr.msk.f32.mxu1 %vm8571_vm2, %v8572_v4  ;;  %7343 = vmatpush3.bf16.msra.mxu1 %v7342_v32 }
0x2b81   : > { %7344 = vmatprep.subr.bf16.mxu1 %v8570_v3 }
0x2b84   : > { %7346 = vmatpush3.bf16.msra.mxu1 %v7345_v0 }
0x2c47   : > { %v5781_v51 = vpop.f32.mrb[48].mxu1 }
0x2c48   : > { %v7150_v52 = vpop.f32.mrb[49].mxu1  ;;  %v5792_v59 = vrot.slane %v5781_v51, %v5597_v58 }
0x2c4a   : > { %v5799_v60 = vrot.slane %v5792_v59, %v5597_v58 }
0x2c52   : > { %v5884_v50 = vpop.f32.mrb[50].mxu1 }
0x2c53   : > { %v5888_v53 = vmul.f32 0.17677669, %v5884_v50  ;;  %v7157_v54 = vpop.f32.mrb[51].mxu1 }
0x2c55   : > { %v5889_v55 = vsel %vm5320_vm10, %v5888_v53, -inf }
0x2c56   : > { %5890 = vmax.xlane.f32.xlu0 %v5889_v55 }
0x2c6c   : > { %7734 = vrot.lane.b32.xlu0 %v9601_v1, %s9883_s1  ;;  %v5598_v1 = vrot.slane %v9656_v28, %v5597_v58  ;;  %s1183_s1 = scalar_lea.vmem [#allocation35], %s1182_s9 }
0x2c6d   : > { %s6173_s2 = sshll.u32 %s1183_s1, 4  ;;  %s9707_s2 = int_to_ptr.vmem [resolvable:$true] %s6173_s2 }
0x2c6e   : > { %v5605_v12 = vrot.slane %v5598_v1, %v5597_v58 }
0x2c70   : > { %5800 = vrot.lane.b32.xlu0 %v5799_v60, %s9876_s10  ;;  %s8410_s10 = scalar_lea.vmem %s9707_s2, 16 }
0x2c71   : > { %p8411_p10 = scmp.ne.s32.totalorder %s9707_s2, %s8410_s10 }
0x2c73   : > { %p8412_p8 = pnand %p8411_p10, %p9889_p7 }
0x2c75   : > { %p8413_p11 = pneg %p8412_p8 }
0x2ce3   : > { %v5891_v61 = vpop.xlane.xlu0 %5890 }
0x2ce4   : > { %v5892_v62 = vsub.f32 %v5888_v53, %v5891_v61 }
0x2ce6   : > { %v5893_v63 = vmul.f32 1.442695, %v5892_v62 }
0x2ce7   : > { %v7735_v13 = vpop.permute.xlu0 %7734 }
0x2ce8   : > { %7846 = vpow2.f32 %v5893_v63  ;;  %v7737_v6 = vunpack.i.h.bf16 %v7735_v13  ;;  %v7736_v7 = vunpack.i.l.bf16 %v7735_v13 }
0x2cea   : > { %v7333_v8 = vpack.c.bf16 %v7737_v6, %v7736_v7 }
0x2ceb   : > { %v5801_v15 = vpop.permute.xlu0 %5800 }
0x2cec   : > { %7334 = vmatpush3.bf16.msra.mxu0 %v7333_v8  ;;  %v5803_v19 = vadd.f32 %v5801_v15, %v9606_v5 }
0x2ced   : > { %7335 = vmatprep.subr.bf16.mxu0 %v8570_v3 }
0x2cf2   : > { %v7847_v9 = vpop.eup %7846 }
0x2cf3   : > { %v5895_v39 = vsel %vm5320_vm10, %v7847_v9, 0.0 }
0x2cf4   : > { %5896 = vadd.xlane.f32.xlu1 %v5895_v39 }
0x2d05   : > { %5606 = vrot.lane.b32.xlu1 %v5605_v12, %s9875_s15 }
0x2d81   : > { %v5897_v14 = vpop.xlane.xlu1 %5896 }
0x2d82   : > { %7848 = vrcp.f32 %v5897_v14 }
0x2d85   : > { %v5607_v16 = vpop.permute.xlu1 %5606 }
0x2d86   : > { %v5609_v17 = vadd.f32 %v5607_v16, %v9606_v5 }
0x2d88   : > { %5611 = vst.msk [vmem:[#allocation2] sm:$0x1] %vm5610_vm12, %v5609_v17 }
0x2d89   : > { %5805 = vst.msk [vmem:[#allocation2] sm:$0x1] %vm5804_vm13, %v5803_v19 }
0x2d8c   : > { %v7849_v20 = vpop.eup %7848 }
0x2d8d   : > { %v5899_v18 = vmul.f32 %v7849_v20, %v7847_v9 }
0x2d8f   : > { %7163 = vmatmul.mubr.msk.f32.vlgmr.msra.gmra.mrb[48].mxu0 %vm1367_vm5, %v5899_v18 }
0x2d90   : > { %7173 = vmatprep.mubr.msk.f32.mxu0 %vm8571_vm2, %v8572_v4  ;;  %7337 = vmatpush3.bf16.msra.mxu0 %v7336_v22 }
0x2d91   : > { %7338 = vmatprep.subr.bf16.mxu0 %v8570_v3 }
0x2d94   : > { %7340 = vmatpush3.bf16.msra.mxu0 %v7339_v25 }
0x2e62   : > { %v5975_v26 = vpop.f32.mrb[48].mxu0 }
0x2e63   : > { %v5986_v27 = vrot.slane %v5975_v26, %v5597_v58  ;;  %v7164_v28 = vpop.f32.mrb[49].mxu0 }
0x2e65   : > { %v5993_v49 = vrot.slane %v5986_v27, %v5597_v58 }
0x2e67   : > { %5994 = vrot.lane.b32.xlu1 %v5993_v49, %s9885_s6  ;;  %s6618_s6 = sshll.u32 %s8766_s22, 4  ;;  %s8584_s22 = smov [#allocation35]  }
0x2e68   : > { %s9705_s13 = scalar_lea.hbm %s8743_s5, %s6618_s6  ;;  %s8414_s15 = sshll.u32 %s8584_s22, 4  ;;  %s8415_s15 = int_to_ptr.vmem [resolvable:$false] %s8414_s15 }
0x2e69   : > { %s8416_s23 = scalar_lea.vmem %s8415_s15, 32  ;;  %p8417_p13 = scmp.lt.s32.totalorder %s9707_s2, %s8415_s15 }
0x2e6a   : > { %p8418_p0 = scmp.lt.s32.totalorder %s8416_s23, %s8410_s10 }
0x2e6c   : > { %p8419_p1 = por %p8418_p0, %p8417_p13 }
0x2e6e   : > { %p8420_p2 = pnand %p8419_p1, %p8413_p11 }
0x2ed9   : > { %v5995_v4 = vpop.permute.xlu1 %5994 }
0x2eda   : > { %v5997_v29 = vadd.f32 %v5995_v4, %v9606_v5 }
0x2edc   : > { %5999 = vst.msk [vmem:[#allocation2] sm:$0x1] %vm5998_vm14, %v5997_v29 }
0x2ee3   : > { %v6000_v2 = vld [vmem:[#allocation2] sm:$0x1] }
0x2ee4   : > { %7174 = vmatmul.mubr.msk.f32.vlgmr.msra.gmra.mrb[50].mxu0 %vm2012_vm9, %v6000_v2 }
0x2fb7   : > { %v6075_v5 = vpop.f32.mrb[50].mxu0 }
0x2fb8   : > { %v6076_v36 = vadd.f32 %v6075_v5, %v6005_v35  ;;  %v7175_v37 = vpop.f32.mrb[51].mxu0 }
0x2fba   : > { %v6079_v38 = vmax.f32 %v6076_v36, 0.0 }
0x2fbc   : > { %v6080_v11 = vadd.f32 %v6079_v38, %v6000_v2 }
0x2fbe   : > { %7185 = vmatmul.mubr.msk.f32.vlgmr.msra.gmra.mrb[52].mxu1 %vm2012_vm9, %v6080_v11 }
0x3091   : > { %v6155_v3 = vpop.f32.mrb[52].mxu1 }
0x3092   : > { %v6156_v43 = vadd.f32 %v6155_v3, %v6085_v40  ;;  %v7186_v41 = vpop.f32.mrb[53].mxu1 }
0x3094   : > { %6159 = vst.msk [vmem:[%s1183_s1] sm:$0x1] %vm5412_vm11, %v6156_v43 }
0x3095   : > { %8423 = shalt.err (!%p8420_p2)
}
0x3096   : > { %s8424_s3 = scalar_lea.hbm %s9705_s13, 16  ;;  %s8428_s18 = scalar_lea.hbm %s8743_s5, 32 }
0x3097   : > { %p8425_p3 = scmp.ne.s32.totalorder %s9705_s13, %s8424_s3  ;;  %p8429_p5 = scmp.lt.u32.totalorder %s9705_s13, %s8743_s5 }
0x3098   : > { %p8430_p6 = scmp.lt.u32.totalorder %s8428_s18, %s8424_s3  ;;  %p8432_p10 = scmp.lt.u32.totalorder %s8424_s3, %s9705_s13 }
0x3099   : > { %p8426_p4 = pnand %p8425_p3, %p9889_p7 }
0x309a   : > { %p8431_p9 = por %p8430_p6, %p8429_p5 }
0x309b   : > { %p8427_p12 = pneg %p8426_p4 }
0x309c   : > { %p8433_p8 = por %p8432_p10, %p8431_p9 }
0x309e   : > { %p8434_p11 = pnand %p8433_p8, %p8427_p12 }
0x30a0   : > { %8437 = shalt.err (!%p8434_p11)
}
0x30a1   : > { %7427 = dma.vmem_to_hbm [thread:$0]  (%p9889_p7), %s9707_s2, 16, %s9705_s13, %s6161_s8  }
0x30a2 PF: > { %s9890_s9 = sld [smem:[#allocation67_spill]]  ;;  %s9891_s6 = sld [smem:[#allocation71_spill]] }
0x30a3   : > { %p7534_p13 = scmp.ge.s32.totalorder %s8516_s0, 2 }
0x30a8   : > { %s6185_s1 = sand.u32 1, %s9890_s9   ;;  %p9892_p0 = scmp.ne.s32.totalorder %s9891_s6, 0 }
0x30a9   : > { %s6186_s10 = scalar_lea.sflag [#allocation5], %s6185_s1 }
0x30aa   : > { %p7491_p1 = pnand %p7534_p13, %p9892_p0 }
0x30ac   : > { %8499 = dma.done.wait (!%p7491_p1), %s6186_s10, 16  }
0x30ad   : > { %8501 = vsyncadd (!%p7491_p1), %s6186_s10, 4294967280  ;;  %s9893_s0 = sld [smem:[#allocation69_spill]]  ;;  %s9894_s22 = sld [smem:[#allocation68_spill]] }
0x30ae   : > { %s9895_s18 = sld [smem:[#allocation70_spill]]  ;;  %s9896_s15 = smov %s8508_s16 }
0x30b3   : > { %p82_p2 = scmp.ge.s32.totalorder %s9893_s0, 4   ;;  %s9897_s16 = smov %s9894_s22 }
0x30b5   :  { %84 = sbr.rel (!%p82_p2) target bundleno = 68 (0x44), region = 286 }
0x30bc   :  { %6190 = vsyncpa [#allocation4], 1 }
0x30bd   :  { %6192 = vsyncpa [#allocation4 + $0x1], 1 }
0x30be   :  { %6193 = vsyncpa [#allocation7], 1 }
0x30bf   :  { %6194 = vsyncpa [#allocation10], 1 }
0x30c0   :  { %6195 = vsyncpa [#allocation13], 1 }
0x30c1   :  { %6196 = vsyncpa [#allocation16], 1 }
0x30c2   :  { %6197 = vsyncpa [#allocation19], 1 }
0x30c3   :  { %6198 = vsyncpa [#allocation22], 1 }
0x30c4   :  { %6199 = vsyncpa [#allocation25], 1 }
0x30c5   :  { %6200 = vsyncpa [#allocation28], 1 }
0x30c6   :  { %6201 = vsyncpa [#allocation31], 1 }
0x30c7   :  { %6202 = vsyncpa [#allocation34], 1 }
0x30c8   :  { %6203 = vsyncpa [#allocation5], 1 }
0x30c9   :  { %6205 = vsyncpa [#allocation5 + $0x1], 1 }

</bundles_post_ra>
